<compile_context>
chip_gen: v5e
topology: v5e:2x2
jax: 0.10.0
libtpu: 0.0.40
codegen_flags: <defaults>
</compile_context>

<pallas_src>
import math

import jax
import jax.numpy as jnp
from jax import lax
from jax.experimental import pallas as pl
from jax.experimental.pallas import tpu as pltpu


def hash_counter_kernel(items_ref, w_ref, pow2_ref, buckets_ref, counts_ref):
    """One grid step processes a (tile_n, D) slab of items.

    items_ref   : (tile_n, D)     f32  -- items tile
    w_ref       : (D, C)          f32  -- hash_fn projection (sign-LSH)
    pow2_ref    : (1, C)          f32  -- powers of two, MSB first
    buckets_ref : (1, 1, tile_n)  i32  -- per-item bucket ids (lane-dense row)
    counts_ref  : (1, 1, B_pad)   f32  -- this tile's partial histogram
    """
    items = items_ref[...]
    tile_n = items.shape[0]
    b_pad = counts_ref.shape[-1]

    # hash_fn: sign-LSH -> binary codes in {0, 1}.
    proj = jnp.dot(items, w_ref[...], preferred_element_type=jnp.float32)    # (tn, C)
    codes = (proj > 0.0).astype(jnp.float32)                                 # (tn, C)
    pow2 = pow2_ref[...]                                                     # (1, C)

    # Lane-dense bucket ids for the output: (1, C) @ codes^T on the MXU.
    # (Exact in f32 for code_len <= 24 -- asserted in the wrapper.)
    bucket_row = lax.dot_general(
        pow2, codes, (((1,), (1,)), ((), ())),
        preferred_element_type=jnp.float32)                                  # (1, tn)
    buckets_ref[0] = bucket_row.astype(jnp.int32)

    # Column-form bucket ids for the histogram one-hot: a VPU weighted sum
    # over the tiny C axis (no degenerate (tn,C)@(C,1) matmul).
    bucket_col = jnp.sum(codes * pow2, axis=1, keepdims=True).astype(jnp.int32)  # (tn, 1)

    # Scatter-add histogram == compare-against-iota one-hot, with the N-axis
    # reduction pushed onto the otherwise idle MXU: ones(1,tn) @ onehot(tn,Bp).
    bucket_iota = lax.broadcasted_iota(jnp.int32, (tile_n, b_pad), 1)        # (tn, Bp)
    onehot = (bucket_col == bucket_iota).astype(jnp.float32)                 # (tn, Bp)
    ones_row = jnp.ones((1, tile_n), dtype=jnp.float32)
    counts_ref[0] = jnp.dot(ones_row, onehot,
                            preferred_element_type=jnp.float32)              # (1, Bp)


def hash_counter_forward(items, w, powers_of_two, num_hash_buckets, tile_n=1024):
    """Returns (hash_buckets: (N,) int32, counts: (num_hash_buckets,) f32).

    NOTE: PyTorch returns a LongTensor (int64); with JAX x64 disabled we return
    int32 bucket ids at the API boundary.
    """
    N, D = items.shape
    C = w.shape[1]
    # ceil(log2(B)) code bits can produce ids up to 2**C - 1; require B to be a
    # power of two so the histogram never silently drops out-of-range buckets.
    assert num_hash_buckets > 0 and (num_hash_buckets & (num_hash_buckets - 1)) == 0, \
        "num_hash_buckets must be a power of two"
    assert C <= 24, "bucket ids computed in f32; exact only for code_len <= 24"
    assert int(powers_of_two.size) == C

    tile_n = min(tile_n, N)
    assert tile_n % 8 == 0 and N % tile_n == 0, (N, tile_n)
    grid_n = N // tile_n
    # Pad the counts lane axis to a multiple of 128 -> unmasked vreg stores.
    b_pad = ((num_hash_buckets + 127) // 128) * 128

    pow2_row = jnp.asarray(powers_of_two, jnp.float32).reshape(1, C)

    buckets, partial_counts = pl.pallas_call(
        hash_counter_kernel,
        out_shape=(
            jax.ShapeDtypeStruct((grid_n, 1, tile_n), jnp.int32),
            jax.ShapeDtypeStruct((grid_n, 1, b_pad), jnp.float32),
        ),
        grid_spec=pltpu.PrefetchScalarGridSpec(
            num_scalar_prefetch=0,
            grid=(grid_n,),
            in_specs=[
                pl.BlockSpec((tile_n, D), lambda i: (i, 0)),        # items tile
                pl.BlockSpec((D, C), lambda i: (0, 0)),             # hash projection
                pl.BlockSpec((1, C), lambda i: (0, 0)),             # powers of two
            ],
            out_specs=[
                pl.BlockSpec((1, 1, tile_n), lambda i: (i, 0, 0)),  # buckets (lane-dense)
                pl.BlockSpec((1, 1, b_pad), lambda i: (i, 0, 0)),   # per-tile histogram
            ],
        ),
        # Per-tile partial histograms -> no resident accumulator -> the grid
        # axis is fully parallel (both TensorCores usable on v7x).
        compiler_params=pltpu.CompilerParams(
            dimension_semantics=("parallel",)),
    )(items, w, pow2_row)

    counts = jnp.sum(partial_counts, axis=(0, 1))[:num_hash_buckets]
    return buckets.reshape(N), counts


if __name__ == "__main__":
    # Small deterministic setup.
    num_hash_buckets = 16
    code_len = int(math.ceil(math.log2(num_hash_buckets)))  # 4
    N, D = 4096, 32
    tile_n = 1024

    key = jax.random.PRNGKey(0)
    k_items, k_w = jax.random.split(key)
    # Integer-valued f32 inputs keep the sign-LSH projection exactly
    # representable under any TPU matmul precision, so the kernel and the
    # pure-JAX reference agree bit-for-bit on the hash codes.
    items = jnp.round(jax.random.normal(k_items, (N, D), dtype=jnp.float32) * 4.0)
    w = jnp.round(jax.random.normal(k_w, (D, code_len), dtype=jnp.float32) * 4.0)
    powers_of_two = 2.0 ** jnp.arange(code_len - 1, -1, -1, dtype=jnp.float32)

    buckets, counts = hash_counter_forward(items, w, powers_of_two,
                                           num_hash_buckets, tile_n=tile_n)
    jax.block_until_ready((buckets, counts))

    # Pure-JAX reference for the same semantics.
    codes_ref = (items @ w > 0).astype(jnp.float32)
    buckets_ref = (codes_ref @ powers_of_two).astype(jnp.int32)
    counts_ref = jnp.zeros((num_hash_buckets,), jnp.float32).at[buckets_ref].add(1.0)

    assert buckets.shape == (N,) and counts.shape == (num_hash_buckets,)
    assert jnp.array_equal(buckets, buckets_ref)
    assert jnp.array_equal(counts, counts_ref)
    assert float(counts.sum()) == float(N)

    # TODO(synk): dynamic buffer registration keyed by the `accumulator` string
    # is Python-side module state with no kernel equivalent; this kernel always
    # produces a single `counts` histogram output.
    print("KERNEL_OK")
</pallas_src>

<mosaic_0001>
module attributes {stable_mosaic.version = 11 : i64} {
  func.func @hash_counter_kernel(%arg0: i32, %arg1: memref<1024x32xf32, #tpu.memory_space<vmem>>, %arg2: memref<32x4xf32, #tpu.memory_space<vmem>>, %arg3: memref<1x4xf32, #tpu.memory_space<vmem>>, %arg4: memref<1x1x1024xi32, #tpu.memory_space<vmem>>, %arg5: memref<1x1x128xf32, #tpu.memory_space<vmem>>) attributes {dimension_semantics = [#tpu.dimension_semantics<parallel>], iteration_bounds = array<i64: 4>, scalar_prefetch = 0 : i64, scratch_operands = 0 : i64, tpu.core_type = #tpu.core_type<tc>, window_params = [{transform_indices = @transform_0, window_bounds = array<i64: 1024, 32>}, {pipeline_mode = #tpu.pipeline_mode<synchronous>, transform_indices = @transform_1, window_bounds = array<i64: 32, 4>}, {pipeline_mode = #tpu.pipeline_mode<synchronous>, transform_indices = @transform_2, window_bounds = array<i64: 1, 4>}, {transform_indices = @transform_3, window_bounds = array<i64: 1, 1, 1024>}, {transform_indices = @transform_4, window_bounds = array<i64: 1, 1, 128>}]} {
    %c0 = arith.constant 0 : index
    %c0_0 = arith.constant 0 : index
    %0 = vector.load %arg1[%c0, %c0_0] : memref<1024x32xf32, #tpu.memory_space<vmem>>, vector<1024x32xf32>
    %c0_1 = arith.constant 0 : index
    %c0_2 = arith.constant 0 : index
    %1 = vector.load %arg2[%c0_1, %c0_2] : memref<32x4xf32, #tpu.memory_space<vmem>>, vector<32x4xf32>
    %cst = arith.constant dense<0.000000e+00> : vector<1024x4xf32>
    %2 = tpu.matmul %0, %1, %cst {dimension_numbers = #tpu.dot_dimension_numbers<[1], [0], [0], [1], [0, 0, 1, 1], [], []>} : vector<1024x32xf32>, vector<32x4xf32>, vector<1024x4xf32> -> vector<1024x4xf32>
    %cst_3 = arith.constant 0.000000e+00 : f32
    %3 = vector.broadcast %cst_3 : f32 to vector<1024x4xf32>
    %4 = arith.cmpf ogt, %2, %3 : vector<1024x4xf32>
    %5 = arith.extui %4 : vector<1024x4xi1> to vector<1024x4xi32>
    %6 = arith.sitofp %5 : vector<1024x4xi32> to vector<1024x4xf32>
    %c0_4 = arith.constant 0 : index
    %c0_5 = arith.constant 0 : index
    %7 = vector.load %arg3[%c0_4, %c0_5] : memref<1x4xf32, #tpu.memory_space<vmem>>, vector<1x4xf32>
    %cst_6 = arith.constant dense<0.000000e+00> : vector<1x1024xf32>
    %8 = tpu.matmul %7, %6, %cst_6 {dimension_numbers = #tpu.dot_dimension_numbers<[1], [1], [0], [0], [0, 0, 1, 0], [], []>} : vector<1x4xf32>, vector<1024x4xf32>, vector<1x1024xf32> -> vector<1x1024xf32>
    %9 = arith.fptosi %8 : vector<1x1024xf32> to vector<1x1024xi32>
    %c0_7 = arith.constant 0 : index
    %c0_8 = arith.constant 0 : index
    %c0_9 = arith.constant 0 : index
    %10 = vector.load %arg4[%c0_7, %c0_8, %c0_9] : memref<1x1x1024xi32, #tpu.memory_space<vmem>>, vector<1x1x1024xi32>
    %11 = vector.shape_cast %10 : vector<1x1x1024xi32> to vector<1x1024xi32>
    %12 = vector.shape_cast %9 : vector<1x1024xi32> to vector<1x1x1024xi32>
    tpu.vector_store %arg4[%c0_7, %c0_8, %c0_9], %12 {strides = array<i32>} : memref<1x1x1024xi32, #tpu.memory_space<vmem>>, vector<1x1x1024xi32>,
    %13 = vector.broadcast %7 : vector<1x4xf32> to vector<1024x4xf32>
    %14 = arith.mulf %6, %13 : vector<1024x4xf32>
    %cst_10 = arith.constant dense<0.000000e+00> : vector<1024xf32>
    %15 = vector.multi_reduction <add>, %14, %cst_10 [1] : vector<1024x4xf32> to vector<1024xf32>
    %16 = vector.shape_cast %15 : vector<1024xf32> to vector<1024x1xf32>
    %17 = arith.fptosi %16 : vector<1024x1xf32> to vector<1024x1xi32>
    %18 = tpu.iota {dimensions = array<i32: 1>} : vector<1024x128xi32>
    %19 = vector.broadcast %17 : vector<1024x1xi32> to vector<1024x128xi32>
    %20 = arith.cmpi eq, %19, %18 : vector<1024x128xi32>
    %21 = arith.extui %20 : vector<1024x128xi1> to vector<1024x128xi32>
    %22 = arith.sitofp %21 : vector<1024x128xi32> to vector<1024x128xf32>
    %cst_11 = arith.constant 1.000000e+00 : f32
    %23 = vector.broadcast %cst_11 : f32 to vector<1x1024xf32>
    %cst_12 = arith.constant dense<0.000000e+00> : vector<1x128xf32>
    %24 = tpu.matmul %23, %22, %cst_12 {dimension_numbers = #tpu.dot_dimension_numbers<[1], [0], [0], [1], [0, 0, 1, 1], [], []>} : vector<1x1024xf32>, vector<1024x128xf32>, vector<1x128xf32> -> vector<1x128xf32>
    %c0_13 = arith.constant 0 : index
    %c0_14 = arith.constant 0 : index
    %c0_15 = arith.constant 0 : index
    %25 = vector.load %arg5[%c0_13, %c0_14, %c0_15] : memref<1x1x128xf32, #tpu.memory_space<vmem>>, vector<1x1x128xf32>
    %26 = vector.shape_cast %25 : vector<1x1x128xf32> to vector<1x128xf32>
    %27 = vector.shape_cast %24 : vector<1x128xf32> to vector<1x1x128xf32>
    tpu.vector_store %arg5[%c0_13, %c0_14, %c0_15], %27 {strides = array<i32>} : memref<1x1x128xf32, #tpu.memory_space<vmem>>, vector<1x1x128xf32>,
    return
  }
  func.func @transform_0(%arg0: i32) -> (i32, i32) {
    %c0_i32 = arith.constant 0 : i32
    %c0_i32_0 = arith.constant 0 : i32
    return %arg0, %c0_i32 : i32, i32
  }
  func.func @transform_1(%arg0: i32) -> (i32, i32) {
    %c0_i32 = arith.constant 0 : i32
    %c0_i32_0 = arith.constant 0 : i32
    %c0_i32_1 = arith.constant 0 : i32
    return %c0_i32, %c0_i32_0 : i32, i32
  }
  func.func @transform_2(%arg0: i32) -> (i32, i32) {
    %c0_i32 = arith.constant 0 : i32
    %c0_i32_0 = arith.constant 0 : i32
    %c0_i32_1 = arith.constant 0 : i32
    return %c0_i32, %c0_i32_0 : i32, i32
  }
  func.func @transform_3(%arg0: i32) -> (i32, i32, i32) {
    %c0_i32 = arith.constant 0 : i32
    %c0_i32_0 = arith.constant 0 : i32
    %c0_i32_1 = arith.constant 0 : i32
    return %arg0, %c0_i32, %c0_i32_0 : i32, i32, i32
  }
  func.func @transform_4(%arg0: i32) -> (i32, i32, i32) {
    %c0_i32 = arith.constant 0 : i32
    %c0_i32_0 = arith.constant 0 : i32
    %c0_i32_1 = arith.constant 0 : i32
    return %arg0, %c0_i32, %c0_i32_0 : i32, i32, i32
  }
}

</mosaic_0001>

<bundles_post_ra>
// kernel: tpu_custom_call.1
= control target key start
LH: loop header
LB: loop body
LE: loop exit
PB: predicated region body
PF: predicated region fallthrough
CT: control target
= control target key end

     0   :  { %10 = vsyncpa [#allocation3], 0  ;;  %s8062_s0 = inlined_call_operand.vmem [shape: f32[4096,32], index: 0, kind: input, shape index: {}]   ;;  %s8063_s1 = inlined_call_operand.vmem [shape: f32[32,4], index: 1, kind: input, shape index: {}]   ;;  %s8064_s2 = inlined_call_operand.vmem [shape: f32[1,4], index: 2, kind: input, shape index: {}]   ;;  %s8065_s3 = inlined_call_operand.hbm [shape: s32[4,1,1024], index: 3, kind: output, shape index: {0}]   ;;  %s8066_s4 = inlined_call_operand.hbm [shape: f32[4,1,128], index: 4, kind: output, shape index: {1}]  }
   0x1   :  { %12 = vsyncpa [#allocation3 + $0x1], 0 }
   0x2   :  { %13 = vsyncpa [#allocation5], 0 }
   0x3   :  { %15 = vsyncpa [#allocation5 + $0x1], 0  ;;  %s4922_s15 = smov 0   ;;  %s4924_s16 = smov 0  }
   0x4   :  { %s4926_s17 = smov 0   ;;  %s4928_s18 = smov 0  }
   0x5 LB: > { %s4943_s19 = sadd.s32 4294967295, %s4893_s18   ;;  %s3398_s20 = sadd.s32 4294967294, %s4893_s18   ;;  %s4893_s18 = sphi %s4928_s18, %s8650_s18   ;;  %s4889_s17 = sphi %s4926_s17, %s8649_s17   ;;  %s4885_s16 = sphi %s4924_s16, %s8648_s16   ;;  %s4881_s15 = sphi %s4922_s15, %s8647_s15  }
   0x6   : > { %s4947_s21 = sadd.s32 1, %s4893_s18   ;;  %s96_s22 = sadd.s32 1, %s4889_s17 }
   0x7   : > { %s93_s23 = ssub.s32 %s4893_s18, %s4947_s21  ;;  %p106_p0 = scmp.ne.s32.totalorder %s4889_s17, %s4885_s16 }
   0x8   : > { %p94_p1 = scmp.eq.s32.totalorder %s93_s23, 0  ;;  %p107_p2 = scmp.eq.s32.totalorder %s4943_s19, 3 }
   0x9   : > { %p112_p3 = scmp.ne.s32.totalorder %s4885_s16, %s4881_s15  ;;  %p113_p4 = scmp.eq.s32.totalorder %s3398_s20, 3 }
   0xa   : > { %s4958_s24 = scalar_select %p94_p1, %s4889_s17, %s96_s22  }
   0xb   : > { %p4960_p5 = por %p107_p2, %p106_p0  ;;  %p4964_p6 = por %p113_p4, %p112_p3 }
   0xc   : > { %p3401_p7 = scmp.ge.s32.totalorder %s4893_s18, 1  ;;  %p172_p8 = scmp.lt.s32.totalorder %s4893_s18, 5 }
   0xe   : > { %p173_p9 = pnand %p3401_p7, %p172_p8 }
  0x10   : > { %176 = sbr.rel (%p173_p9) target bundleno = 949 (0x3b5), region = 32 }
  0x15   : > { %v339_v0 = vld [vmem:[%s8063_s1 + $0x18] sm:$0xff]  ;;  %v338_v1 = vld [vmem:[%s8063_s1 + $0x10] sm:$0xff]  ;;  %s3403_s5 = sshll.u32 %s4943_s19, 7  ;;  %v337_v2 = vld [vmem:[%s8063_s1 + $0x8] sm:$0xff]  ;;  %vm340_vm0 = vcmask 261120   ;;  %vm1511_vm3 = vcmask 31744  }
  0x16   : > { %737 = vmatpush.msra.mxu0 %v339_v0  ;;  %4057 = vmatpush.msra.mxu1 %v339_v0  ;;  %p203_p10 = scmp.lt.s32.totalorder %s3403_s5, 511  ;;  %v336_v3 = vld [vmem:[%s8063_s1] sm:$0xff]  ;;  %s8011_s7 = sand.u32 1, %s4885_s16  }
  0x17   : > { %4058 = vmatpush.msra.mxu2 %v339_v0  ;;  %4059 = vmatpush.msra.mxu3 %v339_v0  ;;  %s4054_s8 = sshll.u32 %s4943_s19, 3  ;;  %s3402_s9 = sshll.u32 %s8011_s7, 3 }
  0x18   : > { %738 = vmatpush.msra.mxu0 %v338_v1  ;;  %4060 = vmatpush.msra.mxu1 %v338_v1  ;;  %s8652_s5 = smov (!%p203_p10, %s3403_s5), 511  ;;  %s3293_s12 = scalar_lea.hbm %s8065_s3, %s4054_s8 }
  0x19   : > { %4061 = vmatpush.msra.mxu2 %v338_v1  ;;  %4062 = vmatpush.msra.mxu3 %v338_v1  ;;  %s3404_s10 = sshll.u32 %s8652_s5, 3  ;;  %s3297_s20 = sshll.u32 %s3293_s12, 4  ;;  %s3298_s20 = int_to_ptr.hbm [resolvable:$true] %s3297_s20 }
  0x1a   : > { %739 = vmatpush.msra.mxu0 %v337_v2  ;;  %4063 = vmatpush.msra.mxu1 %v337_v2  ;;  %s4986_s13 = scalar_lea.vmem %s8062_s0, %s3404_s10  ;;  %s3279_s22 = scalar_lea.sflag [#allocation3], %s8011_s7 }
  0x1b   : > { %4064 = vmatpush.msra.mxu2 %v337_v2  ;;  %4065 = vmatpush.msra.mxu3 %v337_v2  ;;  %v208_v4 = vld [vmem:[%s4986_s13] sm:$0xff]  ;;  %v263_v5 = vld [vmem:[%s4986_s13 + $0x1b8] sm:$0xff]  ;;  %v317_v7 = vld [vmem:[%s4986_s13 + $0x368] sm:$0xff]  ;;  %s4813_s23 = sshra.s32 %s3298_s20, 4  ;;  %s4819_s30 = scalar_lea.hbm %s8065_s3, 32  ;;  %s4814_s23 = int_to_ptr.hbm [resolvable:$true] %s4813_s23 }
  0x1c   : > { %740 = vmatpush.msra.mxu0 %v336_v3  ;;  %4066 = vmatpush.msra.mxu1 %v336_v3  ;;  %v291_v6 = vld [vmem:[%s4986_s13 + $0x298] sm:$0xff]  ;;  %v209_v8 = vld [vmem:[%s4986_s13 + $0x8] sm:$0xff]  ;;  %v264_v9 = vld [vmem:[%s4986_s13 + $0x1c0] sm:$0xff]  ;;  %s4815_s27 = scalar_lea.hbm %s4814_s23, 8  ;;  %p4820_p0 = scmp.lt.s32.totalorder %s4814_s23, %s8065_s3 }
  0x1d   : > { %4067 = vmatpush.msra.mxu2 %v336_v3  ;;  %4068 = vmatpush.msra.mxu3 %v336_v3  ;;  %v292_v10 = vld [vmem:[%s4986_s13 + $0x2a0] sm:$0xff]  ;;  %v318_v11 = vld [vmem:[%s4986_s13 + $0x370] sm:$0xff]  ;;  %v265_v13 = vld [vmem:[%s4986_s13 + $0x1c8] sm:$0xff]  ;;  %p4816_p11 = scmp.ne.s32.totalorder %s4814_s23, %s4815_s27  ;;  %p4821_p1 = scmp.lt.s32.totalorder %s4819_s30, %s4815_s27 }
  0x1e   : > { %3405 = vmatmul.msk.f32.vlgmr.msra.gmra.mxu0 %vm340_vm0, %v208_v4  ;;  %3460 = vmatmul.msk.f32.vlgmr.msra.gmra.mxu1 %vm340_vm0, %v263_v5  ;;  %v210_v12 = vld [vmem:[%s4986_s13 + $0x10] sm:$0xff]  ;;  %v293_v14 = vld [vmem:[%s4986_s13 + $0x2a8] sm:$0xff]  ;;  %v319_v15 = vld [vmem:[%s4986_s13 + $0x378] sm:$0xff] }
  0x1f   : > { %3488 = vmatmul.msk.f32.vlgmr.msra.gmra.mxu2 %vm340_vm0, %v291_v6  ;;  %3514 = vmatmul.msk.f32.vlgmr.msra.gmra.mxu3 %vm340_vm0, %v317_v7  ;;  %v211_v16 = vld [vmem:[%s4986_s13 + $0x18] sm:$0xff]  ;;  %v266_v17 = vld [vmem:[%s4986_s13 + $0x1d0] sm:$0xff]  ;;  %v320_v19 = vld [vmem:[%s4986_s13 + $0x380] sm:$0xff]  ;;  %p4817_p12 = pnand %p4816_p11, %p4960_p5  ;;  %p4822_p2 = por %p4821_p1, %p4820_p0 }
  0x20   : > { %v294_v18 = vld [vmem:[%s4986_s13 + $0x2b0] sm:$0xff]  ;;  %v212_v20 = vld [vmem:[%s4986_s13 + $0x20] sm:$0xff]  ;;  %v267_v21 = vld [vmem:[%s4986_s13 + $0x1d8] sm:$0xff] }
  0x21   : > { %v295_v22 = vld [vmem:[%s4986_s13 + $0x2b8] sm:$0xff]  ;;  %v321_v23 = vld [vmem:[%s4986_s13 + $0x388] sm:$0xff]  ;;  %v268_v25 = vld [vmem:[%s4986_s13 + $0x1e0] sm:$0xff]  ;;  %p4818_p13 = pneg %p4817_p12 }
  0x22   : > { %v213_v24 = vld [vmem:[%s4986_s13 + $0x28] sm:$0xff]  ;;  %v296_v26 = vld [vmem:[%s4986_s13 + $0x2c0] sm:$0xff]  ;;  %v322_v27 = vld [vmem:[%s4986_s13 + $0x390] sm:$0xff] }
  0x23   : > { %v214_v28 = vld [vmem:[%s4986_s13 + $0x30] sm:$0xff]  ;;  %v269_v29 = vld [vmem:[%s4986_s13 + $0x1e8] sm:$0xff]  ;;  %v323_v31 = vld [vmem:[%s4986_s13 + $0x398] sm:$0xff]  ;;  %p4823_p3 = pnand %p4822_p2, %p4818_p13 }
  0x24   : > { %v297_v30 = vld [vmem:[%s4986_s13 + $0x2c8] sm:$0xff]  ;;  %v215_v32 = vld [vmem:[%s4986_s13 + $0x38] sm:$0xff]  ;;  %v270_v33 = vld [vmem:[%s4986_s13 + $0x1f0] sm:$0xff] }
  0x25   : > { %v298_v34 = vld [vmem:[%s4986_s13 + $0x2d0] sm:$0xff]  ;;  %v324_v35 = vld [vmem:[%s4986_s13 + $0x3a0] sm:$0xff]  ;;  %v271_v37 = vld [vmem:[%s4986_s13 + $0x1f8] sm:$0xff] }
  0x26   : > { %3406 = vmatmul.msk.f32.gmra.mxu0 %vm340_vm0, %v209_v8  ;;  %3461 = vmatmul.msk.f32.gmra.mxu1 %vm340_vm0, %v264_v9  ;;  %v216_v36 = vld [vmem:[%s4986_s13 + $0x40] sm:$0xff]  ;;  %v299_v38 = vld [vmem:[%s4986_s13 + $0x2d8] sm:$0xff]  ;;  %v325_v39 = vld [vmem:[%s4986_s13 + $0x3a8] sm:$0xff] }
  0x27   : > { %3489 = vmatmul.msk.f32.gmra.mxu2 %vm340_vm0, %v292_v10  ;;  %3515 = vmatmul.msk.f32.gmra.mxu3 %vm340_vm0, %v318_v11  ;;  %v217_v40 = vld [vmem:[%s4986_s13 + $0x48] sm:$0xff]  ;;  %v272_v41 = vld [vmem:[%s4986_s13 + $0x200] sm:$0xff]  ;;  %v326_v43 = vld [vmem:[%s4986_s13 + $0x3b0] sm:$0xff]  ;;  %v8075_v11 = vmov 0.0  }
  0x28   : > { %v300_v42 = vld [vmem:[%s4986_s13 + $0x2e0] sm:$0xff]  ;;  %v218_v44 = vld [vmem:[%s4986_s13 + $0x50] sm:$0xff]  ;;  %v273_v45 = vld [vmem:[%s4986_s13 + $0x208] sm:$0xff] }
  0x29   : > { %v301_v46 = vld [vmem:[%s4986_s13 + $0x2e8] sm:$0xff]  ;;  %v327_v47 = vld [vmem:[%s4986_s13 + $0x3b8] sm:$0xff]  ;;  %v274_v49 = vld [vmem:[%s4986_s13 + $0x210] sm:$0xff] }
  0x2a   : > { %v219_v48 = vld [vmem:[%s4986_s13 + $0x58] sm:$0xff]  ;;  %v328_v50 = vld [vmem:[%s4986_s13 + $0x3c0] sm:$0xff]  ;;  %v302_v51 = vld [vmem:[%s4986_s13 + $0x2f0] sm:$0xff] }
  0x2b   : > { %v220_v52 = vld [vmem:[%s4986_s13 + $0x60] sm:$0xff]  ;;  %v275_v53 = vld [vmem:[%s4986_s13 + $0x218] sm:$0xff]  ;;  %v329_v54 = vld [vmem:[%s4986_s13 + $0x3c8] sm:$0xff] }
  0x2c   : > { %v303_v55 = vld [vmem:[%s4986_s13 + $0x2f8] sm:$0xff]  ;;  %v221_v56 = vld [vmem:[%s4986_s13 + $0x68] sm:$0xff]  ;;  %v276_v57 = vld [vmem:[%s4986_s13 + $0x220] sm:$0xff] }
  0x2d   : > { %v330_v58 = vld [vmem:[%s4986_s13 + $0x3d0] sm:$0xff]  ;;  %v304_v59 = vld [vmem:[%s4986_s13 + $0x300] sm:$0xff]  ;;  %v277_v61 = vld [vmem:[%s4986_s13 + $0x228] sm:$0xff] }
  0x2e   : > { %3407 = vmatmul.msk.f32.gmra.mxu0 %vm340_vm0, %v210_v12  ;;  %3462 = vmatmul.msk.f32.gmra.mxu1 %vm340_vm0, %v265_v13  ;;  %v222_v60 = vld [vmem:[%s4986_s13 + $0x70] sm:$0xff]  ;;  %v331_v62 = vld [vmem:[%s4986_s13 + $0x3d8] sm:$0xff]  ;;  %v305_v63 = vld [vmem:[%s4986_s13 + $0x308] sm:$0xff] }
  0x2f   : > { %3490 = vmatmul.msk.f32.gmra.mxu2 %vm340_vm0, %v293_v14  ;;  %3516 = vmatmul.msk.f32.gmra.mxu3 %vm340_vm0, %v319_v15  ;;  %v223_v0 = vld [vmem:[%s4986_s13 + $0x78] sm:$0xff]  ;;  %v278_v1 = vld [vmem:[%s4986_s13 + $0x230] sm:$0xff]  ;;  %v332_v2 = vld [vmem:[%s4986_s13 + $0x3e0] sm:$0xff] }
  0x30   : > { %v306_v3 = vld [vmem:[%s4986_s13 + $0x310] sm:$0xff]  ;;  %v5119_v4 = vld [vmem:[%s8064_s2] ss:$0 sm:$0xff]  ;;  %v279_v8 = vld [vmem:[%s4986_s13 + $0x238] sm:$0xff] }
  0x31   : > { %v224_v7 = vld [vmem:[%s4986_s13 + $0x80] sm:$0xff]  ;;  %v333_v9 = vld [vmem:[%s4986_s13 + $0x3e8] sm:$0xff]  ;;  %v307_v10 = vld [vmem:[%s4986_s13 + $0x318] sm:$0xff] }
  0x36   : > { %3408 = vmatmul.msk.f32.gmra.mxu0 %vm340_vm0, %v211_v16  ;;  %3463 = vmatmul.msk.f32.gmra.mxu1 %vm340_vm0, %v266_v17 }
  0x37   : > { %3491 = vmatmul.msk.f32.gmra.mxu2 %vm340_vm0, %v294_v18  ;;  %3517 = vmatmul.msk.f32.gmra.mxu3 %vm340_vm0, %v320_v19 }
  0x3e   : > { %3409 = vmatmul.msk.f32.gmra.mxu0 %vm340_vm0, %v212_v20  ;;  %3464 = vmatmul.msk.f32.gmra.mxu1 %vm340_vm0, %v267_v21  ;;  %v225_v21 = vld [vmem:[%s4986_s13 + $0x88] sm:$0xff] }
  0x3f   : > { %3492 = vmatmul.msk.f32.gmra.mxu2 %vm340_vm0, %v295_v22  ;;  %3518 = vmatmul.msk.f32.gmra.mxu3 %vm340_vm0, %v321_v23  ;;  %v280_v22 = vld [vmem:[%s4986_s13 + $0x240] sm:$0xff] }
  0x46   : > { %3410 = vmatmul.msk.f32.gmra.mxu0 %vm340_vm0, %v213_v24  ;;  %3465 = vmatmul.msk.f32.gmra.mxu1 %vm340_vm0, %v268_v25  ;;  %v308_v24 = vld [vmem:[%s4986_s13 + $0x320] sm:$0xff] }
  0x47   : > { %3493 = vmatmul.msk.f32.gmra.mxu2 %vm340_vm0, %v296_v26  ;;  %3519 = vmatmul.msk.f32.gmra.mxu3 %vm340_vm0, %v322_v27 }
  0x4e   : > { %3411 = vmatmul.msk.f32.gmra.mxu0 %vm340_vm0, %v214_v28  ;;  %3466 = vmatmul.msk.f32.gmra.mxu1 %vm340_vm0, %v269_v29 }
  0x4f   : > { %3494 = vmatmul.msk.f32.gmra.mxu2 %vm340_vm0, %v297_v30  ;;  %3520 = vmatmul.msk.f32.gmra.mxu3 %vm340_vm0, %v323_v31 }
  0x56   : > { %3412 = vmatmul.msk.f32.gmra.mxu0 %vm340_vm0, %v215_v32  ;;  %3467 = vmatmul.msk.f32.gmra.mxu1 %vm340_vm0, %v270_v33  ;;  %v334_v32 = vld [vmem:[%s4986_s13 + $0x3f0] sm:$0xff] }
  0x57   : > { %3495 = vmatmul.msk.f32.gmra.mxu2 %vm340_vm0, %v298_v34  ;;  %3521 = vmatmul.msk.f32.gmra.mxu3 %vm340_vm0, %v324_v35 }
  0x5e   : > { %3413 = vmatmul.msk.f32.gmra.mxu0 %vm340_vm0, %v216_v36  ;;  %3468 = vmatmul.msk.f32.gmra.mxu1 %vm340_vm0, %v271_v37  ;;  %v226_v36 = vld [vmem:[%s4986_s13 + $0x90] sm:$0xff] }
  0x5f   : > { %3496 = vmatmul.msk.f32.gmra.mxu2 %vm340_vm0, %v299_v38  ;;  %3522 = vmatmul.msk.f32.gmra.mxu3 %vm340_vm0, %v325_v39  ;;  %v281_v39 = vld [vmem:[%s4986_s13 + $0x248] sm:$0xff] }
  0x66   : > { %3414 = vmatmul.msk.f32.gmra.mxu0 %vm340_vm0, %v217_v40  ;;  %3469 = vmatmul.msk.f32.gmra.mxu1 %vm340_vm0, %v272_v41  ;;  %v309_v41 = vld [vmem:[%s4986_s13 + $0x328] sm:$0xff] }
  0x67   : > { %3497 = vmatmul.msk.f32.gmra.mxu2 %vm340_vm0, %v300_v42  ;;  %3523 = vmatmul.msk.f32.gmra.mxu3 %vm340_vm0, %v326_v43 }
  0x6e   : > { %3415 = vmatmul.msk.f32.gmra.mxu0 %vm340_vm0, %v218_v44  ;;  %3470 = vmatmul.msk.f32.gmra.mxu1 %vm340_vm0, %v273_v45 }
  0x6f   : > { %3498 = vmatmul.msk.f32.gmra.mxu2 %vm340_vm0, %v301_v46  ;;  %3524 = vmatmul.msk.f32.gmra.mxu3 %vm340_vm0, %v327_v47 }
  0x76   : > { %3416 = vmatmul.msk.f32.gmra.mxu0 %vm340_vm0, %v219_v48  ;;  %3471 = vmatmul.msk.f32.gmra.mxu1 %vm340_vm0, %v274_v49 }
  0x77   : > { %3525 = vmatmul.msk.f32.gmra.mxu3 %vm340_vm0, %v328_v50  ;;  %3499 = vmatmul.msk.f32.gmra.mxu2 %vm340_vm0, %v302_v51 }
  0x7e   : > { %3417 = vmatmul.msk.f32.gmra.mxu0 %vm340_vm0, %v220_v52  ;;  %3472 = vmatmul.msk.f32.gmra.mxu1 %vm340_vm0, %v275_v53 }
  0x7f   : > { %3526 = vmatmul.msk.f32.gmra.mxu3 %vm340_vm0, %v329_v54  ;;  %3500 = vmatmul.msk.f32.gmra.mxu2 %vm340_vm0, %v303_v55  ;;  %v227_v55 = vld [vmem:[%s4986_s13 + $0x98] sm:$0xff] }
  0x86   : > { %3418 = vmatmul.msk.f32.gmra.mxu0 %vm340_vm0, %v221_v56  ;;  %3473 = vmatmul.msk.f32.gmra.mxu1 %vm340_vm0, %v276_v57  ;;  %v282_v57 = vld [vmem:[%s4986_s13 + $0x250] sm:$0xff] }
  0x87   : > { %3527 = vmatmul.msk.f32.gmra.mxu3 %vm340_vm0, %v330_v58  ;;  %3501 = vmatmul.msk.f32.gmra.mxu2 %vm340_vm0, %v304_v59  ;;  %v310_v58 = vld [vmem:[%s4986_s13 + $0x330] sm:$0xff] }
  0x8e   : > { %3419 = vmatmul.msk.f32.gmra.mxu0 %vm340_vm0, %v222_v60  ;;  %3474 = vmatmul.msk.f32.gmra.mxu1 %vm340_vm0, %v277_v61 }
  0x8f   : > { %3528 = vmatmul.msk.f32.gmra.mxu3 %vm340_vm0, %v331_v62  ;;  %3502 = vmatmul.msk.f32.gmra.mxu2 %vm340_vm0, %v305_v63 }
  0x96   : > { %3420 = vmatmul.msk.f32.gmra.mxu0 %vm340_vm0, %v223_v0  ;;  %3475 = vmatmul.msk.f32.gmra.mxu1 %vm340_vm0, %v278_v1 }
  0x97   : > { %3529 = vmatmul.msk.f32.gmra.mxu3 %vm340_vm0, %v332_v2  ;;  %3503 = vmatmul.msk.f32.gmra.mxu2 %vm340_vm0, %v306_v3  ;;  %v335_v3 = vld [vmem:[%s4986_s13 + $0x3f8] sm:$0xff] }
  0x9b   : > { %v742_v5 = vpop.f32.mrf.mxu0  ;;  %v907_v6 = vpop.f32.mrf.mxu1 }
  0x9c   : > { %vm1126_vm1 = vcmp.gt.f32.partialorder %v742_v5, 0.0  ;;  %vm1181_vm2 = vcmp.gt.f32.partialorder %v907_v6, 0.0 }
  0x9d   : > { %v5126_v12 = vsel %vm1126_vm1, 1.0, %v8075_v11  ;;  %v5133_v14 = vsel %vm1181_vm2, 1.0, %v8075_v11 }
  0x9e   : > { %3421 = vmatmul.msk.f32.gmra.mxu0 %vm340_vm0, %v224_v7  ;;  %v2091_v13 = vmul.f32 %v5119_v4, %v5126_v12  ;;  %3476 = vmatmul.msk.f32.gmra.mxu1 %vm340_vm0, %v279_v8  ;;  %v2146_v18 = vmul.f32 %v5119_v4, %v5133_v14 }
  0x9f   : > { %3530 = vmatmul.msk.f32.gmra.mxu3 %vm340_vm0, %v333_v9  ;;  %3504 = vmatmul.msk.f32.gmra.mxu2 %vm340_vm0, %v307_v10 }
  0xa0   : > { %v2219_v15 = vsel %vm1511_vm3, %v2091_v13, 0.0  ;;  %v2384_v28 = vsel %vm1511_vm3, %v2146_v18, 0.0  ;;  %v228_v13 = vld [vmem:[%s4986_s13 + $0xa0] sm:$0xff]  ;;  %v311_v18 = vld [vmem:[%s4986_s13 + $0x338] sm:$0xff] }
  0xa1   : > { %2220 = vadd.xlane.f32.xlu0 %v2219_v15 }
  0xa2   : > { %v5138_v16 = vpop.f32.mrf.mxu2  ;;  %v1069_v17 = vpop.f32.mrf.mxu3 }
  0xa3   : > { %8206 = vst [vmem:[#allocation8_spill] sm:$0xff] %v5138_v16  ;;  %vm1235_vm4 = vcmp.gt.f32.partialorder %v1069_v17, 0.0  ;;  %v745_v19 = vpop.f32.mrf.mxu0  ;;  %v910_v20 = vpop.f32.mrf.mxu1  ;;  %v283_v17 = vld [vmem:[%s4986_s13 + $0x258] sm:$0xff]  ;;  %v254_v16 = vld [vmem:[%s4986_s13 + $0x170] sm:$0xff] }
  0xa4   : > { %vm1182_vm5 = vcmp.gt.f32.partialorder %v910_v20, 0.0  ;;  %v5145_v23 = vsel %vm1235_vm4, 1.0, %v8075_v11  ;;  %vm1127_vm6 = vcmp.gt.f32.partialorder %v745_v19, 0.0 }
  0xa5   : > { %8207 = vst [vmem:[#allocation9_spill] sm:$0xff] %v5145_v23  ;;  %v2200_v25 = vmul.f32 %v5119_v4, %v5145_v23  ;;  %v5151_v26 = vsel %vm1182_vm5, 1.0, %v8075_v11  ;;  %v5161_v30 = vsel %vm1127_vm6, 1.0, %v8075_v11 }
  0xa6   : > { %3422 = vmatmul.msk.f32.gmra.mxu0 %vm340_vm0, %v225_v21  ;;  %v2147_v27 = vmul.f32 %v5119_v4, %v5151_v26  ;;  %3477 = vmatmul.msk.f32.gmra.mxu1 %vm340_vm0, %v280_v22  ;;  %v2092_v38 = vmul.f32 %v5119_v4, %v5161_v30 }
  0xa7   : > { %v2546_v29 = vsel %vm1511_vm3, %v2200_v25, 0.0  ;;  %3505 = vmatmul.msk.f32.gmra.mxu2 %vm340_vm0, %v308_v24  ;;  %3531 = vmatmul.msk.f32.gmra.mxu3 %vm340_vm0, %v334_v32 }
  0xa8   : > { %2547 = vadd.xlane.f32.xlu2 %v2546_v29  ;;  %v2387_v31 = vsel %vm1511_vm3, %v2147_v27, 0.0  ;;  %v2222_v48 = vsel %vm1511_vm3, %v2092_v38, 0.0 }
  0xa9   : > { %2388 = vadd.xlane.f32.xlu1 %v2387_v31  ;;  %2385 = vadd.xlane.f32.xlu0 %v2384_v28  ;;  %v229_v31 = vld [vmem:[%s4986_s13 + $0xa8] sm:$0xff] }
  0xaa   : > { %v994_v33 = vpop.f32.mrf.mxu2  ;;  %v1072_v34 = vpop.f32.mrf.mxu3 }
  0xab   : > { %vm1210_vm7 = vcmp.gt.f32.partialorder %v994_v33, 0.0  ;;  %v748_v35 = vpop.f32.mrf.mxu0  ;;  %v913_v37 = vpop.f32.mrf.mxu1  ;;  %vm1236_vm10 = vcmp.gt.f32.partialorder %v1072_v34, 0.0 }
  0xac   : > { %v5171_v40 = vsel %vm1210_vm7, 1.0, %v8075_v11  ;;  %vm1128_vm8 = vcmp.gt.f32.partialorder %v748_v35, 0.0  ;;  %vm1183_vm9 = vcmp.gt.f32.partialorder %v913_v37, 0.0  ;;  %v5188_v47 = vsel %vm1236_vm10, 1.0, %v8075_v11  ;;  %v312_v35 = vld [vmem:[%s4986_s13 + $0x340] sm:$0xff] }
  0xad   : > { %8208 = vst [vmem:[#allocation10_spill] sm:$0xff] %v5171_v40  ;;  %v5175_v42 = vsel %vm1128_vm8, 1.0, %v8075_v11  ;;  %v2175_v43 = vmul.f32 %v5119_v4, %v5171_v40  ;;  %v5181_v44 = vsel %vm1183_vm9, 1.0, %v8075_v11  ;;  %v2201_v53 = vmul.f32 %v5119_v4, %v5188_v47 }
  0xae   : > { %3423 = vmatmul.msk.f32.gmra.mxu0 %vm340_vm0, %v226_v36  ;;  %v2093_v45 = vmul.f32 %v5119_v4, %v5175_v42  ;;  %3478 = vmatmul.msk.f32.gmra.mxu1 %vm340_vm0, %v281_v39  ;;  %8209 = vst [vmem:[#allocation11_spill] sm:$0xff] %v5188_v47  ;;  %v2148_v50 = vmul.f32 %v5119_v4, %v5181_v44  ;;  %v284_v36 = vld [vmem:[%s4986_s13 + $0x260] sm:$0xff] }
  0xaf   : > { %v2471_v46 = vsel %vm1511_vm3, %v2175_v43, 0.0  ;;  %3506 = vmatmul.msk.f32.gmra.mxu2 %vm340_vm0, %v309_v41  ;;  %v2549_v62 = vsel %vm1511_vm3, %v2201_v53, 0.0  ;;  %3532 = vmatmul.msk.f32.gmra.mxu3 %vm340_vm0, %v335_v3 }
  0xb0   : > { %2472 = vadd.xlane.f32.xlu2 %v2471_v46  ;;  %v2225_v49 = vsel %vm1511_vm3, %v2093_v45, 0.0  ;;  %v2390_v60 = vsel %vm1511_vm3, %v2148_v50, 0.0 }
  0xb1   : > { %2223 = vadd.xlane.f32.xlu0 %v2222_v48  ;;  %2226 = vadd.xlane.f32.xlu1 %v2225_v49 }
  0xb2   : > { %v997_v51 = vpop.f32.mrf.mxu2  ;;  %v1075_v52 = vpop.f32.mrf.mxu3 }
  0xb3   : > { %v751_v54 = vpop.f32.mrf.mxu0  ;;  %vm1211_vm11 = vcmp.gt.f32.partialorder %v997_v51, 0.0  ;;  %v916_v56 = vpop.f32.mrf.mxu1  ;;  %vm1237_vm13 = vcmp.gt.f32.partialorder %v1075_v52, 0.0  ;;  %v230_v51 = vld [vmem:[%s4986_s13 + $0xb0] sm:$0xff] }
  0xb4   : > { %vm1129_vm12 = vcmp.gt.f32.partialorder %v751_v54, 0.0  ;;  %vm1184_vm14 = vcmp.gt.f32.partialorder %v916_v56, 0.0  ;;  %v5205_v61 = vsel %vm1211_vm11, 1.0, %v8075_v11  ;;  %v5213_v0 = vsel %vm1237_vm13, 1.0, %v8075_v11  ;;  %v313_v54 = vld [vmem:[%s4986_s13 + $0x348] sm:$0xff] }
  0xb5   : > { %v5201_v59 = vsel %vm1129_vm12, 1.0, %v8075_v11  ;;  %8210 = vst [vmem:[#allocation12_spill] sm:$0xff] %v5205_v61  ;;  %v5216_v1 = vsel %vm1184_vm14, 1.0, %v8075_v11  ;;  %v2176_v5 = vmul.f32 %v5119_v4, %v5205_v61  ;;  %v2202_v8 = vmul.f32 %v5119_v4, %v5213_v0  ;;  %v238_v61 = vld [vmem:[%s4986_s13 + $0xf0] sm:$0xff] }
  0xb6   : > { %3424 = vmatmul.msk.f32.gmra.mxu0 %vm340_vm0, %v227_v55  ;;  %v2094_v63 = vmul.f32 %v5119_v4, %v5201_v59  ;;  %3479 = vmatmul.msk.f32.gmra.mxu1 %vm340_vm0, %v282_v57  ;;  %8211 = vst [vmem:[#allocation13_spill] sm:$0xff] %v5213_v0  ;;  %v2149_v9 = vmul.f32 %v5119_v4, %v5216_v1  ;;  %v285_v55 = vld [vmem:[%s4986_s13 + $0x268] sm:$0xff] }
  0xb7   : > { %3507 = vmatmul.msk.f32.gmra.mxu2 %vm340_vm0, %v310_v58  ;;  %v2474_v19 = vsel %vm1511_vm3, %v2176_v5, 0.0  ;;  %v2552_v20 = vsel %vm1511_vm3, %v2202_v8, 0.0 }
  0xb8   : > { %2391 = vadd.xlane.f32.xlu2 %v2390_v60  ;;  %v2228_v2 = vsel %vm1511_vm3, %v2094_v63, 0.0  ;;  %v2393_v21 = vsel %vm1511_vm3, %v2149_v9, 0.0 }
  0xb9   : > { %2550 = vadd.xlane.f32.xlu0 %v2549_v62  ;;  %2229 = vadd.xlane.f32.xlu1 %v2228_v2 }
  0xba   : > { %v1000_v6 = vpop.f32.mrf.mxu2  ;;  %v5223_v7 = vpop.f32.mrf.mxu3 }
  0xbb   : > { %v754_v10 = vpop.f32.mrf.mxu0  ;;  %v919_v15 = vpop.f32.mrf.mxu1  ;;  %vm1212_vm15 = vcmp.gt.f32.partialorder %v1000_v6, 0.0 }
  0xbc   : > { %vm1130_vm1 = vcmp.gt.f32.partialorder %v754_v10, 0.0  ;;  %v5239_v22 = vsel %vm1212_vm15, 1.0, %v8075_v11  ;;  %vm1185_vm4 = vcmp.gt.f32.partialorder %v919_v15, 0.0  ;;  %v231_v10 = vld [vmem:[%s4986_s13 + $0xb8] sm:$0xff] }
  0xbd   : > { %8212 = vst [vmem:[#allocation14_spill] sm:$0xff] %v5239_v22  ;;  %v5243_v24 = vsel %vm1130_vm1, 1.0, %v8075_v11  ;;  %v2177_v28 = vmul.f32 %v5119_v4, %v5239_v22  ;;  %v5263_v39 = vsel %vm1185_vm4, 1.0, %v8075_v11 }
  0xbe   : > { %3425 = vmatmul.msk.f32.gmra.mxu0 %vm340_vm0, %v228_v13  ;;  %3480 = vmatmul.msk.f32.gmra.mxu1 %vm340_vm0, %v283_v17  ;;  %v2095_v32 = vmul.f32 %v5119_v4, %v5243_v24  ;;  %v2150_v49 = vmul.f32 %v5119_v4, %v5263_v39  ;;  %v314_v17 = vld [vmem:[%s4986_s13 + $0x350] sm:$0xff] }
  0xbf   : > { %3508 = vmatmul.msk.f32.gmra.mxu2 %vm340_vm0, %v311_v18  ;;  %v2477_v38 = vsel %vm1511_vm3, %v2177_v28, 0.0  ;;  %v286_v18 = vld [vmem:[%s4986_s13 + $0x270] sm:$0xff] }
  0xc0   : > { %2475 = vadd.xlane.f32.xlu2 %v2474_v19  ;;  %v2231_v41 = vsel %vm1511_vm3, %v2095_v32, 0.0  ;;  %v2396_v58 = vsel %vm1511_vm3, %v2150_v49, 0.0 }
  0xc1   : > { %2553 = vadd.xlane.f32.xlu0 %v2552_v20  ;;  %2394 = vadd.xlane.f32.xlu1 %v2393_v21 }
  0xc2   : > { %v1003_v25 = vpop.f32.mrf.mxu2  ;;  %v5245_v27 = vpop.f32.mrf.mxu3 }
  0xc3   : > { %v757_v29 = vpop.f32.mrf.mxu0  ;;  %vm1213_vm2 = vcmp.gt.f32.partialorder %v1003_v25, 0.0  ;;  %v922_v33 = vpop.f32.mrf.mxu1 }
  0xc4   : > { %v5253_v34 = vsel %vm1213_vm2, 1.0, %v8075_v11  ;;  %vm1131_vm5 = vcmp.gt.f32.partialorder %v757_v29, 0.0  ;;  %vm1186_vm6 = vcmp.gt.f32.partialorder %v922_v33, 0.0 }
  0xc5   : > { %8213 = vst [vmem:[#allocation15_spill] sm:$0xff] %v5253_v34  ;;  %v2178_v37 = vmul.f32 %v5119_v4, %v5253_v34  ;;  %v5269_v45 = vsel %vm1131_vm5, 1.0, %v8075_v11  ;;  %v5284_v57 = vsel %vm1186_vm6, 1.0, %v8075_v11 }
  0xc6   : > { %3426 = vmatmul.msk.f32.gmra.mxu0 %vm340_vm0, %v229_v31  ;;  %3481 = vmatmul.msk.f32.gmra.mxu1 %vm340_vm0, %v284_v36  ;;  %v2096_v52 = vmul.f32 %v5119_v4, %v5269_v45  ;;  %v2151_v3 = vmul.f32 %v5119_v4, %v5284_v57 }
  0xc7   : > { %v2480_v43 = vsel %vm1511_vm3, %v2178_v37, 0.0  ;;  %3509 = vmatmul.msk.f32.gmra.mxu2 %vm340_vm0, %v312_v35  ;;  %v232_v37 = vld [vmem:[%s4986_s13 + $0xc0] sm:$0xff] }
  0xc8   : > { %2232 = vadd.xlane.f32.xlu2 %v2231_v41  ;;  %v2234_v62 = vsel %vm1511_vm3, %v2096_v52, 0.0  ;;  %v2399_v19 = vsel %vm1511_vm3, %v2151_v3, 0.0 }
  0xc9   : > { %2481 = vadd.xlane.f32.xlu0 %v2480_v43  ;;  %2478 = vadd.xlane.f32.xlu1 %v2477_v38  ;;  %v287_v43 = vld [vmem:[%s4986_s13 + $0x278] sm:$0xff] }
  0xca   : > { %v1006_v46 = vpop.f32.mrf.mxu2  ;;  %v5271_v48 = vpop.f32.mrf.mxu3 }
  0xcb   : > { %v760_v50 = vpop.f32.mrf.mxu0  ;;  %v925_v53 = vpop.f32.mrf.mxu1  ;;  %vm1214_vm9 = vcmp.gt.f32.partialorder %v1006_v46, 0.0 }
  0xcc   : > { %vm1132_vm7 = vcmp.gt.f32.partialorder %v760_v50, 0.0  ;;  %vm1187_vm8 = vcmp.gt.f32.partialorder %v925_v53, 0.0  ;;  %v5311_v21 = vsel %vm1214_vm9, 1.0, %v8075_v11 }
  0xcd   : > { %v5281_v56 = vsel %vm1132_vm7, 1.0, %v8075_v11  ;;  %v5293_v63 = vsel %vm1187_vm8, 1.0, %v8075_v11  ;;  %8215 = vst [vmem:[#allocation17_spill] sm:$0xff] %v5311_v21  ;;  %v2179_v31 = vmul.f32 %v5119_v4, %v5311_v21  ;;  %v239_v21 = vld [vmem:[%s4986_s13 + $0xf8] sm:$0xff] }
  0xce   : > { %3427 = vmatmul.msk.f32.gmra.mxu0 %vm340_vm0, %v230_v51  ;;  %v2097_v60 = vmul.f32 %v5119_v4, %v5281_v56  ;;  %3482 = vmatmul.msk.f32.gmra.mxu1 %vm340_vm0, %v285_v55  ;;  %v2152_v8 = vmul.f32 %v5119_v4, %v5293_v63 }
  0xcf   : > { %3510 = vmatmul.msk.f32.gmra.mxu2 %vm340_vm0, %v313_v54  ;;  %v2483_v46 = vsel %vm1511_vm3, %v2179_v31, 0.0 }
  0xd0   : > { %2235 = vadd.xlane.f32.xlu2 %v2234_v62  ;;  %v2237_v2 = vsel %vm1511_vm3, %v2097_v60, 0.0  ;;  %v2402_v25 = vsel %vm1511_vm3, %v2152_v8, 0.0 }
  0xd1   : > { %2397 = vadd.xlane.f32.xlu1 %v2396_v58  ;;  %2238 = vadd.xlane.f32.xlu0 %v2237_v2  ;;  %v233_v2 = vld [vmem:[%s4986_s13 + $0xc8] sm:$0xff] }
  0xd2   : > { %v1009_v5 = vpop.f32.mrf.mxu2  ;;  %v1087_v6 = vpop.f32.mrf.mxu3 }
  0xd3   : > { %v763_v9 = vpop.f32.mrf.mxu0  ;;  %vm1215_vm10 = vcmp.gt.f32.partialorder %v1009_v5, 0.0  ;;  %v928_v13 = vpop.f32.mrf.mxu1  ;;  %vm1241_vm11 = vcmp.gt.f32.partialorder %v1087_v6, 0.0 }
  0xd4   : > { %v5303_v15 = vsel %vm1215_vm10, 1.0, %v8075_v11  ;;  %v5317_v28 = vsel %vm1241_vm11, 1.0, %v8075_v11  ;;  %vm1133_vm15 = vcmp.gt.f32.partialorder %v763_v9, 0.0  ;;  %vm1188_vm2 = vcmp.gt.f32.partialorder %v928_v13, 0.0 }
  0xd5   : > { %8214 = vst [vmem:[#allocation16_spill] sm:$0xff] %v5303_v15  ;;  %v2180_v20 = vmul.f32 %v5119_v4, %v5303_v15  ;;  %v2206_v35 = vmul.f32 %v5119_v4, %v5317_v28  ;;  %v5346_v54 = vsel %vm1133_vm15, 1.0, %v8075_v11 }
  0xd6   : > { %3428 = vmatmul.msk.f32.gmra.mxu0 %vm340_vm0, %v231_v10  ;;  %3483 = vmatmul.msk.f32.gmra.mxu1 %vm340_vm0, %v286_v18  ;;  %v2098_v6 = vmul.f32 %v5119_v4, %v5346_v54  ;;  %v5361_v10 = vsel %vm1188_vm2, 1.0, %v8075_v11 }
  0xd7   : > { %v2486_v29 = vsel %vm1511_vm3, %v2180_v20, 0.0  ;;  %3511 = vmatmul.msk.f32.gmra.mxu2 %vm340_vm0, %v314_v17  ;;  %v2564_v50 = vsel %vm1511_vm3, %v2206_v35, 0.0 }
  0xd8   : > { %2400 = vadd.xlane.f32.xlu2 %v2399_v19  ;;  %v2240_v13 = vsel %vm1511_vm3, %v2098_v6, 0.0  ;;  %v315_v19 = vld [vmem:[%s4986_s13 + $0x358] sm:$0xff] }
  0xd9   : > { %2487 = vadd.xlane.f32.xlu1 %v2486_v29  ;;  %2403 = vadd.xlane.f32.xlu0 %v2402_v25 }
  0xda   : > { %v1012_v32 = vpop.f32.mrf.mxu2  ;;  %v5323_v33 = vpop.f32.mrf.mxu3 }
  0xdb   : > { %v766_v36 = vpop.f32.mrf.mxu0  ;;  %vm1216_vm12 = vcmp.gt.f32.partialorder %v1012_v32, 0.0  ;;  %v931_v38 = vpop.f32.mrf.mxu1  ;;  %v2153_v32 = vmul.f32 %v5119_v4, %v5361_v10  ;;  %vm1242_vm6 = vcmp.gt.f32.partialorder %v5323_v33, 0.0 }
  0xdc   : > { %v5329_v41 = vsel %vm1216_vm12, 1.0, %v8075_v11  ;;  %vm1189_vm13 = vcmp.gt.f32.partialorder %v931_v38, 0.0  ;;  %vm1134_vm14 = vcmp.gt.f32.partialorder %v766_v36, 0.0  ;;  %v234_v36 = vld [vmem:[%s4986_s13 + $0xd0] sm:$0xff] }
  0xdd   : > { %8216 = vst [vmem:[#allocation18_spill] sm:$0xff] %v5329_v41  ;;  %v2181_v49 = vmul.f32 %v5119_v4, %v5329_v41  ;;  %v5340_v52 = vsel %vm1189_vm13, 1.0, %v8075_v11  ;;  %v5343_v53 = vsel %vm1134_vm14, 1.0, %v8075_v11 }
  0xde   : > { %3429 = vmatmul.msk.f32.gmra.mxu0 %vm340_vm0, %v232_v37  ;;  %3484 = vmatmul.msk.f32.gmra.mxu1 %vm340_vm0, %v287_v43  ;;  %v2154_v60 = vmul.f32 %v5119_v4, %v5340_v52  ;;  %v2099_v3 = vmul.f32 %v5119_v4, %v5343_v53 }
  0xdf   : > { %v2489_v51 = vsel %vm1511_vm3, %v2181_v49, 0.0  ;;  %3512 = vmatmul.msk.f32.gmra.mxu2 %vm340_vm0, %v315_v19  ;;  %v2405_v49 = vsel %vm1511_vm3, %v2153_v32, 0.0 }
  0xe0   : > { %2484 = vadd.xlane.f32.xlu2 %v2483_v46  ;;  %v2408_v9 = vsel %vm1511_vm3, %v2154_v60, 0.0  ;;  %v2243_v17 = vsel %vm1511_vm3, %v2099_v3, 0.0  ;;  %v235_v3 = vld [vmem:[%s4986_s13 + $0xd8] sm:$0xff] }
  0xe1   : > { %2565 = vadd.xlane.f32.xlu1 %v2564_v50  ;;  %2490 = vadd.xlane.f32.xlu0 %v2489_v51  ;;  %v5388_v50 = vsel %vm1242_vm6, 1.0, %v8075_v11  ;;  %v316_v51 = vld [vmem:[%s4986_s13 + $0x360] sm:$0xff] }
  0xe2   : > { %v1015_v55 = vpop.f32.mrf.mxu2  ;;  %v1093_v58 = vpop.f32.mrf.mxu3 }
  0xe3   : > { %v769_v62 = vpop.f32.mrf.mxu0  ;;  %vm1217_vm1 = vcmp.gt.f32.partialorder %v1015_v55, 0.0  ;;  %v934_v5 = vpop.f32.mrf.mxu1  ;;  %vm1243_vm4 = vcmp.gt.f32.partialorder %v1093_v58, 0.0 }
  0xe4   : > { %v5357_v8 = vsel %vm1217_vm1, 1.0, %v8075_v11  ;;  %v5365_v18 = vsel %vm1243_vm4, 1.0, %v8075_v11  ;;  %vm1135_vm7 = vcmp.gt.f32.partialorder %v769_v62, 0.0  ;;  %v2207_v62 = vmul.f32 %v5119_v4, %v5388_v50 }
  0xe5   : > { %8217 = vst [vmem:[#allocation19_spill] sm:$0xff] %v5357_v8  ;;  %v2182_v20 = vmul.f32 %v5119_v4, %v5357_v8  ;;  %v2208_v31 = vmul.f32 %v5119_v4, %v5365_v18  ;;  %v5392_v33 = vsel %vm1135_vm7, 1.0, %v8075_v11  ;;  %vm1190_vm9 = vcmp.gt.f32.partialorder %v934_v5, 0.0 }
  0xe6   : > { %3430 = vmatmul.msk.f32.gmra.mxu0 %vm340_vm0, %v233_v2  ;;  %v2567_v19 = vsel %vm1511_vm3, %v2207_v62, 0.0 }
  0xe7   : > { %v2492_v38 = vsel %vm1511_vm3, %v2182_v20, 0.0  ;;  %v2570_v46 = vsel %vm1511_vm3, %v2208_v31, 0.0  ;;  %3513 = vmatmul.msk.f32.gmra.mxu2 %vm340_vm0, %v316_v51  ;;  %v5411_v20 = vsel %vm1190_vm9, 1.0, %v8075_v11 }
  0xe8   : > { %2244 = vadd.xlane.f32.xlu2 %v2243_v17 }
  0xe9   : > { %2409 = vadd.xlane.f32.xlu0 %v2408_v9  ;;  %2241 = vadd.xlane.f32.xlu1 %v2240_v13  ;;  %v2100_v9 = vmul.f32 %v5119_v4, %v5392_v33 }
  0xea   : > { %v1018_v25 = vpop.f32.mrf.mxu2  ;;  %v1096_v29 = vpop.f32.mrf.mxu3 }
  0xeb   : > { %v5376_v35 = vpop.f32.mrf.mxu0  ;;  %vm1244_vm5 = vcmp.gt.f32.partialorder %v1096_v29, 0.0  ;;  %v937_v37 = vpop.f32.mrf.mxu1  ;;  %v2246_v5 = vsel %vm1511_vm3, %v2100_v9, 0.0  ;;  %vm1218_vm11 = vcmp.gt.f32.partialorder %v1018_v25, 0.0 }
  0xec   : > { %v5383_v43 = vsel %vm1244_vm5, 1.0, %v8075_v11  ;;  %vm1191_vm10 = vcmp.gt.f32.partialorder %v937_v37, 0.0  ;;  %vm1136_vm1 = vcmp.gt.f32.partialorder %v5376_v35, 0.0 }
  0xed   : > { %v2209_v55 = vmul.f32 %v5119_v4, %v5383_v43  ;;  %v5414_v29 = vsel %vm1191_vm10, 1.0, %v8075_v11 }
  0xee   : > { %3431 = vmatmul.msk.f32.gmra.mxu0 %vm340_vm0, %v234_v36  ;;  %v2155_v36 = vmul.f32 %v5119_v4, %v5411_v20  ;;  %v2156_v37 = vmul.f32 %v5119_v4, %v5414_v29 }
  0xef   : > { %v2573_v17 = vsel %vm1511_vm3, %v2209_v55, 0.0 }
  0xf0   : > { %2493 = vadd.xlane.f32.xlu2 %v2492_v38  ;;  %v2414_v62 = vsel %vm1511_vm3, %v2156_v37, 0.0 }
  0xf1   : > { %2571 = vadd.xlane.f32.xlu0 %v2570_v46  ;;  %2406 = vadd.xlane.f32.xlu1 %v2405_v49  ;;  %v236_v49 = vld [vmem:[%s4986_s13 + $0xe0] sm:$0xff] }
  0xf2   : > { %v1021_v58 = vpop.f32.mrf.mxu2  ;;  %v5396_v60 = vpop.f32.mrf.mxu3 }
  0xf3   : > { %v775_v2 = vpop.f32.mrf.mxu0  ;;  %vm1219_vm8 = vcmp.gt.f32.partialorder %v1021_v58, 0.0  ;;  %v940_v6 = vpop.f32.mrf.mxu1  ;;  %v2411_v58 = vsel %vm1511_vm3, %v2155_v36, 0.0  ;;  %v237_v36 = vld [vmem:[%s4986_s13 + $0xe8] sm:$0xff]  ;;  %vm1245_vm4 = vcmp.gt.f32.partialorder %v5396_v60, 0.0 }
  0xf4   : > { %v5407_v13 = vsel %vm1219_vm8, 1.0, %v8075_v11  ;;  %vm1137_vm13 = vcmp.gt.f32.partialorder %v775_v2, 0.0  ;;  %vm1192_vm14 = vcmp.gt.f32.partialorder %v940_v6, 0.0  ;;  %v5462_v6 = vsel %vm1136_vm1, 1.0, %v8075_v11 }
  0xf5   : > { %8218 = vst [vmem:[#allocation20_spill] sm:$0xff] %v5407_v13  ;;  %v2184_v31 = vmul.f32 %v5119_v4, %v5407_v13  ;;  %v241_v13 = vld [vmem:[%s4986_s13 + $0x108] sm:$0xff] }
  0xf6   : > { %3432 = vmatmul.msk.f32.gmra.mxu0 %vm340_vm0, %v235_v3  ;;  %v5431_v3 = vsel %vm1218_vm11, 1.0, %v8075_v11 }
  0xf7   : > { %v2498_v55 = vsel %vm1511_vm3, %v2184_v31, 0.0  ;;  %8219 = vst [vmem:[#allocation21_spill] sm:$0xff] %v5431_v3  ;;  %v2183_v2 = vmul.f32 %v5119_v4, %v5431_v3 }
  0xf8   : > { %2574 = vadd.xlane.f32.xlu2 %v2573_v17  ;;  %v5437_v17 = vsel %vm1137_vm13, 1.0, %v8075_v11 }
  0xf9   : > { %2568 = vadd.xlane.f32.xlu1 %v2567_v19  ;;  %2247 = vadd.xlane.f32.xlu0 %v2246_v5  ;;  %v2102_v37 = vmul.f32 %v5119_v4, %v5437_v17 }
  0xfa   : > { %v1102_v32 = vpop.f32.mrf.mxu3  ;;  %v1024_v38 = vpop.f32.mrf.mxu2 }
  0xfb   : > { %v778_v46 = vpop.f32.mrf.mxu0  ;;  %v5424_v51 = vpop.f32.mrf.mxu1  ;;  %vm1220_vm12 = vcmp.gt.f32.partialorder %v1024_v38, 0.0  ;;  %vm1246_vm15 = vcmp.gt.f32.partialorder %v1102_v32, 0.0  ;;  %v2252_v40 = vsel %vm1511_vm3, %v2102_v37, 0.0 }
  0xfc   : > { %v5434_v9 = vsel %vm1220_vm12, 1.0, %v8075_v11  ;;  %vm1138_vm5 = vcmp.gt.f32.partialorder %v778_v46, 0.0  ;;  %vm1193_vm6 = vcmp.gt.f32.partialorder %v5424_v51, 0.0 }
  0xfd   : > { %8220 = vst [vmem:[#allocation22_spill] sm:$0xff] %v5434_v9  ;;  %v2185_v19 = vmul.f32 %v5119_v4, %v5434_v9  ;;  %v3545_v34 = vsel %vm1138_vm5, 1.0, %v8075_v11  ;;  %v5507_v51 = vsel %vm1193_vm6, 1.0, %v8075_v11  ;;  %v245_v9 = vld [vmem:[%s4986_s13 + $0x128] sm:$0xff] }
  0xfe   : > { %3433 = vmatmul.msk.f32.gmra.mxu0 %vm340_vm0, %v236_v49  ;;  %v5453_v49 = vsel %vm1192_vm14, 1.0, %v8075_v11 }
  0xff   : > { %v2157_v35 = vmul.f32 %v5119_v4, %v5453_v49 }
 0x100   : > { %2499 = vadd.xlane.f32.xlu2 %v2498_v55  ;;  %v2495_v55 = vsel %vm1511_vm3, %v2183_v2, 0.0 }
 0x101   : > { %2412 = vadd.xlane.f32.xlu1 %v2411_v58  ;;  %2415 = vadd.xlane.f32.xlu0 %v2414_v62  ;;  %v2501_v58 = vsel %vm1511_vm3, %v2185_v19, 0.0  ;;  %v5458_v62 = vsel %vm1246_vm15, 1.0, %v8075_v11 }
 0x102   : > { %v1105_v25 = vpop.f32.mrf.mxu3  ;;  %v5443_v5 = vpop.f32.mrf.mxu2  ;;  %v2211_v2 = vmul.f32 %v5119_v4, %v5458_v62 }
 0x103   : > { %v5445_v31 = vpop.f32.mrf.mxu0  ;;  %v946_v38 = vpop.f32.mrf.mxu1  ;;  %vm1247_vm2 = vcmp.gt.f32.partialorder %v1105_v25, 0.0  ;;  %v5483_v25 = vsel %vm1245_vm4, 1.0, %v8075_v11  ;;  %vm1221_vm12 = vcmp.gt.f32.partialorder %v5443_v5, 0.0 }
 0x104   : > { %v2579_v22 = vsel %vm1511_vm3, %v2211_v2, 0.0  ;;  %v2210_v23 = vmul.f32 %v5119_v4, %v5483_v25  ;;  %vm1194_vm8 = vcmp.gt.f32.partialorder %v946_v38, 0.0  ;;  %vm1139_vm10 = vcmp.gt.f32.partialorder %v5445_v31, 0.0 }
 0x105   : > { %v5510_v38 = vsel %vm1194_vm8, 1.0, %v8075_v11  ;;  %v8221_v31 = vmov 0.0  }
 0x106   : > { %3434 = vmatmul.msk.f32.gmra.mxu0 %vm340_vm0, %v237_v36 }
 0x108   : > { %2253 = vadd.xlane.f32.xlu2 %v2252_v40  ;;  %v2101_v40 = vmul.f32 %v5119_v4, %v5462_v6 }
 0x109   : > { %2496 = vadd.xlane.f32.xlu1 %v2495_v55  ;;  %2502 = vadd.xlane.f32.xlu0 %v2501_v58  ;;  %v2417_v55 = vsel %vm1511_vm3, %v2157_v35, 0.0  ;;  %v5478_v58 = vsel %vm1247_vm2, 1.0, %v8075_v11 }
 0x10a   : > { %v5466_v32 = vpop.f32.mrf.mxu3  ;;  %v5470_v19 = vpop.f32.mrf.mxu2  ;;  %v2249_v60 = vsel %vm1511_vm3, %v2101_v40, 0.0  ;;  %v2212_v46 = vmul.f32 %v5119_v4, %v5478_v58  ;;  %v2103_v40 = vmul.f32 %v5119_v4, %v3545_v34 }
 0x10b   : > { %v784_v36 = vpop.f32.mrf.mxu0  ;;  %v949_v37 = vpop.f32.mrf.mxu1  ;;  %vm1248_vm15 = vcmp.gt.f32.partialorder %v5466_v32, 0.0 }
 0x10c   : > { %vm1140_vm9 = vcmp.gt.f32.partialorder %v784_v36, 0.0  ;;  %v2255_v36 = vsel %vm1511_vm3, %v2103_v40, 0.0  ;;  %v240_v40 = vld [vmem:[%s4986_s13 + $0x100] sm:$0xff]  ;;  %vm1195_vm11 = vcmp.gt.f32.partialorder %v949_v37, 0.0 }
 0x10e   : > { %3435 = vmatmul.msk.f32.gmra.mxu0 %vm340_vm0, %v238_v61 }
 0x110   : > { %2418 = vadd.xlane.f32.xlu2 %v2417_v55  ;;  %v2582_v55 = vsel %vm1511_vm3, %v2212_v46, 0.0  ;;  %v3547_v46 = vsel %vm1140_vm9, 1.0, %v8075_v11 }
 0x111   : > { %2580 = vadd.xlane.f32.xlu0 %v2579_v22  ;;  %2250 = vadd.xlane.f32.xlu1 %v2249_v60  ;;  %v2576_v60 = vsel %vm1511_vm3, %v2210_v23, 0.0 }
 0x112   : > { %v1111_v35 = vpop.f32.mrf.mxu3  ;;  %v5491_v61 = vpop.f32.mrf.mxu2 }
 0x113   : > { %v787_v2 = vpop.f32.mrf.mxu0  ;;  %v5504_v47 = vpop.f32.mrf.mxu1  ;;  %vm1249_vm13 = vcmp.gt.f32.partialorder %v1111_v35, 0.0 }
 0x114   : > { %vm1141_vm7 = vcmp.gt.f32.partialorder %v787_v2, 0.0  ;;  %v2159_v2 = vmul.f32 %v5119_v4, %v5510_v38  ;;  %v5539_v5 = vsel %vm1249_vm13, 1.0, %v8221_v31  ;;  %vm1196_vm5 = vcmp.gt.f32.partialorder %v5504_v47, 0.0 }
 0x115   : > { %v5497_v22 = vsel %vm1141_vm7, 1.0, %v8075_v11  ;;  %v2105_v11 = vmul.f32 %v5119_v4, %v3547_v46  ;;  %v2214_v8 = vmul.f32 %v5119_v4, %v5539_v5  ;;  %v5619_v47 = vsel %vm1196_vm5, 1.0, %v8221_v31 }
 0x116   : > { %3436 = vmatmul.msk.f32.gmra.mxu0 %vm340_vm0, %v239_v21  ;;  %3661 = vmatpush.xpose.msk.msrb.mxu1 %vm1511_vm3, %v5497_v22  ;;  %v2158_v21 = vmul.f32 %v5119_v4, %v5507_v51  ;;  %v2423_v41 = vsel %vm1511_vm3, %v2159_v2, 0.0 }
 0x117   : > { %v2261_v37 = vsel %vm1511_vm3, %v2105_v11, 0.0 }
 0x118   : > { %2583 = vadd.xlane.f32.xlu2 %v2582_v55  ;;  %v2420_v0 = vsel %vm1511_vm3, %v2158_v21, 0.0 }
 0x119   : > { %2577 = vadd.xlane.f32.xlu1 %v2576_v60  ;;  %2256 = vadd.xlane.f32.xlu0 %v2255_v36  ;;  %v3546_v60 = vsel %vm1139_vm10, 1.0, %v8221_v31  ;;  %v5531_v36 = vsel %vm1195_vm11, 1.0, %v8221_v31 }
 0x11a   : > { %3662 = vmatpush.xpose.msk.msrb.mxu1 %vm1511_vm3, %v3547_v46  ;;  %v5516_v23 = vpop.f32.mrf.mxu3  ;;  %v1036_v15 = vpop.f32.mrf.mxu2  ;;  %v5536_v46 = vsel %vm1221_vm12, 1.0, %v8221_v31 }
 0x11b   : > { %v5522_v55 = vpop.f32.mrf.mxu0  ;;  %8222 = vst [vmem:[#allocation23_spill] sm:$0xff] %v5536_v46  ;;  %v5542_v35 = vpop.f32.mrf.mxu1  ;;  %v2186_v2 = vmul.f32 %v5119_v4, %v5536_v46  ;;  %vm1224_vm1 = vcmp.gt.f32.partialorder %v1036_v15, 0.0  ;;  %vm1250_vm8 = vcmp.gt.f32.partialorder %v5516_v23, 0.0 }
 0x11c   : > { %v5583_v32 = vpop.xlane.xlu1 %2388  ;;  %v5586_v15 = vsel %vm1224_vm1, 1.0, %v8221_v31  ;;  %vm1197_vm6 = vcmp.gt.f32.partialorder %v5542_v35, 0.0  ;;  %v5652_v23 = vsel %vm1250_vm8, 1.0, %v8221_v31  ;;  %vm1142_vm12 = vcmp.gt.f32.partialorder %v5522_v55, 0.0 }
 0x11d   : > { %8223 = vst [vmem:[#allocation24_spill] sm:$0xff] %v5583_v32  ;;  %v5622_v35 = vsel %vm1197_vm6, 1.0, %v8221_v31  ;;  %v5690_v55 = vsel %vm1142_vm12, 1.0, %v8221_v31 }
 0x11e   : > { %3437 = vmatmul.msk.f32.gmra.mxu0 %vm340_vm0, %v240_v40  ;;  %3663 = vmatpush.xpose.msk.msrb.mxu1 %vm1511_vm3, %v3546_v60  ;;  %v2160_v40 = vmul.f32 %v5119_v4, %v5531_v36  ;;  %8224 = vst [vmem:[#allocation25_spill] sm:$0xff] %v5586_v15 }
 0x120   : > { %2262 = vadd.xlane.f32.xlu2 %v2261_v37  ;;  %v2588_v37 = vsel %vm1511_vm3, %v2214_v8, 0.0  ;;  %v2106_v8 = vmul.f32 %v5119_v4, %v5497_v22 }
 0x121   : > { %2421 = vadd.xlane.f32.xlu1 %v2420_v0  ;;  %2424 = vadd.xlane.f32.xlu0 %v2423_v41  ;;  %v2426_v0 = vsel %vm1511_vm3, %v2160_v40, 0.0  ;;  %v2504_v41 = vsel %vm1511_vm3, %v2186_v2, 0.0  ;;  %v2104_v2 = vmul.f32 %v5119_v4, %v3546_v60 }
 0x122   : > { %3664 = vmatpush.xpose.msk.msrb.mxu1 %vm1511_vm3, %v3545_v34  ;;  %v1117_v21 = vpop.f32.mrf.mxu3  ;;  %v5552_v11 = vpop.f32.mrf.mxu2  ;;  %v2264_v60 = vsel %vm1511_vm3, %v2106_v8, 0.0 }
 0x123   : > { %v793_v3 = vpop.f32.mrf.mxu0  ;;  %vm1251_vm14 = vcmp.gt.f32.partialorder %v1117_v21, 0.0  ;;  %vm1225_vm9 = vcmp.gt.f32.partialorder %v5552_v11, 0.0 }
 0x124   : > { %v5559_v34 = vsel %vm1251_vm14, 1.0, %v8221_v31  ;;  %vm1143_vm2 = vcmp.gt.f32.partialorder %v793_v3, 0.0  ;;  %v2258_v3 = vsel %vm1511_vm3, %v2104_v2, 0.0  ;;  %v5655_v11 = vsel %vm1225_vm9, 1.0, %v8221_v31 }
 0x125   : > { %v2216_v21 = vmul.f32 %v5119_v4, %v5559_v34  ;;  %v5589_v22 = vsel %vm1143_vm2, 1.0, %v8221_v31  ;;  %8229 = vst [vmem:[#allocation30_spill] sm:$0xff] %v5655_v11 }
 0x126   : > { %3438 = vmatmul.msk.f32.gmra.mxu0 %vm340_vm0, %v241_v13  ;;  %3665 = vmatpush.xpose.msk.msrb.mxu1 %vm1511_vm3, %v5437_v17  ;;  %v5567_v13 = vpop.f32.mrf.mxu1  ;;  %v242_v17 = vld [vmem:[%s4986_s13 + $0x110] sm:$0xff]  ;;  %v2108_v2 = vmul.f32 %v5119_v4, %v5589_v22 }
 0x127   : > { %vm1198_vm14 = vcmp.gt.f32.partialorder %v5567_v13, 0.0 }
 0x128   : > { %2427 = vadd.xlane.f32.xlu2 %v2426_v0  ;;  %v2594_v0 = vsel %vm1511_vm3, %v2216_v21, 0.0  ;;  %v2189_v21 = vmul.f32 %v5119_v4, %v5586_v15 }
 0x129   : > { %2505 = vadd.xlane.f32.xlu1 %v2504_v41  ;;  %2589 = vadd.xlane.f32.xlu0 %v2588_v37  ;;  %v5581_v41 = vsel %vm1248_vm15, 1.0, %v8221_v31  ;;  %v5593_v37 = vpop.xlane.xlu0 %2220 }
 0x12a   : > { %3666 = vmatpush.xpose.msk.msrb.mxu1 %vm1511_vm3, %v5462_v6  ;;  %v1042_v6 = vpop.f32.mrf.mxu2  ;;  %8225 = vst [vmem:[#allocation26_spill] sm:$0xff] %v5593_v37 }
 0x12b   : > { %v5569_v40 = vpop.f32.mrf.mxu0  ;;  %vm1226_vm4 = vcmp.gt.f32.partialorder %v1042_v6, 0.0  ;;  %v2270_v6 = vsel %vm1511_vm3, %v2108_v2, 0.0 }
 0x12c   : > { %vm1144_vm15 = vcmp.gt.f32.partialorder %v5569_v40, 0.0 }
 0x12e   : > { %3439 = vmatmul.msk.f32.gmra.mxu0 %vm340_vm0, %v242_v17  ;;  %3667 = vmatpush.xpose.msk.msrb.mxu1 %vm1511_vm3, %v5392_v33  ;;  %v2213_v33 = vmul.f32 %v5119_v4, %v5581_v41  ;;  %v961_v8 = vpop.f32.mrf.mxu1 }
 0x12f   : > { %vm1199_vm7 = vcmp.gt.f32.partialorder %v961_v8, 0.0 }
 0x130   : > { %2595 = vadd.xlane.f32.xlu2 %v2594_v0  ;;  %v243_v0 = vld [vmem:[%s4986_s13 + $0x118] sm:$0xff] }
 0x131   : > { %2259 = vadd.xlane.f32.xlu1 %v2258_v3  ;;  %2265 = vadd.xlane.f32.xlu0 %v2264_v60  ;;  %v2585_v3 = vsel %vm1511_vm3, %v2213_v33, 0.0  ;;  %v2513_v60 = vsel %vm1511_vm3, %v2189_v21, 0.0  ;;  %v2161_v21 = vmul.f32 %v5119_v4, %v5619_v47  ;;  %v5635_v37 = vpop.xlane.xlu0 %2385 }
 0x132   : > { %3668 = vmatpush.xpose.msk.msrb.mxu1 %vm1511_vm3, %v5343_v53  ;;  %v5612_v53 = vsel %vm1226_vm4, 1.0, %v8221_v31  ;;  %v5616_v15 = vpop.f32.mrf.mxu2  ;;  %8228 = vst [vmem:[#allocation29_spill] sm:$0xff] %v5635_v37 }
 0x133   : > { %v5601_v17 = vpop.f32.mrf.mxu0  ;;  %8226 = vst [vmem:[#allocation27_spill] sm:$0xff] %v5612_v53  ;;  %v2191_v33 = vmul.f32 %v5119_v4, %v5612_v53  ;;  %vm1227_vm6 = vcmp.gt.f32.partialorder %v5616_v15, 0.0 }
 0x134   : > { %vm1145_vm9 = vcmp.gt.f32.partialorder %v5601_v17, 0.0 }
 0x135   : > { %v5830_v17 = vsel %vm1145_vm9, 1.0, %v8221_v31 }
 0x136   : > { %3440 = vmatmul.msk.f32.gmra.mxu0 %vm340_vm0, %v243_v0  ;;  %3669 = vmatpush.xpose.msk.msrb.mxu1 %vm1511_vm3, %v5346_v54  ;;  %v5625_v54 = vpop.xlane.xlu1 %2226  ;;  %v2162_v0 = vmul.f32 %v5119_v4, %v5622_v35  ;;  %v5649_v8 = vpop.f32.mrf.mxu1 }
 0x137   : > { %8227 = vst [vmem:[#allocation28_spill] sm:$0xff] %v5625_v54  ;;  %vm1200_vm2 = vcmp.gt.f32.partialorder %v5649_v8, 0.0 }
 0x138   : > { %2271 = vadd.xlane.f32.xlu2 %v2270_v6  ;;  %v244_v6 = vld [vmem:[%s4986_s13 + $0x120] sm:$0xff]  ;;  %v2432_v53 = vsel %vm1511_vm3, %v2162_v0, 0.0  ;;  %v2215_v0 = vmul.f32 %v5119_v4, %v5652_v23  ;;  %v5756_v8 = vsel %vm1200_vm2, 1.0, %v8221_v31 }
 0x139   : > { %2586 = vadd.xlane.f32.xlu1 %v2585_v3  ;;  %2514 = vadd.xlane.f32.xlu0 %v2513_v60  ;;  %v2519_v3 = vsel %vm1511_vm3, %v2191_v33, 0.0  ;;  %v2429_v60 = vsel %vm1511_vm3, %v2161_v21, 0.0  ;;  %v1120_v21 = vpop.f32.mrf.mxu3 }
 0x13a   : > { %3670 = vmatpush.xpose.msk.msrb.mxu1 %vm1511_vm3, %v5281_v56  ;;  %v5645_v56 = vsel %vm1199_vm7, 1.0, %v8221_v31  ;;  %v5657_v33 = vpop.f32.mrf.mxu2  ;;  %vm1252_vm10 = vcmp.gt.f32.partialorder %v1120_v21, 0.0 }
 0x13b   : > { %v802_v2 = vpop.f32.mrf.mxu0  ;;  %vm1228_vm7 = vcmp.gt.f32.partialorder %v5657_v33, 0.0 }
 0x13c   : > { %vm1146_vm11 = vcmp.gt.f32.partialorder %v802_v2, 0.0  ;;  %v5794_v15 = vsel %vm1228_vm7, 1.0, %v8221_v31 }
 0x13d   : > { %v5687_v21 = vsel %vm1146_vm11, 1.0, %v8221_v31  ;;  %8241 = vst [vmem:[#allocation42_spill] sm:$0xff] %v5794_v15 }
 0x13e   : > { %3441 = vmatmul.msk.f32.gmra.mxu0 %vm340_vm0, %v244_v6  ;;  %3671 = vmatpush.xpose.msk.msrb.mxu1 %vm1511_vm3, %v5269_v45  ;;  %v2164_v45 = vmul.f32 %v5119_v4, %v5645_v56  ;;  %v2190_v6 = vmul.f32 %v5119_v4, %v5655_v11  ;;  %v5667_v54 = vpop.xlane.xlu1 %2229  ;;  %v2591_v4 = vsel %vm1511_vm3, %v2215_v0, 0.0  ;;  %v5684_v11 = vsel %vm1252_vm10, 1.0, %v8221_v31  ;;  %v967_v2 = vpop.f32.mrf.mxu1 }
 0x13f   : > { %8230 = vst [vmem:[#allocation31_spill] sm:$0xff] %v5667_v54  ;;  %vm1201_vm13 = vcmp.gt.f32.partialorder %v967_v2, 0.0  ;;  %v5724_v54 = vsel %vm1198_vm14, 1.0, %v8221_v31 }
 0x140   : > { %2520 = vadd.xlane.f32.xlu2 %v2519_v3  ;;  %v2438_v46 = vsel %vm1511_vm3, %v2164_v45, 0.0 }
 0x141   : > { %2430 = vadd.xlane.f32.xlu1 %v2429_v60  ;;  %2433 = vadd.xlane.f32.xlu0 %v2432_v53  ;;  %v5672_v60 = vpop.xlane.xlu2 %2547  ;;  %v5674_v53 = vpop.xlane.xlu0 %2223 }
 0x142   : > { %3672 = vmatpush.xpose.msk.msrb.mxu1 %vm1511_vm3, %v5243_v24  ;;  %8231 = vst [vmem:[#allocation32_spill] sm:$0xff] %v5672_v60  ;;  %v2516_v24 = vsel %vm1511_vm3, %v2190_v6, 0.0  ;;  %v1051_v45 = vpop.f32.mrf.mxu2  ;;  %v5718_v60 = vsel %vm1201_vm13, 1.0, %v8221_v31 }
 0x143   : > { %v5669_v3 = vpop.f32.mrf.mxu0  ;;  %8232 = vst [vmem:[#allocation33_spill] sm:$0xff] %v5674_v53  ;;  %vm1229_vm1 = vcmp.gt.f32.partialorder %v1051_v45, 0.0 }
 0x144   : > { %vm1147_vm10 = vcmp.gt.f32.partialorder %v5669_v3, 0.0 }
 0x145   : > { %v5833_v3 = vsel %vm1147_vm10, 1.0, %v8221_v31 }
 0x146   : > { %3442 = vmatmul.msk.f32.gmra.mxu0 %vm340_vm0, %v245_v9  ;;  %3673 = vmatpush.xpose.msk.msrb.mxu1 %vm1511_vm3, %v5201_v59  ;;  %v5697_v59 = vld [vmem:[%s8064_s2] ss:$0 sm:$0xff]  ;;  %v970_v53 = vpop.f32.mrf.mxu1 }
 0x147   : > { %v2217_v9 = vmul.f32 %v5697_v59, %v5684_v11  ;;  %v2111_v6 = vmul.f32 %v5697_v59, %v5687_v21  ;;  %vm1202_vm5 = vcmp.gt.f32.partialorder %v970_v53, 0.0  ;;  %v5791_v53 = vsel %vm1227_vm6, 1.0, %v8221_v31 }
 0x148   : > { %2439 = vadd.xlane.f32.xlu2 %v2438_v46  ;;  %v246_v46 = vld [vmem:[%s4986_s13 + $0x130] sm:$0xff]  ;;  %8240 = vst [vmem:[#allocation41_spill] sm:$0xff] %v5791_v53 }
 0x149   : > { %2592 = vadd.xlane.f32.xlu1 %v2591_v4  ;;  %2517 = vadd.xlane.f32.xlu0 %v2516_v24  ;;  %v5709_v4 = vpop.xlane.xlu1 %2394  ;;  %v5711_v24 = vpop.xlane.xlu2 %2472  ;;  %v2597_v2 = vsel %vm1511_vm3, %v2217_v9, 0.0 }
 0x14a   : > { %3674 = vmatpush.xpose.msk.msrb.mxu1 %vm1511_vm3, %v5175_v42  ;;  %v2107_v42 = vmul.f32 %v5697_v59, %v5690_v55  ;;  %8233 = vst [vmem:[#allocation34_spill] sm:$0xff] %v5709_v4  ;;  %v5721_v13 = vpop.xlane.xlu0 %2550  ;;  %v1123_v9 = vpop.f32.mrf.mxu3 }
 0x14b   : > { %v5701_v0 = vpop.f32.mrf.mxu0  ;;  %8234 = vst [vmem:[#allocation35_spill] sm:$0xff] %v5711_v24  ;;  %v2279_v24 = vsel %vm1511_vm3, %v2111_v6, 0.0  ;;  %vm1253_vm4 = vcmp.gt.f32.partialorder %v1123_v9, 0.0 }
 0x14c   : > { %8235 = vst [vmem:[#allocation36_spill] sm:$0xff] %v5721_v13  ;;  %v2267_v40 = vsel %vm1511_vm3, %v2107_v42, 0.0  ;;  %v2163_v13 = vmul.f32 %v5697_v59, %v5724_v54  ;;  %v247_v42 = vld [vmem:[%s4986_s13 + $0x138] sm:$0xff]  ;;  %v5761_v45 = vsel %vm1253_vm4, 1.0, %v8221_v31 }
 0x14e   : > { %3443 = vmatmul.msk.f32.gmra.mxu0 %vm340_vm0, %v246_v46  ;;  %3675 = vmatpush.xpose.msk.msrb.mxu1 %vm1511_vm3, %v5161_v30  ;;  %v5729_v46 = vsel %vm1144_vm15, 1.0, %v8221_v31  ;;  %v2166_v30 = vmul.f32 %v5697_v59, %v5718_v60  ;;  %v2435_v37 = vsel %vm1511_vm3, %v2163_v13, 0.0 }
 0x150   : > { %2280 = vadd.xlane.f32.xlu2 %v2279_v24  ;;  %v2109_v24 = vmul.f32 %v5697_v59, %v5729_v46 }
 0x151   : > { %2598 = vadd.xlane.f32.xlu0 %v2597_v2  ;;  %2268 = vadd.xlane.f32.xlu1 %v2267_v40  ;;  %v5745_v2 = vpop.f32.mrf.mxu2  ;;  %v5750_v40 = vsel %vm1229_vm1, 1.0, %v8221_v31  ;;  %vm1148_vm1 = vcmp.gt.f32.partialorder %v5701_v0, 0.0 }
 0x152   : > { %3676 = vmatpush.xpose.msk.msrb.mxu1 %vm1511_vm3, %v5126_v12  ;;  %v2444_v12 = vsel %vm1511_vm3, %v2166_v30, 0.0  ;;  %8236 = vst [vmem:[#allocation37_spill] sm:$0xff] %v5750_v40  ;;  %v5763_v30 = vpop.xlane.xlu2 %2391  ;;  %v2273_v9 = vsel %vm1511_vm3, %v2109_v24, 0.0  ;;  %v2194_v13 = vmul.f32 %v5697_v59, %v5750_v40  ;;  %vm1230_vm12 = vcmp.gt.f32.partialorder %v5745_v2, 0.0 }
 0x153   : > { %v5737_v6 = vpop.f32.mrf.mxu0  ;;  %8238 = vst [vmem:[#allocation39_spill] sm:$0xff] %v5763_v30 }
 0x154   : > { %v2528_v24 = vsel %vm1511_vm3, %v2194_v13, 0.0  ;;  %vm1149_vm8 = vcmp.gt.f32.partialorder %v5737_v6, 0.0 }
 0x156   : > { %3712 = vmatpush.xpose.msk.msra.mxu1 %vm1511_vm3, %v5340_v52  ;;  %3444 = vmatmul.msk.f32.gmra.mxu0 %vm340_vm0, %v247_v42  ;;  %v5753_v52 = vpop.xlane.xlu1 %2478  ;;  %v5766_v42 = vpop.xlane.xlu0 %2553 }
 0x157   : > { %8237 = vst [vmem:[#allocation38_spill] sm:$0xff] %v5753_v52  ;;  %v2218_v52 = vmul.f32 %v5697_v59, %v5761_v45 }
 0x158   : > { %2445 = vadd.xlane.f32.xlu2 %v2444_v12  ;;  %8239 = vst [vmem:[#allocation40_spill] sm:$0xff] %v5766_v42  ;;  %v248_v12 = vld [vmem:[%s4986_s13 + $0x140] sm:$0xff] }
 0x159   : > { %2436 = vadd.xlane.f32.xlu1 %v2435_v37  ;;  %2274 = vadd.xlane.f32.xlu0 %v2273_v9  ;;  %v973_v37 = vpop.f32.mrf.mxu1  ;;  %v5784_v9 = vsel %vm1202_vm5, 1.0, %v8221_v31  ;;  %v2600_v40 = vsel %vm1511_vm3, %v2218_v52, 0.0 }
 0x15a   : > { %3713 = vmatpush.xpose.msk.msra.mxu1 %vm1511_vm3, %v5361_v10  ;;  %v2165_v10 = vmul.f32 %v5697_v59, %v5756_v8  ;;  %v2167_v52 = vmul.f32 %v5697_v59, %v5784_v9  ;;  %v5802_v13 = vpop.xlane.xlu2 %2475  ;;  %vm1203_vm13 = vcmp.gt.f32.partialorder %v973_v37, 0.0 }
 0x15b   : > { %v5774_v32 = vpop.f32.mrf.mxu0  ;;  %8243 = vst [vmem:[#allocation44_spill] sm:$0xff] %v5802_v13  ;;  %v5859_v2 = vsel %vm1203_vm13, 1.0, %v8221_v31 }
 0x15c   : > { %v2441_v42 = vsel %vm1511_vm3, %v2165_v10, 0.0  ;;  %v2192_v10 = vmul.f32 %v5697_v59, %v5791_v53  ;;  %vm1150_vm5 = vcmp.gt.f32.partialorder %v5774_v32, 0.0 }
 0x15e   : > { %3714 = vmatpush.xpose.msk.msra.mxu1 %vm1511_vm3, %v5293_v63  ;;  %3445 = vmatmul.msk.f32.gmra.mxu0 %vm340_vm0, %v248_v12  ;;  %v5788_v63 = vpop.f32.mrf.mxu2  ;;  %v5798_v33 = vpop.xlane.xlu1 %2397  ;;  %v2193_v12 = vmul.f32 %v5697_v59, %v5794_v15 }
 0x15f   : > { %8242 = vst [vmem:[#allocation43_spill] sm:$0xff] %v5798_v33  ;;  %v5808_v30 = vpop.xlane.xlu0 %2481  ;;  %vm1231_vm15 = vcmp.gt.f32.partialorder %v5788_v63, 0.0 }
 0x160   : > { %2529 = vadd.xlane.f32.xlu2 %v2528_v24  ;;  %8244 = vst [vmem:[#allocation45_spill] sm:$0xff] %v5808_v30  ;;  %v2525_v24 = vsel %vm1511_vm3, %v2193_v12, 0.0  ;;  %v5893_v63 = vsel %vm1231_vm15, 1.0, %v8221_v31 }
 0x161   : > { %2601 = vadd.xlane.f32.xlu1 %v2600_v40  ;;  %2442 = vadd.xlane.f32.xlu0 %v2441_v42  ;;  %v2447_v40 = vsel %vm1511_vm3, %v2167_v52, 0.0  ;;  %v2522_v42 = vsel %vm1511_vm3, %v2192_v10, 0.0  ;;  %v5822_v53 = vpop.f32.mrf.mxu1  ;;  %8253 = vst [vmem:[#allocation54_spill] sm:$0xff] %v5893_v63 }
 0x162   : > { %3715 = vmatpush.xpose.msk.msra.mxu1 %vm1511_vm3, %v5284_v57  ;;  %v249_v57 = vld [vmem:[%s4986_s13 + $0x148] sm:$0xff]  ;;  %vm1204_vm2 = vcmp.gt.f32.partialorder %v5822_v53, 0.0 }
 0x163   : > { %v5810_v4 = vpop.f32.mrf.mxu0 }
 0x166   : > { %3716 = vmatpush.xpose.msk.msra.mxu1 %vm1511_vm3, %v5263_v39  ;;  %3446 = vmatmul.msk.f32.gmra.mxu0 %vm340_vm0, %v249_v57  ;;  %v5827_v39 = vsel %vm1149_vm8, 1.0, %v8221_v31  ;;  %v1060_v6 = vpop.f32.mrf.mxu2  ;;  %v5835_v52 = vpop.xlane.xlu1 %2487  ;;  %vm1151_vm8 = vcmp.gt.f32.partialorder %v5810_v4, 0.0 }
 0x167   : > { %8245 = vst [vmem:[#allocation46_spill] sm:$0xff] %v5835_v52  ;;  %v2114_v12 = vmul.f32 %v5697_v59, %v5827_v39  ;;  %vm1232_vm11 = vcmp.gt.f32.partialorder %v1060_v6, 0.0  ;;  %v5842_v57 = vpop.xlane.xlu2 %2232  ;;  %v5856_v6 = vsel %vm1230_vm12, 1.0, %v8221_v31 }
 0x168   : > { %2448 = vadd.xlane.f32.xlu2 %v2447_v40  ;;  %8246 = vst [vmem:[#allocation47_spill] sm:$0xff] %v5842_v57  ;;  %v2110_v40 = vmul.f32 %v5697_v59, %v5830_v17  ;;  %v2195_v13 = vmul.f32 %v5697_v59, %v5856_v6 }
 0x169   : > { %2523 = vadd.xlane.f32.xlu1 %v2522_v42  ;;  %2526 = vadd.xlane.f32.xlu0 %v2525_v24  ;;  %v2112_v42 = vmul.f32 %v5697_v59, %v5833_v3  ;;  %v5849_v24 = vpop.xlane.xlu0 %2238  ;;  %8249 = vst [vmem:[#allocation50_spill] sm:$0xff] %v5856_v6  ;;  %v2288_v37 = vsel %vm1511_vm3, %v2114_v12, 0.0  ;;  %v979_v52 = vpop.f32.mrf.mxu1  ;;  %v251_v12 = vld [vmem:[%s4986_s13 + $0x158] sm:$0xff]  ;;  %v5915_v6 = vsel %vm1204_vm2, 1.0, %v8221_v31 }
 0x16a   : > { %3717 = vmatpush.xpose.msk.msra.mxu1 %vm1511_vm3, %v5216_v1  ;;  %v250_v1 = vld [vmem:[%s4986_s13 + $0x150] sm:$0xff]  ;;  %8247 = vst [vmem:[#allocation48_spill] sm:$0xff] %v5849_v24  ;;  %v2276_v15 = vsel %vm1511_vm3, %v2110_v40, 0.0  ;;  %v2168_v24 = vmul.f32 %v5697_v59, %v5859_v2  ;;  %vm1205_vm14 = vcmp.gt.f32.partialorder %v979_v52, 0.0 }
 0x16b   : > { %v820_v10 = vpop.f32.mrf.mxu0 }
 0x16c   : > { %v2450_v52 = vsel %vm1511_vm3, %v2168_v24, 0.0  ;;  %v252_v24 = vld [vmem:[%s4986_s13 + $0x160] sm:$0xff]  ;;  %vm1152_vm4 = vcmp.gt.f32.partialorder %v820_v10, 0.0 }
 0x16e   : > { %3718 = vmatpush.xpose.msk.msra.mxu1 %vm1511_vm3, %v5181_v44  ;;  %3447 = vmatmul.msk.f32.gmra.mxu0 %vm340_vm0, %v250_v1  ;;  %v5853_v44 = vsel %vm1232_vm11, 1.0, %v8221_v31  ;;  %v2282_v1 = vsel %vm1511_vm3, %v2112_v42, 0.0 }
 0x16f   : > { %8248 = vst [vmem:[#allocation49_spill] sm:$0xff] %v5853_v44  ;;  %v2197_v30 = vmul.f32 %v5697_v59, %v5853_v44  ;;  %v5881_v42 = vpop.xlane.xlu2 %2235  ;;  %v5920_v44 = vsel %vm1152_vm4, 1.0, %v8221_v31 }
 0x170   : > { %2289 = vadd.xlane.f32.xlu2 %v2288_v37  ;;  %8251 = vst [vmem:[#allocation52_spill] sm:$0xff] %v5881_v42  ;;  %v5886_v37 = vsel %vm1205_vm14, 1.0, %v8221_v31  ;;  %v2117_v42 = vmul.f32 %v5697_v59, %v5920_v44 }
 0x171   : > { %2277 = vadd.xlane.f32.xlu1 %v2276_v15  ;;  %2283 = vadd.xlane.f32.xlu0 %v2282_v1  ;;  %v5878_v15 = vpop.xlane.xlu1 %2565  ;;  %v2537_v40 = vsel %vm1511_vm3, %v2197_v30, 0.0  ;;  %v5890_v1 = vpop.xlane.xlu0 %2403  ;;  %v5896_v30 = vsel %vm1148_vm1, 1.0, %v8221_v31  ;;  %v2170_v0 = vmul.f32 %v5697_v59, %v5886_v37 }
 0x172   : > { %3719 = vmatpush.xpose.msk.msra.mxu1 %vm1511_vm3, %v5151_v26  ;;  %8250 = vst [vmem:[#allocation51_spill] sm:$0xff] %v5878_v15  ;;  %v2113_v15 = vmul.f32 %v5697_v59, %v5896_v30 }
 0x173   : > { %v5872_v26 = vpop.f32.mrf.mxu0  ;;  %8252 = vst [vmem:[#allocation53_spill] sm:$0xff] %v5890_v1  ;;  %v255_v1 = vld [vmem:[%s4986_s13 + $0x178] sm:$0xff] }
 0x174   : > { %v2285_v10 = vsel %vm1511_vm3, %v2113_v15, 0.0  ;;  %vm1153_vm10 = vcmp.gt.f32.partialorder %v5872_v26, 0.0 }
 0x176   : > { %3720 = vmatpush.xpose.msk.msra.mxu1 %vm1511_vm3, %v5133_v14  ;;  %3448 = vmatmul.msk.f32.gmra.mxu0 %vm340_vm0, %v251_v12  ;;  %v2531_v14 = vsel %vm1511_vm3, %v2195_v13, 0.0  ;;  %v2196_v12 = vmul.f32 %v5697_v59, %v5893_v63  ;;  %v1063_v63 = vpop.f32.mrf.mxu2 }
 0x177   : > { %v5917_v53 = vpop.xlane.xlu2 %2400  ;;  %vm1233_vm6 = vcmp.gt.f32.partialorder %v1063_v63, 0.0  ;;  %v5945_v63 = vsel %vm1151_vm8, 1.0, %v8221_v31 }
 0x178   : > { %2538 = vadd.xlane.f32.xlu2 %v2537_v40  ;;  %v2456_v40 = vsel %vm1511_vm3, %v2170_v0, 0.0  ;;  %8255 = vst [vmem:[#allocation56_spill] sm:$0xff] %v5917_v53  ;;  %v5926_v0 = vsel %vm1150_vm5, 1.0, %v8221_v31  ;;  %v3560_v53 = vsel %vm1153_vm10, 1.0, %v8221_v31 }
 0x179   : > { %2532 = vadd.xlane.f32.xlu1 %v2531_v14  ;;  %2451 = vadd.xlane.f32.xlu0 %v2450_v52  ;;  %v2534_v14 = vsel %vm1511_vm3, %v2196_v12, 0.0  ;;  %v5912_v52 = vpop.xlane.xlu1 %2241  ;;  %v5923_v32 = vpop.xlane.xlu0 %2490  ;;  %v2169_v12 = vmul.f32 %v5697_v59, %v5915_v6 }
 0x17a   : > { %8254 = vst [vmem:[#allocation55_spill] sm:$0xff] %v5912_v52  ;;  %v253_v52 = vld [vmem:[%s4986_s13 + $0x168] sm:$0xff] }
 0x17b   : > { %v5902_v13 = vpop.f32.mrf.mxu0  ;;  %8256 = vst [vmem:[#allocation57_spill] sm:$0xff] %v5923_v32  ;;  %v2453_v15 = vsel %vm1511_vm3, %v2169_v12, 0.0 }
 0x17c   : > { %vm1154_vm12 = vcmp.gt.f32.partialorder %v5902_v13, 0.0 }
 0x17e   : > { %3449 = vmatmul.msk.f32.gmra.mxu0 %vm340_vm0, %v252_v24  ;;  %v1066_v4 = vpop.f32.mrf.mxu2 }
 0x17f   : > { %vm1234_vm9 = vcmp.gt.f32.partialorder %v1066_v4, 0.0 }
 0x180   : > { %2457 = vadd.xlane.f32.xlu2 %v2456_v40  ;;  %v2115_v40 = vmul.f32 %v5697_v59, %v5926_v0 }
 0x181   : > { %2535 = vadd.xlane.f32.xlu0 %v2534_v14  ;;  %2286 = vadd.xlane.f32.xlu1 %v2285_v10  ;;  %v2297_v14 = vsel %vm1511_vm3, %v2117_v42, 0.0  ;;  %v5940_v10 = vsel %vm1233_vm6, 1.0, %v8221_v31  ;;  %v5953_v12 = vpop.xlane.xlu0 %2409 }
 0x182   : > { %8257 = vst [vmem:[#allocation58_spill] sm:$0xff] %v5940_v10  ;;  %v2291_v57 = vsel %vm1511_vm3, %v2115_v40, 0.0  ;;  %v2198_v42 = vmul.f32 %v5697_v59, %v5940_v10  ;;  %v2116_v40 = vmul.f32 %v5697_v59, %v5945_v63  ;;  %v5964_v10 = vsel %vm1234_vm9, 1.0, %v8221_v31 }
 0x183   : > { %v829_v24 = vpop.f32.mrf.mxu0  ;;  %8259 = vst [vmem:[#allocation60_spill] sm:$0xff] %v5964_v10  ;;  %v2199_v4 = vmul.f32 %v5697_v59, %v5964_v10  ;;  %v256_v10 = vld [vmem:[%s4986_s13 + $0x180] sm:$0xff] }
 0x184   : > { %vm1155_vm7 = vcmp.gt.f32.partialorder %v829_v24, 0.0  ;;  %v5947_v24 = vpop.xlane.xlu1 %2406 }
 0x185   : > { %v3562_v32 = vsel %vm1155_vm7, 1.0, %v8221_v31 }
 0x186   : > { %3450 = vmatmul.msk.f32.gmra.mxu0 %vm340_vm0, %v253_v52  ;;  %v5949_v52 = vpop.xlane.xlu2 %2484 }
 0x187   : > { %8258 = vst [vmem:[#allocation59_spill] sm:$0xff] %v5949_v52  ;;  %v2294_v52 = vsel %vm1511_vm3, %v2116_v40, 0.0 }
 0x188   : > { %2298 = vadd.xlane.f32.xlu2 %v2297_v14  ;;  %v2120_v14 = vmul.f32 %v5697_v59, %v3562_v32 }
 0x189   : > { %2454 = vadd.xlane.f32.xlu1 %v2453_v15  ;;  %2292 = vadd.xlane.f32.xlu0 %v2291_v57  ;;  %v2540_v57 = vsel %vm1511_vm3, %v2198_v42, 0.0 }
 0x18a   : > { %v2306_v15 = vsel %vm1511_vm3, %v2120_v14, 0.0  ;;  %v2118_v14 = vmul.f32 %v5697_v59, %v3560_v53 }
 0x18b   : > { %v832_v33 = vpop.f32.mrf.mxu0 }
 0x18c   : > { %v5970_v26 = vpop.xlane.xlu1 %2568  ;;  %vm1156_vm13 = vcmp.gt.f32.partialorder %v832_v33, 0.0 }
 0x18d   : > { %8260 = vst [vmem:[#allocation61_spill] sm:$0xff] %v5970_v26  ;;  %v3563_v26 = vsel %vm1156_vm13, 1.0, %v8221_v31 }
 0x18e   : > { %3451 = vmatmul.msk.f32.gmra.mxu0 %vm340_vm0, %v254_v16  ;;  %v5973_v42 = vpop.xlane.xlu2 %2244 }
 0x18f   : > { %8261 = vst [vmem:[#allocation62_spill] sm:$0xff] %v5973_v42 }
 0x190   : > { %2307 = vadd.xlane.f32.xlu2 %v2306_v15  ;;  %v5976_v15 = vpop.xlane.xlu0 %2571 }
 0x191   : > { %2541 = vadd.xlane.f32.xlu0 %v2540_v57  ;;  %2295 = vadd.xlane.f32.xlu1 %v2294_v52  ;;  %8262 = vst [vmem:[#allocation63_spill] sm:$0xff] %v5976_v15  ;;  %v2543_v52 = vsel %vm1511_vm3, %v2199_v4, 0.0  ;;  %v2300_v57 = vsel %vm1511_vm3, %v2118_v14, 0.0 }
 0x193   : > { %v835_v16 = vpop.f32.mrf.mxu0 }
 0x194   : > { %vm1157_vm11 = vcmp.gt.f32.partialorder %v835_v16, 0.0  ;;  %v3561_v16 = vsel %vm1154_vm12, 1.0, %v8221_v31  ;;  %v5990_v13 = vpop.xlane.xlu1 %2412 }
 0x195   : > { %v3564_v40 = vsel %vm1157_vm11, 1.0, %v8221_v31  ;;  %v2119_v33 = vmul.f32 %v5697_v59, %v3561_v16  ;;  %8263 = vst [vmem:[#allocation64_spill] sm:$0xff] %v5990_v13 }
 0x196   : > { %3452 = vmatmul.msk.f32.gmra.mxu0 %vm340_vm0, %v255_v1  ;;  %3678 = vmatpush.xpose.msk.msrb.mxu2 %vm1511_vm3, %v3564_v40  ;;  %v2121_v1 = vmul.f32 %v5697_v59, %v3563_v26  ;;  %v5995_v14 = vpop.xlane.xlu2 %2493 }
 0x197   : > { %8264 = vst [vmem:[#allocation65_spill] sm:$0xff] %v5995_v14 }
 0x199   : > { %2544 = vadd.xlane.f32.xlu1 %v2543_v52  ;;  %2301 = vadd.xlane.f32.xlu0 %v2300_v57  ;;  %v2303_v57 = vsel %vm1511_vm3, %v2119_v33, 0.0 }
 0x19a   : > { %3679 = vmatpush.xpose.msk.msrb.mxu2 %vm1511_vm3, %v3563_v26  ;;  %v2309_v26 = vsel %vm1511_vm3, %v2121_v1, 0.0 }
 0x19b   : > { %v838_v15 = vpop.f32.mrf.mxu0 }
 0x19c   : > { %vm1158_vm14 = vcmp.gt.f32.partialorder %v838_v15, 0.0  ;;  %v6001_v15 = vpop.xlane.xlu0 %2247  ;;  %v6016_v1 = vpop.xlane.xlu1 %2496 }
 0x19d   : > { %v5993_v4 = vsel %vm1158_vm14, 1.0, %v8221_v31 }
 0x19e   : > { %3453 = vmatmul.msk.f32.gmra.mxu0 %vm340_vm0, %v256_v10  ;;  %3680 = vmatpush.xpose.msk.msrb.mxu2 %vm1511_vm3, %v3562_v32  ;;  %v2123_v52 = vmul.f32 %v5697_v59, %v5993_v4  ;;  %v257_v10 = vld [vmem:[%s4986_s13 + $0x188] sm:$0xff]  ;;  %v2122_v32 = vmul.f32 %v5697_v59, %v3564_v40  ;;  %v258_v40 = vld [vmem:[%s4986_s13 + $0x190] sm:$0xff] }
 0x1a0   : > { %v2315_v13 = vsel %vm1511_vm3, %v2123_v52, 0.0 }
 0x1a1   : > { %2304 = vadd.xlane.f32.xlu1 %v2303_v57  ;;  %2310 = vadd.xlane.f32.xlu0 %v2309_v26 }
 0x1a2   : > { %2316 = vadd.xlane.f32.xlu2 %v2315_v13  ;;  %3681 = vmatpush.xpose.msk.msrb.mxu2 %vm1511_vm3, %v3561_v16  ;;  %v6018_v13 = vpop.xlane.xlu2 %2574  ;;  %v2312_v16 = vsel %vm1511_vm3, %v2122_v32, 0.0 }
 0x1a3   : > { %v841_v14 = vpop.f32.mrf.mxu0  ;;  %8265 = vst [vmem:[#allocation66_spill] sm:$0xff] %v6018_v13 }
 0x1a4   : > { %vm1159_vm15 = vcmp.gt.f32.partialorder %v841_v14, 0.0  ;;  %v6022_v52 = vpop.xlane.xlu0 %2415  ;;  %v6036_v32 = vpop.xlane.xlu1 %2250 }
 0x1a5   : > { %v6010_v42 = vsel %vm1159_vm15, 1.0, %v8221_v31  ;;  %8266 = vst [vmem:[#allocation67_spill] sm:$0xff] %v6022_v52  ;;  %v8368_v52 = vld [vmem:[#allocation10_spill] sm:$0xff] }
 0x1a6   : > { %3454 = vmatmul.msk.f32.gmra.mxu0 %vm340_vm0, %v257_v10  ;;  %3682 = vmatpush.xpose.msk.msrb.mxu2 %vm1511_vm3, %v3560_v53  ;;  %v2124_v33 = vmul.f32 %v5697_v59, %v6010_v42 }
 0x1a8   : > { %v2318_v14 = vsel %vm1511_vm3, %v2124_v33, 0.0 }
 0x1a9   : > { %2313 = vadd.xlane.f32.xlu1 %v2312_v16  ;;  %2319 = vadd.xlane.f32.xlu0 %v2318_v14  ;;  %v259_v14 = vld [vmem:[%s4986_s13 + $0x198] sm:$0xff] }
 0x1aa   : > { %3683 = vmatpush.xpose.msk.msrb.mxu2 %vm1511_vm3, %v5920_v44  ;;  %v6038_v44 = vpop.xlane.xlu2 %2499 }
 0x1ab   : > { %v844_v53 = vpop.f32.mrf.mxu0  ;;  %8267 = vst [vmem:[#allocation68_spill] sm:$0xff] %v6038_v44 }
 0x1ac   : > { %vm1160_vm1 = vcmp.gt.f32.partialorder %v844_v53, 0.0  ;;  %v6042_v33 = vpop.xlane.xlu0 %2502 }
 0x1ad   : > { %v6028_v57 = vsel %vm1160_vm1, 1.0, %v8221_v31 }
 0x1ae   : > { %3455 = vmatmul.msk.f32.gmra.mxu0 %vm340_vm0, %v258_v40  ;;  %3684 = vmatpush.xpose.msk.msrb.mxu2 %vm1511_vm3, %v5945_v63  ;;  %v2125_v26 = vmul.f32 %v5697_v59, %v6028_v57 }
 0x1b0   : > { %v2321_v10 = vsel %vm1511_vm3, %v2125_v26, 0.0 }
 0x1b1   : > { %2322 = vadd.xlane.f32.xlu1 %v2321_v10  ;;  %v260_v10 = vld [vmem:[%s4986_s13 + $0x1a0] sm:$0xff] }
 0x1b2   : > { %3685 = vmatpush.xpose.msk.msrb.mxu2 %vm1511_vm3, %v5926_v0  ;;  %v6056_v0 = vpop.xlane.xlu1 %2577 }
 0x1b3   : > { %v847_v16 = vpop.f32.mrf.mxu0  ;;  %8268 = vst [vmem:[#allocation69_spill] sm:$0xff] %v6056_v0 }
 0x1b4   : > { %vm1161_vm2 = vcmp.gt.f32.partialorder %v847_v16, 0.0  ;;  %v6059_v16 = vpop.xlane.xlu2 %2253 }
 0x1b5   : > { %v6046_v63 = vsel %vm1161_vm2, 1.0, %v8221_v31 }
 0x1b6   : > { %3456 = vmatmul.msk.f32.gmra.mxu0 %vm340_vm0, %v259_v14  ;;  %3686 = vmatpush.xpose.msk.msrb.mxu2 %vm1511_vm3, %v5827_v39  ;;  %v2126_v53 = vmul.f32 %v5697_v59, %v6046_v63  ;;  %v288_v14 = vld [vmem:[%s4986_s13 + $0x280] sm:$0xff]  ;;  %v6062_v39 = vpop.xlane.xlu0 %2580 }
 0x1b7   : > { %8269 = vst [vmem:[#allocation70_spill] sm:$0xff] %v6062_v39  ;;  %3485 = vmatmul.msk.f32.gmra.mxu1 %vm340_vm0, %v288_v14  ;;  %v289_v14 = vld [vmem:[%s4986_s13 + $0x288] sm:$0xff]  ;;  %v290_v39 = vld [vmem:[%s4986_s13 + $0x290] sm:$0xff] }
 0x1b8   : > { %v2324_v40 = vsel %vm1511_vm3, %v2126_v53, 0.0 }
 0x1b9   : > { %2325 = vadd.xlane.f32.xlu2 %v2324_v40 }
 0x1ba   : > { %3687 = vmatpush.xpose.msk.msrb.mxu2 %vm1511_vm3, %v5896_v30  ;;  %v6078_v0 = vpop.xlane.xlu1 %2421 }
 0x1bb   : > { %v850_v26 = vpop.f32.mrf.mxu0  ;;  %8270 = vst [vmem:[#allocation71_spill] sm:$0xff] %v6078_v0 }
 0x1bc   : > { %vm1162_vm4 = vcmp.gt.f32.partialorder %v850_v26, 0.0  ;;  %v261_v26 = vld [vmem:[%s4986_s13 + $0x1a8] sm:$0xff] }
 0x1bd   : > { %v6065_v13 = vsel %vm1162_vm4, 1.0, %v8221_v31 }
 0x1be   : > { %3457 = vmatmul.msk.f32.gmra.mxu0 %vm340_vm0, %v260_v10  ;;  %3688 = vmatpush.xpose.msk.msrb.mxu2 %vm1511_vm3, %v5833_v3  ;;  %v2127_v30 = vmul.f32 %v5697_v59, %v6065_v13  ;;  %v6084_v3 = vpop.xlane.xlu2 %2418 }
 0x1bf   : > { %3486 = vmatmul.msk.f32.gmra.mxu1 %vm340_vm0, %v289_v14  ;;  %8271 = vst [vmem:[#allocation72_spill] sm:$0xff] %v6084_v3  ;;  %v262_v14 = vld [vmem:[%s4986_s13 + $0x1b0] sm:$0xff]  ;;  %v8376_v3 = vld [vmem:[#allocation50_spill] sm:$0xff]  ;;  %s195_s13 = scalar_lea.vmem [#allocation2], %s3402_s9 }
 0x1c0   : > { %v2327_v53 = vsel %vm1511_vm3, %v2127_v30, 0.0  ;;  %v6091_v30 = vpop.xlane.xlu0 %2256  ;;  %s3295_s14 = sshll.u32 %s195_s13, 4  ;;  %s3296_s14 = int_to_ptr.vmem [resolvable:$true] %s3295_s14 }
 0x1c1   : > { %2328 = vadd.xlane.f32.xlu0 %v2327_v53 }
 0x1c2   : > { %3689 = vmatpush.xpose.msk.msrb.mxu2 %vm1511_vm3, %v5687_v21 }
 0x1c3   : > { %v853_v40 = vpop.f32.mrf.mxu0 }
 0x1c4   : > { %vm1163_vm5 = vcmp.gt.f32.partialorder %v853_v40, 0.0 }
 0x1c5   : > { %v6081_v10 = vsel %vm1163_vm5, 1.0, %v8221_v31  ;;  %vm1223_vm5 = vcmp.gt.f32.partialorder %v5491_v61, 0.0 }
 0x1c6   : > { %3458 = vmatmul.msk.f32.gmra.mxu0 %vm340_vm0, %v261_v26  ;;  %3690 = vmatpush.xpose.msk.msrb.mxu2 %vm1511_vm3, %v5830_v17  ;;  %v2128_v21 = vmul.f32 %v5697_v59, %v6081_v10 }
 0x1c7   : > { %3487 = vmatmul.msk.f32.gmra.mxu1 %vm340_vm0, %v290_v39  ;;  %v6117_v39 = vld [vmem:[%s8064_s2] sm:$0x1] }
 0x1c8   : > { %v2330_v53 = vsel %vm1511_vm3, %v2128_v21, 0.0  ;;  %v6107_v21 = vpop.xlane.xlu1 %2505 }
 0x1c9   : > { %2331 = vadd.xlane.f32.xlu1 %v2330_v53  ;;  %8272 = vst [vmem:[#allocation73_spill] sm:$0xff] %v6107_v21 }
 0x1ca   : > { %3691 = vmatpush.xpose.msk.msrb.mxu2 %vm1511_vm3, %v5729_v46  ;;  %v6109_v46 = vpop.xlane.xlu2 %2583 }
 0x1cb   : > { %v856_v40 = vpop.f32.mrf.mxu0  ;;  %8273 = vst [vmem:[#allocation74_spill] sm:$0xff] %v6109_v46 }
 0x1cc   : > { %vm1164_vm6 = vcmp.gt.f32.partialorder %v856_v40, 0.0  ;;  %v6112_v40 = vpop.xlane.xlu0 %2424 }
 0x1cd   : > { %v6099_v26 = vsel %vm1164_vm6, 1.0, %v8221_v31  ;;  %8274 = vst [vmem:[#allocation75_spill] sm:$0xff] %v6112_v40 }
 0x1ce   : > { %3459 = vmatmul.msk.f32.gmra.mxu0 %vm340_vm0, %v262_v14  ;;  %3692 = vmatpush.xpose.msk.msrb.mxu2 %vm1511_vm3, %v5589_v22  ;;  %v2129_v17 = vmul.f32 %v5697_v59, %v6099_v26 }
 0x1cf   : > { %3677 = vmatmul.msk.f32.vlgmr.msrb.gmra.mxu1 %vm1511_vm3, %v6117_v39 }
 0x1d0   : > { %v2333_v53 = vsel %vm1511_vm3, %v2129_v17, 0.0 }
 0x1d1   : > { %2334 = vadd.xlane.f32.xlu2 %v2333_v53  ;;  %v6135_v53 = vpop.xlane.xlu1 %2259 }
 0x1d2   : > { %3693 = vmatpush.xpose.msk.msrb.mxu2 %vm1511_vm3, %v5690_v55  ;;  %8275 = vst [vmem:[#allocation76_spill] sm:$0xff] %v6135_v53 }
 0x1d3   : > { %v859_v22 = vpop.f32.mrf.mxu0 }
 0x1d4   : > { %vm1165_vm0 = vcmp.gt.f32.partialorder %v859_v22, 0.0  ;;  %v6139_v22 = vpop.xlane.xlu0 %2589 }
 0x1d5   : > { %v6124_v14 = vsel %vm1165_vm0, 1.0, %v8221_v31  ;;  %3694 = vmatmul.msk.f32.vlgmr.msrb.gmra.mxu2 %vm1511_vm3, %v6117_v39  ;;  %8276 = vst [vmem:[#allocation77_spill] sm:$0xff] %v6139_v22  ;;  %vm1240_vm0 = vcmp.gt.f32.partialorder %v5271_v48, 0.0 }
 0x1d6   : > { %3729 = vmatpush.xpose.msk.msra.mxu2 %vm1511_vm3, %v5886_v37  ;;  %v2130_v17 = vmul.f32 %v5697_v59, %v6124_v14  ;;  %v6137_v37 = vpop.xlane.xlu2 %2262  ;;  %v3647_v48 = vsel %vm1240_vm0, 1.0, %v8221_v31 }
 0x1d8   : > { %v2336_v55 = vsel %vm1511_vm3, %v2130_v17, 0.0 }
 0x1d9   : > { %2337 = vadd.xlane.f32.xlu0 %v2336_v55  ;;  %v6151_v55 = vpop.xlane.xlu1 %2586 }
 0x1da   : > { %3730 = vmatpush.xpose.msk.msra.mxu2 %vm1511_vm3, %v5915_v6  ;;  %8277 = vst [vmem:[#allocation78_spill] sm:$0xff] %v6151_v55 }
 0x1db   : > { %v862_v46 = vpop.f32.mrf.mxu0 }
 0x1dc   : > { %vm1166_vm7 = vcmp.gt.f32.partialorder %v862_v46, 0.0  ;;  %v6157_v46 = vpop.xlane.xlu0 %2265 }
 0x1dd   : > { %v6144_v40 = vsel %vm1166_vm7, 1.0, %v8221_v31  ;;  %vm1222_vm7 = vcmp.gt.f32.partialorder %v5470_v19, 0.0 }
 0x1de   : > { %3731 = vmatpush.xpose.msk.msra.mxu2 %vm1511_vm3, %v5859_v2  ;;  %v2131_v6 = vmul.f32 %v5697_v59, %v6144_v40  ;;  %v6155_v2 = vpop.xlane.xlu2 %2427 }
 0x1df   : > { %8278 = vst [vmem:[#allocation79_spill] sm:$0xff] %v6155_v2 }
 0x1e0   : > { %v2339_v17 = vsel %vm1511_vm3, %v2131_v6, 0.0 }
 0x1e1   : > { %2340 = vadd.xlane.f32.xlu1 %v2339_v17 }
 0x1e2   : > { %3732 = vmatpush.xpose.msk.msra.mxu2 %vm1511_vm3, %v5784_v9 }
 0x1e3   : > { %v865_v22 = vpop.f32.mrf.mxu0 }
 0x1e4   : > { %vm1167_vm8 = vcmp.gt.f32.partialorder %v865_v22, 0.0  ;;  %v6178_v21 = vpop.xlane.xlu0 %2514 }
 0x1e5   : > { %v6160_v53 = vsel %vm1167_vm8, 1.0, %v8221_v31  ;;  %8281 = vst [vmem:[#allocation82_spill] sm:$0xff] %v6178_v21  ;;  %vm1238_vm8 = vcmp.gt.f32.partialorder %v5223_v7, 0.0 }
 0x1e6   : > { %3733 = vmatpush.xpose.msk.msra.mxu2 %vm1511_vm3, %v5718_v60  ;;  %v2132_v9 = vmul.f32 %v5697_v59, %v6160_v53  ;;  %v6169_v60 = vpop.xlane.xlu1 %2430  ;;  %v6174_v55 = vpop.xlane.xlu2 %2595 }
 0x1e7   : > { %8279 = vst [vmem:[#allocation80_spill] sm:$0xff] %v6169_v60 }
 0x1e8   : > { %v2342_v6 = vsel %vm1511_vm3, %v2132_v9, 0.0  ;;  %8280 = vst [vmem:[#allocation81_spill] sm:$0xff] %v6174_v55 }
 0x1e9   : > { %2343 = vadd.xlane.f32.xlu2 %v2342_v6 }
 0x1ea   : > { %3734 = vmatpush.xpose.msk.msra.mxu2 %vm1511_vm3, %v5756_v8 }
 0x1eb   : > { %v868_v17 = vpop.f32.mrf.mxu0 }
 0x1ec   : > { %vm1168_vm9 = vcmp.gt.f32.partialorder %v868_v17, 0.0 }
 0x1ed   : > { %v6172_v22 = vsel %vm1168_vm9, 1.0, %v8221_v31  ;;  %vm4424_vm9 = vcmp.lt.s32.totalorder %v5953_v12, 0 }
 0x1ee   : > { %3735 = vmatpush.xpose.msk.msra.mxu2 %vm1511_vm3, %v5645_v56  ;;  %v2133_v2 = vmul.f32 %v5697_v59, %v6172_v22  ;;  %v6188_v6 = vpop.xlane.xlu1 %2592 }
 0x1ef   : > { %8282 = vst [vmem:[#allocation83_spill] sm:$0xff] %v6188_v6 }
 0x1f0   : > { %v2345_v8 = vsel %vm1511_vm3, %v2133_v2, 0.0  ;;  %v6196_v2 = vpop.xlane.xlu0 %2433 }
 0x1f1   : > { %2346 = vadd.xlane.f32.xlu0 %v2345_v8  ;;  %8283 = vst [vmem:[#allocation84_spill] sm:$0xff] %v6196_v2 }
 0x1f2   : > { %3736 = vmatpush.xpose.msk.msra.mxu2 %vm1511_vm3, %v5724_v54  ;;  %v6194_v54 = vpop.xlane.xlu2 %2271 }
 0x1f3   : > { %v871_v56 = vpop.f32.mrf.mxu0 }
 0x1f4   : > { %vm1169_vm10 = vcmp.gt.f32.partialorder %v871_v56, 0.0 }
 0x1f5   : > { %v6186_v9 = vsel %vm1169_vm10, 1.0, %v8221_v31  ;;  %vm1239_vm10 = vcmp.gt.f32.partialorder %v5245_v27, 0.0 }
 0x1f6   : > { %3737 = vmatpush.xpose.msk.msra.mxu2 %vm1511_vm3, %v5622_v35  ;;  %v2134_v17 = vmul.f32 %v5697_v59, %v6186_v9  ;;  %v6206_v60 = vpop.xlane.xlu1 %2268 }
 0x1f8   : > { %v2348_v8 = vsel %vm1511_vm3, %v2134_v17, 0.0  ;;  %v6210_v17 = vpop.xlane.xlu0 %2517 }
 0x1f9   : > { %2349 = vadd.xlane.f32.xlu1 %v2348_v8  ;;  %8285 = vst [vmem:[#allocation86_spill] sm:$0xff] %v6210_v17 }
 0x1fa   : > { %3738 = vmatpush.xpose.msk.msra.mxu2 %vm1511_vm3, %v5619_v47  ;;  %v6208_v2 = vpop.xlane.xlu2 %2520 }
 0x1fb   : > { %v874_v35 = vpop.f32.mrf.mxu0  ;;  %8284 = vst [vmem:[#allocation85_spill] sm:$0xff] %v6208_v2 }
 0x1fc   : > { %vm1170_vm11 = vcmp.gt.f32.partialorder %v874_v35, 0.0 }
 0x1fd   : > { %v3577_v56 = vsel %vm1170_vm11, 1.0, %v8221_v31  ;;  %vm4419_vm11 = vcmp.lt.s32.totalorder %v5947_v24, 0 }
 0x1fe   : > { %3739 = vmatpush.xpose.msk.msra.mxu2 %vm1511_vm3, %v5531_v36  ;;  %v2135_v6 = vmul.f32 %v5697_v59, %v3577_v56 }
 0x200   : > { %v2351_v47 = vsel %vm1511_vm3, %v2135_v6, 0.0  ;;  %v6219_v6 = vpop.xlane.xlu1 %2436 }
 0x201   : > { %2352 = vadd.xlane.f32.xlu2 %v2351_v47 }
 0x202   : > { %3740 = vmatpush.xpose.msk.msra.mxu2 %vm1511_vm3, %v5510_v38  ;;  %v6223_v17 = vpop.xlane.xlu2 %2439 }
 0x203   : > { %v877_v8 = vpop.f32.mrf.mxu0 }
 0x204   : > { %vm1171_vm12 = vcmp.gt.f32.partialorder %v877_v8, 0.0 }
 0x205   : > { %v3578_v36 = vsel %vm1171_vm12, 1.0, %v8221_v31 }
 0x206   : > { %3741 = vmatpush.xpose.msk.msra.mxu2 %vm1511_vm3, %v5507_v51  ;;  %v2136_v35 = vmul.f32 %v5697_v59, %v3578_v36  ;;  %v6225_v51 = vpop.xlane.xlu0 %2598 }
 0x207   : > { %8286 = vst [vmem:[#allocation87_spill] sm:$0xff] %v6225_v51 }
 0x208   : > { %v2354_v38 = vsel %vm1511_vm3, %v2136_v35, 0.0  ;;  %v6238_v35 = vpop.xlane.xlu1 %2601 }
 0x209   : > { %2355 = vadd.xlane.f32.xlu0 %v2354_v38  ;;  %8287 = vst [vmem:[#allocation88_spill] sm:$0xff] %v6238_v35 }
 0x20a   : > { %3742 = vmatpush.xpose.msk.msra.mxu2 %vm1511_vm3, %v5453_v49 }
 0x20b   : > { %v880_v47 = vpop.f32.mrf.mxu0 }
 0x20c   : > { %vm1172_vm13 = vcmp.gt.f32.partialorder %v880_v47, 0.0  ;;  %v6241_v47 = vpop.xlane.xlu2 %2280 }
 0x20d   : > { %v3579_v8 = vsel %vm1172_vm13, 1.0, %v8221_v31 }
 0x20e   : > { %3743 = vmatpush.xpose.msk.msra.mxu2 %vm1511_vm3, %v5414_v29  ;;  %v2137_v2 = vmul.f32 %v5697_v59, %v3579_v8 }
 0x210   : > { %v2357_v49 = vsel %vm1511_vm3, %v2137_v2, 0.0 }
 0x211   : > { %2358 = vadd.xlane.f32.xlu1 %v2357_v49 }
 0x212   : > { %3744 = vmatpush.xpose.msk.msra.mxu2 %vm1511_vm3, %v5411_v20  ;;  %v6244_v20 = vpop.xlane.xlu0 %2274 }
 0x213   : > { %v883_v29 = vpop.f32.mrf.mxu0 }
 0x214   : > { %vm1173_vm14 = vcmp.gt.f32.partialorder %v883_v29, 0.0 }
 0x215   : > { %3745 = vmatmul.msk.f32.vlgmr.msra.gmra.mxu2 %vm1511_vm3, %v6117_v39  ;;  %v3580_v38 = vsel %vm1173_vm14, 1.0, %v8221_v31 }
 0x216   : > { %3780 = vmatpush.xpose.msk.msrb.mxu2 %vm1511_vm3, %v5761_v45  ;;  %3695 = vmatpush.xpose.msk.msrb.mxu3 %vm1511_vm3, %v3580_v38  ;;  %v2138_v45 = vmul.f32 %v5697_v59, %v3580_v38  ;;  %v6259_v38 = vpop.xlane.xlu1 %2523 }
 0x217   : > { %8288 = vst [vmem:[#allocation89_spill] sm:$0xff] %v6259_v38 }
 0x218   : > { %v2360_v2 = vsel %vm1511_vm3, %v2138_v45, 0.0 }
 0x219   : > { %2361 = vadd.xlane.f32.xlu2 %v2360_v2 }
 0x21a   : > { %3781 = vmatpush.xpose.msk.msrb.mxu2 %vm1511_vm3, %v5684_v11  ;;  %3696 = vmatpush.xpose.msk.msrb.mxu3 %vm1511_vm3, %v3579_v8  ;;  %v6266_v45 = vpop.xlane.xlu0 %2442 }
 0x21b   : > { %v886_v11 = vpop.f32.mrf.mxu0 }
 0x21c   : > { %vm1174_vm15 = vcmp.gt.f32.partialorder %v886_v11, 0.0 }
 0x21d   : > { %v6254_v49 = vsel %vm1174_vm15, 1.0, %v8221_v31 }
 0x21e   : > { %3782 = vmatpush.xpose.msk.msrb.mxu2 %vm1511_vm3, %v5559_v34  ;;  %3697 = vmatpush.xpose.msk.msrb.mxu3 %vm1511_vm3, %v3578_v36  ;;  %v2139_v29 = vmul.f32 %v5697_v59, %v6254_v49  ;;  %v6261_v34 = vpop.xlane.xlu2 %2445 }
 0x220   : > { %v2363_v8 = vsel %vm1511_vm3, %v2139_v29, 0.0 }
 0x221   : > { %2364 = vadd.xlane.f32.xlu0 %v2363_v8 }
 0x222   : > { %3783 = vmatpush.xpose.msk.msrb.mxu2 %vm1511_vm3, %v5652_v23  ;;  %3698 = vmatpush.xpose.msk.msrb.mxu3 %vm1511_vm3, %v3577_v56  ;;  %v6281_v56 = vpop.xlane.xlu1 %2277 }
 0x223   : > { %v889_v23 = vpop.f32.mrf.mxu0  ;;  %8289 = vst [vmem:[#allocation90_spill] sm:$0xff] %v6281_v56  ;;  %v8302_v56 = vld [vmem:[#allocation8_spill] sm:$0xff] }
 0x224   : > { %vm1175_vm1 = vcmp.gt.f32.partialorder %v889_v23, 0.0  ;;  %vm1209_vm14 = vcmp.gt.f32.partialorder %v8302_v56, 0.0 }
 0x225   : > { %v6272_v36 = vsel %vm1175_vm1, 1.0, %v8221_v31 }
 0x226   : > { %3784 = vmatpush.xpose.msk.msrb.mxu2 %vm1511_vm3, %v5539_v5  ;;  %3699 = vmatpush.xpose.msk.msrb.mxu3 %vm1511_vm3, %v6186_v9  ;;  %v2140_v5 = vmul.f32 %v5697_v59, %v6272_v36  ;;  %v6283_v11 = vpop.xlane.xlu2 %2529 }
 0x227   : > { %8290 = vst [vmem:[#allocation91_spill] sm:$0xff] %v6283_v11 }
 0x228   : > { %v2366_v2 = vsel %vm1511_vm3, %v2140_v5, 0.0 }
 0x229   : > { %2367 = vadd.xlane.f32.xlu1 %v2366_v2 }
 0x22a   : > { %3785 = vmatpush.xpose.msk.msrb.mxu2 %vm1511_vm3, %v5581_v41  ;;  %3700 = vmatpush.xpose.msk.msrb.mxu3 %vm1511_vm3, %v6172_v22  ;;  %v6287_v41 = vpop.xlane.xlu0 %2526  ;;  %v6303_v8 = vpop.xlane.xlu1 %2532 }
 0x22b   : > { %8291 = vst [vmem:[#allocation92_spill] sm:$0xff] %v6287_v41  ;;  %v892_v29 = vpop.f32.mrf.mxu0 }
 0x22c   : > { %vm1176_vm2 = vcmp.gt.f32.partialorder %v892_v29, 0.0  ;;  %8292 = vst [vmem:[#allocation93_spill] sm:$0xff] %v6303_v8  ;;  %v3645_v8 = vsel %vm1238_vm8, 1.0, %v8221_v31 }
 0x22d   : > { %v6292_v9 = vsel %vm1176_vm2, 1.0, %v8221_v31 }
 0x22e   : > { %3786 = vmatpush.xpose.msk.msrb.mxu2 %vm1511_vm3, %v5478_v58  ;;  %3701 = vmatpush.xpose.msk.msrb.mxu3 %vm1511_vm3, %v6160_v53  ;;  %v2141_v58 = vmul.f32 %v5697_v59, %v6292_v9  ;;  %v6305_v23 = vpop.xlane.xlu2 %2448 }
 0x230   : > { %v2369_v22 = vsel %vm1511_vm3, %v2141_v58, 0.0 }
 0x231   : > { %2370 = vadd.xlane.f32.xlu2 %v2369_v22 }
 0x232   : > { %3787 = vmatpush.xpose.msk.msrb.mxu2 %vm1511_vm3, %v5458_v62  ;;  %3702 = vmatpush.xpose.msk.msrb.mxu3 %vm1511_vm3, %v6144_v40  ;;  %v6309_v53 = vpop.xlane.xlu0 %2283 }
 0x233   : > { %v895_v62 = vpop.f32.mrf.mxu0  ;;  %8293 = vst [vmem:[#allocation94_spill] sm:$0xff] %v6309_v53 }
 0x234   : > { %vm1177_vm4 = vcmp.gt.f32.partialorder %v895_v62, 0.0  ;;  %v6354_v62 = vsel %vm1222_vm7, 1.0, %v8221_v31 }
 0x235   : > { %v6312_v5 = vsel %vm1177_vm4, 1.0, %v8221_v31  ;;  %8297 = vst [vmem:[#allocation98_spill] sm:$0xff] %v6354_v62 }
 0x236   : > { %3788 = vmatpush.xpose.msk.msrb.mxu2 %vm1511_vm3, %v5483_v25  ;;  %3703 = vmatpush.xpose.msk.msrb.mxu3 %vm1511_vm3, %v6124_v14  ;;  %v2142_v25 = vmul.f32 %v5697_v59, %v6312_v5  ;;  %v6338_v29 = vpop.xlane.xlu2 %2289 }
 0x238   : > { %v2372_v40 = vsel %vm1511_vm3, %v2142_v25, 0.0  ;;  %v4426_v25 = vfloor.f32 %v5953_v12 }
 0x239   : > { %2373 = vadd.xlane.f32.xlu0 %v2372_v40  ;;  %v4421_v40 = vfloor.f32 %v5947_v24 }
 0x23a   : > { %3789 = vmatpush.xpose.msk.msrb.mxu2 %vm1511_vm3, %v5383_v43  ;;  %v6323_v43 = vsel %vm1223_vm5, 1.0, %v8221_v31  ;;  %3704 = vmatpush.xpose.msk.msrb.mxu3 %vm1511_vm3, %v6099_v26  ;;  %v6344_v26 = vpop.f32.mrf.mxu1  ;;  %v6346_v58 = vpop.xlane.xlu0 %2451 }
 0x23b   : > { %8294 = vst [vmem:[#allocation95_spill] sm:$0xff] %v6323_v43  ;;  %v898_v2 = vpop.f32.mrf.mxu0  ;;  %v2188_v61 = vmul.f32 %v5697_v59, %v6323_v43 }
 0x23c   : > { %vm1178_vm6 = vcmp.gt.f32.partialorder %v898_v2, 0.0  ;;  %8296 = vst [vmem:[#allocation97_spill] sm:$0xff] %v6346_v58 }
 0x23d   : > { %v6335_v14 = vsel %vm1178_vm6, 1.0, %v8221_v31  ;;  %v2510_v22 = vsel %vm1511_vm3, %v2188_v61, 0.0  ;;  %v2205_v61 = vmul.f32 %v5697_v59, %v3647_v48 }
 0x23e   : > { %3790 = vmatpush.xpose.msk.msrb.mxu2 %vm1511_vm3, %v5365_v18  ;;  %v6332_v18 = vpop.xlane.xlu1 %2286  ;;  %3705 = vmatpush.xpose.msk.msrb.mxu3 %vm1511_vm3, %v6081_v10  ;;  %v4425_v10 = vceil.f32 %v5953_v12  ;;  %v2187_v12 = vmul.f32 %v5697_v59, %v6354_v62  ;;  %v6398_v41 = vpop.xlane.xlu2 %2538 }
 0x23f   : > { %8295 = vst [vmem:[#allocation96_spill] sm:$0xff] %v6332_v18  ;;  %v2561_v62 = vsel %vm1511_vm3, %v2205_v61, 0.0 }
 0x240   : > { %v4427_v51 = vsel %vm4424_vm9, %v4425_v10, %v4426_v25  ;;  %v3646_v10 = vsel %vm1239_vm10, 1.0, %v8221_v31  ;;  %v8299_v25 = vld [vmem:[#allocation56_spill] sm:$0xff]  ;;  %v2507_v38 = vsel %vm1511_vm3, %v2187_v12, 0.0  ;;  %vm1206_vm9 = vcmp.gt.f32.partialorder %v6344_v26, 0.0 }
 0x241   : > { %2511 = vadd.xlane.f32.xlu0 %v2510_v22  ;;  %v8298_v22 = vld [vmem:[#allocation53_spill] sm:$0xff]  ;;  %v4410_v7 = vceil.f32 %v8299_v25  ;;  %v4411_v43 = vfloor.f32 %v8299_v25  ;;  %v4428_v18 = vcvt.f32.s32 %v4427_v51  ;;  %8301 = vst [vmem:[#allocation56_spill] sm:$0xff] %v6398_v41  ;;  %vm4409_vm15 = vcmp.lt.s32.totalorder %v8299_v25, 0 }
 0x242   : > { %3791 = vmatpush.xpose.msk.msrb.mxu2 %vm1511_vm3, %v5388_v50  ;;  %v2143_v50 = vmul.f32 %v5697_v59, %v6335_v14  ;;  %3706 = vmatpush.xpose.msk.msrb.mxu3 %vm1511_vm3, %v6065_v13  ;;  %v4415_v13 = vceil.f32 %v8298_v22  ;;  %vm4414_vm13 = vcmp.lt.s32.totalorder %v8298_v22, 0  ;;  %v6384_v59 = vld [vmem:[%s8064_s2] ss:$0 sm:$0xff]  ;;  %v6403_v53 = vpop.f32.mrf.mxu1  ;;  %v6407_v61 = vpop.xlane.xlu0 %2535 }
 0x243   : > { %v901_v2 = vpop.f32.mrf.mxu0  ;;  %8303 = vst [vmem:[#allocation8_spill] sm:$0xff] %v6407_v61 }
 0x244   : > { %v2375_v19 = vsel %vm1511_vm3, %v2143_v50, 0.0  ;;  %vm1179_vm12 = vcmp.gt.f32.partialorder %v901_v2, 0.0  ;;  %v2731_v50 = vlaneseq }
 0x245   : > { %2376 = vadd.xlane.f32.xlu1 %v2375_v19  ;;  %v4416_v19 = vfloor.f32 %v8298_v22  ;;  %v6373_v58 = vsel %vm1179_vm12, 1.0, %v8221_v31  ;;  %v4412_v22 = vsel %vm4409_vm15, %v4410_v7, %v4411_v43 }
 0x246   : > { %3792 = vmatpush.xpose.msk.msrb.mxu2 %vm1511_vm3, %v5317_v28  ;;  %v4420_v28 = vceil.f32 %v5947_v24  ;;  %3707 = vmatpush.xpose.msk.msrb.mxu3 %vm1511_vm3, %v6046_v63  ;;  %v6392_v2 = vpop.xlane.xlu1 %2454  ;;  %v6409_v24 = vand.u32 127, %v2731_v50 }
 0x247   : > { %8300 = vst [vmem:[#allocation53_spill] sm:$0xff] %v6392_v2  ;;  %v4417_v51 = vsel %vm4414_vm13, %v4415_v13, %v4416_v19  ;;  %v8305_v2 = vld [vmem:[#allocation34_spill] sm:$0xff] }
 0x248   : > { %v4422_v63 = vsel %vm4419_vm11, %v4420_v28, %v4421_v40  ;;  %v8304_v28 = vld [vmem:[#allocation43_spill] sm:$0xff]  ;;  %v4400_v41 = vceil.f32 %v8305_v2  ;;  %v4401_v61 = vfloor.f32 %v8305_v2  ;;  %vm2796_vm4 = vcmp.eq.s32.totalorder %v4428_v18, %v6409_v24  ;;  %v8307_v18 = vld [vmem:[#allocation24_spill] sm:$0xff] }
 0x249   : > { %2508 = vadd.xlane.f32.xlu0 %v2507_v38  ;;  %v4405_v40 = vceil.f32 %v8304_v28  ;;  %v4406_v12 = vfloor.f32 %v8304_v28  ;;  %vm4404_vm1 = vcmp.lt.s32.totalorder %v8304_v28, 0  ;;  %v4418_v50 = vcvt.f32.s32 %v4417_v51 }
 0x24a   : > { %3793 = vmatpush.xpose.msk.msrb.mxu2 %vm1511_vm3, %v3647_v48  ;;  %v2144_v48 = vmul.f32 %v6384_v59, %v6373_v58  ;;  %3708 = vmatpush.xpose.msk.msrb.mxu3 %vm1511_vm3, %v6028_v57  ;;  %v8306_v57 = vld [vmem:[#allocation39_spill] sm:$0xff]  ;;  %vm4399_vm5 = vcmp.lt.s32.totalorder %v8305_v2, 0  ;;  %v4390_v25 = vceil.f32 %v8307_v18  ;;  %v4391_v7 = vfloor.f32 %v8307_v18 }
 0x24b   : > { %v904_v38 = vpop.f32.mrf.mxu0  ;;  %v4395_v13 = vceil.f32 %v8306_v57  ;;  %v4407_v43 = vsel %vm4404_vm1, %v4405_v40, %v4406_v12  ;;  %vm4394_vm0 = vcmp.lt.s32.totalorder %v8306_v57, 0  ;;  %vm2794_vm7 = vcmp.eq.s32.totalorder %v4418_v50, %v6409_v24  ;;  %v6462_v50 = vpop.xlane.xlu2 %2457 }
 0x24c   : > { %v2378_v27 = vsel %vm1511_vm3, %v2144_v48, 0.0  ;;  %v4423_v48 = vcvt.f32.s32 %v4422_v63  ;;  %vm1180_vm2 = vcmp.gt.f32.partialorder %v904_v38, 0.0  ;;  %v8155_v63 = vmov 1.0   ;;  %8309 = vst [vmem:[#allocation43_spill] sm:$0xff] %v6462_v50  ;;  %v8343_v50 = vld [vmem:[#allocation55_spill] sm:$0xff] }
 0x24d   : > { %2562 = vadd.xlane.f32.xlu1 %v2561_v62  ;;  %2379 = vadd.xlane.f32.xlu2 %v2378_v27  ;;  %v2203_v62 = vmul.f32 %v6384_v59, %v3645_v8  ;;  %v3587_v19 = vsel %vm1180_vm2, 1.0, %v8221_v31  ;;  %v2204_v27 = vmul.f32 %v6384_v59, %v3646_v10  ;;  %v4396_v38 = vfloor.f32 %v8306_v57 }
 0x24e   : > { %3794 = vmatpush.xpose.msk.msrb.mxu2 %vm1511_vm3, %v3646_v10  ;;  %3709 = vmatpush.xpose.msk.msrb.mxu3 %vm1511_vm3, %v6010_v42  ;;  %vm2795_vm6 = vcmp.eq.s32.totalorder %v4423_v48, %v6409_v24  ;;  %v4413_v10 = vcvt.f32.s32 %v4412_v22  ;;  %v4402_v48 = vsel %vm4399_vm5, %v4400_v41, %v4401_v61  ;;  %vm4389_vm8 = vcmp.lt.s32.totalorder %v8307_v18, 0  ;;  %v6450_v28 = vpop.xlane.xlu1 %2295  ;;  %v8308_v41 = vld [vmem:[#allocation29_spill] sm:$0xff]  ;;  %v8311_v18 = vld [vmem:[#allocation22_spill] sm:$0xff] }
 0x24f   : > { %3721 = vmatpush.xpose.msk.msra.mxu1 %vm1511_vm3, %v3587_v19  ;;  %v2555_v42 = vsel %vm1511_vm3, %v2203_v62, 0.0  ;;  %v2558_v40 = vsel %vm1511_vm3, %v2204_v27, 0.0  ;;  %v4408_v12 = vcvt.f32.s32 %v4407_v43  ;;  %v6458_v2 = vsel %vm1209_vm14, 1.0, %v8221_v31  ;;  %v6467_v27 = vpop.xlane.xlu0 %2292 }
 0x250   : > { %v4385_v61 = vceil.f32 %v8308_v41  ;;  %v4386_v62 = vfloor.f32 %v8308_v41  ;;  %v4397_v22 = vsel %vm4394_vm0, %v4395_v13, %v4396_v38  ;;  %vm4384_vm10 = vcmp.lt.s32.totalorder %v8308_v41, 0  ;;  %v8315_v41 = vld [vmem:[#allocation26_spill] sm:$0xff] }
 0x251   : > { %2556 = vadd.xlane.f32.xlu0 %v2555_v42  ;;  %vm2793_vm11 = vcmp.eq.s32.totalorder %v4413_v10, %v6409_v24  ;;  %v4403_v56 = vcvt.f32.s32 %v4402_v48  ;;  %v6480_v57 = vsel %vm1206_vm9, 1.0, %v8221_v31  ;;  %v4392_v13 = vsel %vm4389_vm8, %v4390_v25, %v4391_v7 }
 0x252   : > { %3795 = vmatpush.xpose.msk.msrb.mxu2 %vm1511_vm3, %v3645_v8  ;;  %v2145_v8 = vmul.f32 %v6384_v59, %v3587_v19  ;;  %v988_v19 = vpop.f32.mrf.mxu1  ;;  %3710 = vmatpush.xpose.msk.msrb.mxu3 %vm1511_vm3, %v5993_v4  ;;  %vm2792_vm12 = vcmp.eq.s32.totalorder %v4408_v12, %v6409_v24  ;;  %v4398_v4 = vcvt.f32.s32 %v4397_v22  ;;  %v4387_v38 = vsel %vm4384_vm10, %v4385_v61, %v4386_v62  ;;  %v8316_v22 = vld [vmem:[#allocation21_spill] sm:$0xff] }
 0x253   : > { %3722 = vmatpush.xpose.msk.msra.mxu1 %vm1511_vm3, %v6373_v58  ;;  %v2174_v58 = vmul.f32 %v6384_v59, %v6458_v2  ;;  %vm1208_vm13 = vcmp.gt.f32.partialorder %v988_v19, 0.0  ;;  %vm2791_vm14 = vcmp.eq.s32.totalorder %v4403_v56, %v6409_v24  ;;  %v4393_v26 = vcvt.f32.s32 %v4392_v13  ;;  %v6512_v48 = vpop.xlane.xlu2 %2298 }
 0x254   : > { %v2381_v51 = vsel %vm1511_vm3, %v2145_v8, 0.0  ;;  %v8310_v8 = vld [vmem:[#allocation23_spill] sm:$0xff]  ;;  %v2171_v43 = vmul.f32 %v6384_v59, %v6480_v57  ;;  %v6499_v25 = vsel %vm1208_vm13, 1.0, %v8221_v31  ;;  %vm2790_vm15 = vcmp.eq.s32.totalorder %v4398_v4, %v6409_v24 }
 0x255   : > { %3796 = vmatmul.msk.f32.vlgmr.msrb.gmra.mxu2 %vm1511_vm3, %v6117_v39  ;;  %2559 = vadd.xlane.f32.xlu1 %v2558_v40  ;;  %v2468_v7 = vsel %vm1511_vm3, %v2174_v58, 0.0  ;;  %v4388_v10 = vcvt.f32.s32 %v4387_v38  ;;  %vm2789_vm1 = vcmp.eq.s32.totalorder %v4393_v26, %v6409_v24  ;;  %v8313_v40 = vld [vmem:[#allocation20_spill] sm:$0xff]  ;;  %v4110_v61 = vceil.f32 %v8315_v41  ;;  %v8319_v58 = vld [vmem:[#allocation19_spill] sm:$0xff] }
 0x256   : > { %3973 = vmatpush.msk.msra.mxu2 %vm2796_vm4, %v8155_v63  ;;  %2382 = vadd.xlane.f32.xlu2 %v2381_v51  ;;  %v6505_v42 = vpop.xlane.xlu1 %2544  ;;  %v2173_v51 = vmul.f32 %v6384_v59, %v6499_v25  ;;  %vm1207_vm4 = vcmp.gt.f32.partialorder %v6403_v53, 0.0  ;;  %v4111_v62 = vfloor.f32 %v8315_v41  ;;  %vm4109_vm5 = vcmp.lt.s32.totalorder %v8315_v41, 0  ;;  %v8317_v53 = vld [vmem:[#allocation33_spill] sm:$0xff]  ;;  %v8321_v26 = vld [vmem:[#allocation31_spill] sm:$0xff] }
 0x257   : > { %3746 = vmatpush.xpose.msk.msra.mxu3 %vm1511_vm3, %v8310_v8  ;;  %3723 = vmatpush.xpose.msk.msra.mxu1 %vm1511_vm3, %v6335_v14  ;;  %v2459_v14 = vsel %vm1511_vm3, %v2171_v43, 0.0  ;;  %8312 = vst [vmem:[#allocation34_spill] sm:$0xff] %v6505_v42  ;;  %v6517_v12 = vpop.xlane.xlu0 %2541  ;;  %vm2788_vm2 = vcmp.eq.s32.totalorder %v4388_v10, %v6409_v24  ;;  %v6530_v19 = vsel %vm1207_vm4, 1.0, %v8221_v31  ;;  %v4115_v56 = vceil.f32 %v8317_v53  ;;  %v8318_v8 = vld [vmem:[#allocation28_spill] sm:$0xff]  ;;  %v8325_v41 = vld [vmem:[#allocation35_spill] sm:$0xff] }
 0x258   : > { %3974 = vmatpush.msk.msra.mxu2 %vm2795_vm6, %v8155_v63  ;;  %3711 = vmatmul.msk.f32.vlgmr.msrb.gmra.mxu3 %vm1511_vm3, %v6117_v39  ;;  %8314 = vst [vmem:[#allocation39_spill] sm:$0xff] %v6517_v12  ;;  %v4120_v13 = vceil.f32 %v8318_v8  ;;  %v4121_v4 = vfloor.f32 %v8318_v8  ;;  %v6542_v31 = vsel %vm4109_vm5, %v4110_v61, %v4111_v62  ;;  %v4116_v38 = vfloor.f32 %v8317_v53  ;;  %v8326_v62 = vld [vmem:[#allocation18_spill] sm:$0xff]  ;;  %v8332_v61 = vld [vmem:[#allocation47_spill] sm:$0xff] }
 0x259   : > { %8320 = vst [vmem:[#allocation24_spill] sm:$0xff] %v6542_v31  ;;  %vm4119_vm6 = vcmp.lt.s32.totalorder %v8318_v8, 0  ;;  %v4126_v43 = vfloor.f32 %v8321_v26  ;;  %vm4114_vm0 = vcmp.lt.s32.totalorder %v8317_v53, 0  ;;  %vm4129_vm9 = vcmp.lt.s32.totalorder %v8332_v61, 0  ;;  %v8334_v53 = vld [vmem:[#allocation36_spill] sm:$0xff] }
 0x25a   : > { %3975 = vmatpush.msk.msra.mxu2 %vm2794_vm7, %v8155_v63  ;;  %vm4124_vm7 = vcmp.lt.s32.totalorder %v8321_v26, 0  ;;  %v4145_v31 = vceil.f32 %v8343_v50  ;;  %vm4144_vm13 = vcmp.lt.s32.totalorder %v8343_v50, 0  ;;  %vm4659_vm4 = vcmp.lt.s32.totalorder %v8334_v53, 0 }
 0x25b   : > { %3747 = vmatpush.xpose.msk.msra.mxu3 %vm1511_vm3, %v8311_v18  ;;  %3724 = vmatpush.xpose.msk.msra.mxu1 %vm1511_vm3, %v6312_v5  ;;  %v2465_v5 = vsel %vm1511_vm3, %v2173_v51, 0.0  ;;  %v6552_v18 = vpop.xlane.xlu2 %2307  ;;  %v8324_v51 = vld [vmem:[#allocation32_spill] sm:$0xff] }
 0x25c   : > { %3976 = vmatpush.msk.msra.mxu2 %vm2793_vm11, %v8155_v63 }
 0x25d   : > { %2460 = vadd.xlane.f32.xlu1 %v2459_v14 }
 0x25e   : > { %3977 = vmatpush.msk.msra.mxu2 %vm2792_vm12, %v8155_v63  ;;  %2469 = vadd.xlane.f32.xlu2 %v2468_v7 }
 0x25f   : > { %3748 = vmatpush.xpose.msk.msra.mxu3 %vm1511_vm3, %v8313_v40  ;;  %3725 = vmatpush.xpose.msk.msra.mxu1 %vm1511_vm3, %v6292_v9  ;;  %v2172_v9 = vmul.f32 %v6384_v59, %v6530_v19  ;;  %v6548_v59 = vpop.xlane.xlu1 %2304  ;;  %v6554_v7 = vpop.xlane.xlu0 %2301  ;;  %v4130_v40 = vceil.f32 %v8332_v61 }
 0x260   : > { %3978 = vmatpush.msk.msra.mxu2 %vm2791_vm14, %v8155_v63  ;;  %8322 = vst [vmem:[#allocation29_spill] sm:$0xff] %v6548_v59  ;;  %vm4154_vm14 = vcmp.lt.s32.totalorder %v6001_v15, 0 }
 0x261   : > { %8323 = vst [vmem:[#allocation23_spill] sm:$0xff] %v6554_v7  ;;  %v2462_v10 = vsel %vm1511_vm3, %v2172_v9, 0.0  ;;  %v8363_v7 = vld [vmem:[#allocation49_spill] sm:$0xff] }
 0x262   : > { %3979 = vmatpush.msk.msra.mxu2 %vm2790_vm15, %v8155_v63  ;;  %vm4654_vm15 = vcmp.lt.s32.totalorder %v8324_v51, 0 }
 0x263   : > { %3749 = vmatpush.xpose.msk.msra.mxu3 %vm1511_vm3, %v8316_v22  ;;  %3726 = vmatpush.xpose.msk.msra.mxu1 %vm1511_vm3, %v6272_v36  ;;  %v4125_v36 = vceil.f32 %v8321_v26  ;;  %v8327_v22 = vld [vmem:[#allocation13_spill] sm:$0xff] }
 0x264   : > { %3980 = vmatpush.msk.msra.mxu2 %vm2789_vm1, %v8155_v63  ;;  %vm4529_vm1 = vcmp.lt.s32.totalorder %v8325_v41, 0 }
 0x265   : > { %v6573_v14 = vsel %vm4124_vm7, %v4125_v36, %v4126_v43  ;;  %v8336_v36 = vld [vmem:[#allocation11_spill] sm:$0xff]  ;;  %v8342_v43 = vld [vmem:[#allocation62_spill] sm:$0xff] }
 0x266   : > { %3981 = vmatpush.msk.msra.mxu2 %vm2788_vm2, %v8155_v63  ;;  %2466 = vadd.xlane.f32.xlu2 %v2465_v5  ;;  %8330 = vst [vmem:[#allocation20_spill] sm:$0xff] %v6573_v14  ;;  %v6577_v63 = vsel %vm4114_vm0, %v4115_v56, %v4116_v38  ;;  %v8333_v5 = vld [vmem:[#allocation48_spill] sm:$0xff]  ;;  %v4146_v56 = vfloor.f32 %v8343_v50  ;;  %vm4149_vm12 = vcmp.lt.s32.totalorder %v8342_v43, 0  ;;  %vm4164_vm2 = vcmp.lt.s32.totalorder %v6059_v16, 0 }
 0x267   : > { %3750 = vmatpush.xpose.msk.msra.mxu3 %vm1511_vm3, %v8319_v58  ;;  %3727 = vmatpush.xpose.msk.msra.mxu1 %vm1511_vm3, %v6254_v49  ;;  %v6569_v58 = vsel %vm4119_vm6, %v4120_v13, %v4121_v4  ;;  %v8329_v49 = vld [vmem:[#allocation40_spill] sm:$0xff]  ;;  %8331 = vst [vmem:[#allocation26_spill] sm:$0xff] %v6577_v63  ;;  %v4141_v8 = vfloor.f32 %v8333_v5  ;;  %vm4139_vm10 = vcmp.lt.s32.totalorder %v8333_v5, 0  ;;  %v8351_v63 = vld [vmem:[#allocation15_spill] sm:$0xff]  ;;  %vm4159_vm6 = vcmp.lt.s32.totalorder %v6036_v32, 0 }
 0x268   : > { %8328 = vst [vmem:[#allocation22_spill] sm:$0xff] %v6569_v58  ;;  %v4665_v9 = vceil.f32 %v8329_v49  ;;  %v4666_v26 = vfloor.f32 %v8329_v49  ;;  %vm4664_vm8 = vcmp.lt.s32.totalorder %v8329_v49, 0  ;;  %v8335_v38 = vld [vmem:[#allocation16_spill] sm:$0xff]  ;;  %v4151_v49 = vfloor.f32 %v8342_v43 }
 0x269   : > { %v8338_v13 = vld [vmem:[#allocation52_spill] sm:$0xff]  ;;  %v4161_v58 = vfloor.f32 %v6036_v32  ;;  %vm4169_vm0 = vcmp.lt.s32.totalorder %v6091_v30, 0 }
 0x26a   : > { %3728 = vmatmul.msk.f32.vlgmr.msra.gmra.mxu1 %vm1511_vm3, %v6117_v39  ;;  %v4135_v42 = vceil.f32 %v8338_v13  ;;  %v6601_v12 = vsel %vm4664_vm8, %v4665_v9, %v4666_v26  ;;  %vm4134_vm11 = vcmp.lt.s32.totalorder %v8338_v13, 0  ;;  %v4150_v39 = vceil.f32 %v8342_v43  ;;  %v6616_v9 = vpop.xlane.xlu1 %2313  ;;  %v8348_v43 = vld [vmem:[#allocation45_spill] sm:$0xff] }
 0x26b   : > { %3751 = vmatpush.xpose.msk.msra.mxu3 %vm1511_vm3, %v8326_v62  ;;  %3763 = vmatpush.xpose.msk.msrb.mxu1 %vm1511_vm3, %v8327_v22  ;;  %v4131_v62 = vfloor.f32 %v8332_v61  ;;  %v4140_v22 = vceil.f32 %v8333_v5  ;;  %v4136_v5 = vfloor.f32 %v8338_v13  ;;  %8339 = vst [vmem:[#allocation21_spill] sm:$0xff] %v6601_v12  ;;  %v4155_v26 = vceil.f32 %v6001_v15  ;;  %v8357_v12 = vld [vmem:[#allocation14_spill] sm:$0xff] }
 0x26c   : > { %8344 = vst [vmem:[#allocation19_spill] sm:$0xff] %v6616_v9  ;;  %v4156_v61 = vfloor.f32 %v6001_v15  ;;  %v6639_v59 = vsel %vm4149_vm12, %v4150_v39, %v4151_v49  ;;  %v8352_v9 = vld [vmem:[#allocation60_spill] sm:$0xff]  ;;  %v8353_v39 = vld [vmem:[#allocation59_spill] sm:$0xff]  ;;  %v4171_v49 = vfloor.f32 %v6091_v30  ;;  %vm4179_vm8 = vcmp.lt.s32.totalorder %v6137_v37, 0 }
 0x26d   : > { %v6606_v4 = vsel %vm4139_vm10, %v4140_v22, %v4141_v8  ;;  %v6633_v50 = vsel %vm4134_vm11, %v4135_v42, %v4136_v5  ;;  %v6641_v22 = vsel %vm4144_vm13, %v4145_v31, %v4146_v56  ;;  %v8350_v42 = vld [vmem:[#allocation46_spill] sm:$0xff]  ;;  %v8354_v8 = vld [vmem:[#allocation57_spill] sm:$0xff]  ;;  %v4166_v56 = vfloor.f32 %v6059_v16 }
 0x26e   : > { %2463 = vadd.xlane.f32.xlu2 %v2462_v10  ;;  %v8337_v10 = vld [vmem:[#allocation44_spill] sm:$0xff]  ;;  %v6654_v31 = vsel %vm4154_vm14, %v4155_v26, %v4156_v61  ;;  %v4165_v61 = vceil.f32 %v6059_v16  ;;  %v4160_v5 = vceil.f32 %v6036_v32  ;;  %v8358_v26 = vld [vmem:[#allocation58_spill] sm:$0xff]  ;;  %vm4184_vm10 = vcmp.lt.s32.totalorder %v6157_v46, 0 }
 0x26f   : > { %3752 = vmatpush.xpose.msk.msra.mxu3 %vm1511_vm3, %v8335_v38  ;;  %3764 = vmatpush.xpose.msk.msrb.mxu1 %vm1511_vm3, %v8336_v36  ;;  %v6604_v38 = vpop.xlane.xlu2 %2316  ;;  %v6610_v36 = vsel %vm4129_vm9, %v4130_v40, %v4131_v62  ;;  %v8345_v40 = vld [vmem:[#allocation17_spill] sm:$0xff]  ;;  %vm4534_vm5 = vcmp.lt.s32.totalorder %v8337_v10, 0  ;;  %vm4544_vm9 = vcmp.lt.s32.totalorder %v8348_v43, 0  ;;  %v8365_v16 = vceil.f32 %v8324_v51 }
 0x270   : > { %8340 = vst [vmem:[#allocation33_spill] sm:$0xff] %v6604_v38  ;;  %v8346_v62 = vld [vmem:[#allocation9_spill] sm:$0xff]  ;;  %v6629_v38 = vpop.xlane.xlu0 %2310  ;;  %v6714_v44 = vsel %vm4159_vm6, %v4160_v5, %v4161_v58  ;;  %v8369_v58 = vld [vmem:[#allocation54_spill] sm:$0xff]  ;;  %v8370_v32 = vfloor.f32 %v8325_v41  ;;  %v8371_v5 = vceil.f32 %v8325_v41  ;;  %vm4549_vm11 = vcmp.lt.s32.totalorder %v8353_v39, 0 }
 0x271   : > { %8341 = vst [vmem:[#allocation28_spill] sm:$0xff] %v6610_v36  ;;  %vm4554_vm14 = vcmp.lt.s32.totalorder %v8350_v42, 0  ;;  %v8377_v41 = vfloor.f32 %v8337_v10  ;;  %vm4209_vm6 = vcmp.lt.s32.totalorder %v6241_v47, 0  ;;  %v8406_v0 = vfloor.f32 %v8350_v42 }
 0x272   : > { %8347 = vst [vmem:[#allocation31_spill] sm:$0xff] %v6629_v38  ;;  %v4180_v38 = vceil.f32 %v6137_v37 }
 0x273   : > { %3753 = vmatpush.xpose.msk.msra.mxu3 %vm1511_vm3, %v8345_v40  ;;  %3765 = vmatpush.xpose.msk.msrb.mxu1 %vm1511_vm3, %v8346_v62  ;;  %v8349_v40 = vld [vmem:[#allocation38_spill] sm:$0xff] }
 0x274   : > { %vm4539_vm7 = vcmp.lt.s32.totalorder %v8349_v40, 0 }
 0x277   : > { %3754 = vmatpush.xpose.msk.msra.mxu3 %vm1511_vm3, %v8351_v63  ;;  %3766 = vmatpush.xpose.msk.msrb.mxu1 %vm1511_vm3, %v8352_v9  ;;  %v8355_v63 = vld [vmem:[#allocation65_spill] sm:$0xff]  ;;  %v6664_v62 = vpop.xlane.xlu2 %2325  ;;  %v4170_v9 = vceil.f32 %v6091_v30 }
 0x278   : > { %8356 = vst [vmem:[#allocation32_spill] sm:$0xff] %v6664_v62  ;;  %v6686_v62 = vpop.xlane.xlu1 %2322  ;;  %v6696_v36 = vpop.xlane.xlu0 %2319  ;;  %v8367_v30 = vld [vmem:[#allocation73_spill] sm:$0xff] }
 0x279   : > { %8359 = vst [vmem:[#allocation35_spill] sm:$0xff] %v6686_v62  ;;  %v6700_v62 = vsel %vm4164_vm2, %v4165_v61, %v4166_v56  ;;  %v6710_v14 = vsel %vm4169_vm0, %v4170_v9, %v4171_v49  ;;  %v4185_v56 = vceil.f32 %v6157_v46  ;;  %v4186_v61 = vfloor.f32 %v6157_v46 }
 0x27a   : > { %8361 = vst [vmem:[#allocation18_spill] sm:$0xff] %v6696_v36  ;;  %v4585_v15 = vceil.f32 %v8367_v30  ;;  %v4586_v13 = vfloor.f32 %v8367_v30  ;;  %vm4584_vm12 = vcmp.lt.s32.totalorder %v8367_v30, 0  ;;  %v8380_v46 = vfloor.f32 %v8334_v53 }
 0x27b   : > { %3755 = vmatpush.xpose.msk.msra.mxu3 %vm1511_vm3, %v8357_v12  ;;  %3767 = vmatpush.xpose.msk.msrb.mxu1 %vm1511_vm3, %v8358_v26  ;;  %v4181_v26 = vfloor.f32 %v6137_v37  ;;  %v8362_v12 = vld [vmem:[#allocation12_spill] sm:$0xff]  ;;  %v4187_v37 = vsel %vm4184_vm10, %v4185_v56, %v4186_v61  ;;  %vm4189_vm0 = vcmp.lt.s32.totalorder %v6206_v60, 0  ;;  %v8403_v30 = vcvt.f32.s32 %v6710_v14 }
 0x27c   : > { %v6772_v61 = vsel %vm4584_vm12, %v4585_v15, %v4586_v13  ;;  %v8381_v13 = vceil.f32 %v8334_v53  ;;  %v4211_v53 = vfloor.f32 %v6241_v47 }
 0x27d   : > { %v4182_v9 = vsel %vm4179_vm8, %v4180_v38, %v4181_v26  ;;  %v4188_v26 = vcvt.f32.s32 %v4187_v37 }
 0x27e   : > { %v4183_v36 = vcvt.f32.s32 %v4182_v9  ;;  %v6792_v15 = vsel %vm4659_vm4, %v8381_v13, %v8380_v46  ;;  %vm4564_vm4 = vcmp.lt.s32.totalorder %v8355_v63, 0  ;;  %v8399_v46 = vceil.f32 %v8353_v39  ;;  %v8430_v13 = vld [vmem:[#allocation30_spill] sm:$0xff] }
 0x27f   : > { %3756 = vmatpush.xpose.msk.msra.mxu3 %vm1511_vm3, %v8362_v12  ;;  %3768 = vmatpush.xpose.msk.msrb.mxu1 %vm1511_vm3, %v8363_v7  ;;  %v6724_v49 = vpop.xlane.xlu2 %2334  ;;  %v8364_v12 = vfloor.f32 %v8324_v51  ;;  %v6752_v51 = vsel %vm4529_vm1, %v8371_v5, %v8370_v32  ;;  %v8378_v32 = vceil.f32 %v8337_v10  ;;  %8382 = vst [vmem:[#allocation48_spill] sm:$0xff] %v6792_v15  ;;  %v8383_v10 = vfloor.f32 %v8349_v40 }
 0x280   : > { %8372 = vst [vmem:[#allocation40_spill] sm:$0xff] %v6752_v51  ;;  %v6760_v38 = vpop.xlane.xlu1 %2331  ;;  %v6768_v5 = vpop.xlane.xlu0 %2328  ;;  %vm4194_vm1 = vcmp.lt.s32.totalorder %v6194_v54, 0  ;;  %vm6823_vm2 = vcmp.eq.s32.totalorder %v4188_v26, %v6409_v24  ;;  %v8390_v26 = vfloor.f32 %v8348_v43 }
 0x281   : > { %v6736_v7 = vsel %vm4654_vm15, %v8365_v16, %v8364_v12  ;;  %v8373_v16 = vld [vmem:[#allocation76_spill] sm:$0xff]  ;;  %v6784_v9 = vsel %vm4534_vm5, %v8378_v32, %v8377_v41  ;;  %vm4559_vm15 = vcmp.lt.s32.totalorder %v8354_v8, 0  ;;  %v8384_v41 = vceil.f32 %v8349_v40 }
 0x282   : > { %8366 = vst [vmem:[#allocation13_spill] sm:$0xff] %v6736_v7  ;;  %v4176_v12 = vfloor.f32 %v8373_v16  ;;  %vm4174_vm13 = vcmp.lt.s32.totalorder %v8373_v16, 0  ;;  %vm6850_vm5 = vcmp.eq.s32.totalorder %v4183_v36, %v6409_v24 }
 0x283   : > { %3757 = vmatpush.xpose.msk.msra.mxu3 %vm1511_vm3, %v8368_v52  ;;  %3769 = vmatpush.xpose.msk.msrb.mxu1 %vm1511_vm3, %v8369_v58  ;;  %v4175_v52 = vceil.f32 %v8373_v16  ;;  %8379 = vst [vmem:[#allocation47_spill] sm:$0xff] %v6784_v9  ;;  %v6805_v32 = vsel %vm4539_vm7, %v8384_v41, %v8383_v10  ;;  %v8387_v41 = vld [vmem:[#allocation37_spill] sm:$0xff]  ;;  %v4190_v10 = vceil.f32 %v6206_v60  ;;  %vm4199_vm7 = vcmp.lt.s32.totalorder %v6244_v20, 0  ;;  %v8419_v58 = vld [vmem:[#allocation27_spill] sm:$0xff] }
 0x284   : > { %8385 = vst [vmem:[#allocation36_spill] sm:$0xff] %v6805_v32  ;;  %v8398_v16 = vfloor.f32 %v8353_v39 }
 0x285   : > { %v4177_v37 = vsel %vm4174_vm13, %v4175_v52, %v4176_v12  ;;  %v4210_v12 = vceil.f32 %v6241_v47  ;;  %v4191_v52 = vfloor.f32 %v6206_v60  ;;  %vm4224_vm13 = vcmp.lt.s32.totalorder %v6338_v29, 0  ;;  %v8429_v60 = vld [vmem:[#allocation94_spill] sm:$0xff] }
 0x286   : > { %v4178_v56 = vcvt.f32.s32 %v4177_v37  ;;  %v6877_v21 = vsel %vm4549_vm11, %v8399_v46, %v8398_v16  ;;  %v4216_v36 = vfloor.f32 %v8429_v60 }
 0x287   : > { %3758 = vmatpush.xpose.msk.msra.mxu3 %vm1511_vm3, %v6458_v2  ;;  %3770 = vmatpush.xpose.msk.msrb.mxu1 %vm1511_vm3, %v8376_v3  ;;  %v4195_v3 = vceil.f32 %v6194_v54  ;;  %v4196_v2 = vfloor.f32 %v6194_v54  ;;  %v6811_v7 = vpop.xlane.xlu2 %2343  ;;  %v6896_v46 = vsel %vm4209_vm6, %v4210_v12, %v4211_v53  ;;  %v6900_v16 = vsel %vm4189_vm0, %v4190_v10, %v4191_v52  ;;  %v6983_v54 = vld [vmem:[%s8064_s2] sm:$0x1] }
 0x288   : > { %v6831_v40 = vpop.xlane.xlu1 %2340  ;;  %vm6866_vm8 = vcmp.eq.s32.totalorder %v4178_v56, %v6409_v24  ;;  %v8420_v53 = vcvt.f32.s32 %v6654_v31  ;;  %v8426_v31 = vcvt.f32.s32 %v6639_v59  ;;  %v4215_v10 = vceil.f32 %v8429_v60  ;;  %v8435_v56 = vld [vmem:[#allocation92_spill] sm:$0xff] }
 0x289   : > { %v4255_v59 = vceil.f32 %v6552_v18 }
 0x28a   : > { %vm6976_vm12 = vcmp.eq.s32.totalorder %v8420_v53, %v6409_v24  ;;  %v8449_v53 = vld [vmem:[#allocation20_spill] sm:$0xff] }
 0x28b   : > { %3759 = vmatpush.xpose.msk.msra.mxu3 %vm1511_vm3, %v6499_v25  ;;  %3771 = vmatpush.xpose.msk.msrb.mxu1 %vm1511_vm3, %v8387_v41  ;;  %v6835_v25 = vsel %vm4194_vm1, %v4195_v3, %v4196_v2  ;;  %v8391_v41 = vceil.f32 %v8348_v43  ;;  %v4200_v43 = vceil.f32 %v6244_v20  ;;  %v4201_v3 = vfloor.f32 %v6244_v20  ;;  %v6858_v2 = vpop.xlane.xlu0 %2337 }
 0x28c   : > { %vm4214_vm1 = vcmp.lt.s32.totalorder %v8429_v60, 0  ;;  %v4235_v20 = vceil.f32 %v6450_v28  ;;  %v8443_v60 = vld [vmem:[#allocation96_spill] sm:$0xff] }
 0x28d   : > { %v6843_v37 = vsel %vm4544_vm9, %v8391_v41, %v8390_v26  ;;  %v8395_v26 = vld [vmem:[#allocation42_spill] sm:$0xff]  ;;  %vm6890_vm9 = vcmp.eq.s32.totalorder %v8403_v30, %v6409_v24  ;;  %v6914_v47 = vsel %vm4199_vm7, %v4200_v43, %v4201_v3  ;;  %v8413_v43 = vfloor.f32 %v8354_v8 }
 0x28e   : > { %8392 = vst [vmem:[#allocation16_spill] sm:$0xff] %v6843_v37  ;;  %v8414_v3 = vceil.f32 %v8354_v8  ;;  %v8424_v30 = vceil.f32 %v8355_v63  ;;  %v4225_v8 = vceil.f32 %v6338_v29  ;;  %vm4234_vm7 = vcmp.lt.s32.totalorder %v6450_v28, 0 }
 0x28f   : > { %3760 = vmatpush.xpose.msk.msra.mxu3 %vm1511_vm3, %v6530_v19  ;;  %3772 = vmatpush.xpose.msk.msrb.mxu1 %vm1511_vm3, %v8395_v26  ;;  %v6885_v9 = vpop.xlane.xlu2 %2352  ;;  %v8407_v26 = vceil.f32 %v8350_v42  ;;  %v8410_v42 = vcvt.f32.s32 %v6700_v62  ;;  %v8425_v19 = vld [vmem:[#allocation90_spill] sm:$0xff]  ;;  %v8431_v62 = vcvt.f32.s32 %v6641_v22  ;;  %v8436_v22 = vcvt.f32.s32 %v6606_v4 }
 0x290   : > { %v6940_v12 = vpop.xlane.xlu1 %2349 }
 0x291   : > { %v6908_v15 = vsel %vm4554_vm14, %v8407_v26, %v8406_v0  ;;  %v8409_v0 = vld [vmem:[#allocation41_spill] sm:$0xff]  ;;  %vm6927_vm10 = vcmp.eq.s32.totalorder %v8410_v42, %v6409_v24  ;;  %v6937_v26 = vsel %vm4559_vm15, %v8414_v3, %v8413_v43  ;;  %v8416_v3 = vcvt.f32.s32 %v6714_v44 }
 0x292   : > { %v4226_v43 = vfloor.f32 %v6338_v29  ;;  %vm4204_vm14 = vcmp.lt.s32.totalorder %v8425_v19, 0  ;;  %vm7009_vm15 = vcmp.eq.s32.totalorder %v8426_v31, %v6409_v24  ;;  %v4240_v44 = vceil.f32 %v6512_v48 }
 0x293   : > { %3761 = vmatpush.xpose.msk.msra.mxu3 %vm1511_vm3, %v6480_v57  ;;  %3773 = vmatpush.xpose.msk.msrb.mxu1 %vm1511_vm3, %v8409_v0  ;;  %v8415_v0 = vmov 1.0   ;;  %vm6954_vm11 = vcmp.eq.s32.totalorder %v8416_v3, %v6409_v24  ;;  %v6962_v57 = vpop.xlane.xlu0 %2346  ;;  %v8423_v3 = vfloor.f32 %v8355_v63  ;;  %v4205_v63 = vceil.f32 %v8425_v19 }
 0x294   : > { %v4241_v42 = vfloor.f32 %v6512_v48  ;;  %v4256_v31 = vfloor.f32 %v6552_v18  ;;  %vm7042_vm0 = vcmp.eq.s32.totalorder %v8436_v22, %v6409_v24  ;;  %v7048_v55 = vsel %vm4224_vm13, %v4225_v8, %v4226_v43  ;;  %v8439_v43 = vld [vmem:[#allocation25_spill] sm:$0xff] }
 0x295   : > { %v7065_v29 = vsel %vm4214_vm1, %v4215_v10, %v4216_v36  ;;  %v8450_v10 = vcvt.f32.s32 %v8449_v53  ;;  %vm4329_vm13 = vcmp.lt.s32.totalorder %v6885_v9, 0  ;;  %vm4324_vm1 = vcmp.lt.s32.totalorder %v6940_v12, 0 }
 0x296   : > { %3762 = vmatmul.msk.f32.vlgmr.msra.gmra.mxu3 %vm1511_vm3, %v6983_v54 }
 0x297   : > { %3925 = vmatpush.msk.msrb.mxu3 %vm6823_vm2, %v8415_v0  ;;  %3774 = vmatpush.xpose.msk.msrb.mxu1 %vm1511_vm3, %v8419_v58  ;;  %v6993_v58 = vsel %vm4564_vm4, %v8424_v30, %v8423_v3  ;;  %v4206_v30 = vfloor.f32 %v8425_v19  ;;  %v2362_v3 = vpop.xlane.xlu2 %2361  ;;  %vm4239_vm2 = vcmp.lt.s32.totalorder %v6512_v48, 0  ;;  %vm7029_vm4 = vcmp.eq.s32.totalorder %v8431_v62, %v6409_v24  ;;  %v8465_v62 = vld [vmem:[#allocation31_spill] sm:$0xff] }
 0x298   : > { %v2359_v35 = vpop.xlane.xlu1 %2358  ;;  %v4345_v11 = vceil.f32 %v2362_v3  ;;  %v4346_v32 = vfloor.f32 %v2362_v3  ;;  %vm4344_vm6 = vcmp.lt.s32.totalorder %v2362_v3, 0  ;;  %v7061_v4 = vsel %vm4239_vm2, %v4240_v44, %v4241_v42 }
 0x299   : > { %3926 = vmatpush.msk.msrb.mxu3 %vm6850_vm5, %v8415_v0  ;;  %vm4254_vm5 = vcmp.lt.s32.totalorder %v6552_v18, 0  ;;  %v7052_v39 = vsel %vm4204_vm14, %v4205_v63, %v4206_v30  ;;  %v4340_v19 = vceil.f32 %v2359_v35  ;;  %v4341_v8 = vfloor.f32 %v2359_v35  ;;  %v8444_v18 = vld [vmem:[#allocation28_spill] sm:$0xff]  ;;  %v8459_v30 = vld [vmem:[#allocation19_spill] sm:$0xff] }
 0x29a   : > { %v8440_v63 = vcvt.f32.s32 %v6633_v50  ;;  %v7079_v48 = vsel %vm4254_vm5, %v4255_v59, %v4256_v31  ;;  %v4347_v44 = vsel %vm4344_vm6, %v4345_v11, %v4346_v32  ;;  %v8445_v59 = vcvt.f32.s32 %v8444_v18  ;;  %v8448_v18 = vld [vmem:[#allocation95_spill] sm:$0xff]  ;;  %v8454_v32 = vld [vmem:[#allocation29_spill] sm:$0xff] }
 0x29b   : > { %3927 = vmatpush.msk.msrb.mxu3 %vm6866_vm8, %v8415_v0  ;;  %3775 = vmatpush.xpose.msk.msrb.mxu1 %vm1511_vm3, %v8430_v13  ;;  %v4236_v13 = vfloor.f32 %v6450_v28  ;;  %v2356_v37 = vpop.xlane.xlu0 %2355  ;;  %v4330_v3 = vceil.f32 %v6885_v9  ;;  %v8453_v28 = vld [vmem:[#allocation23_spill] sm:$0xff]  ;;  %v4265_v52 = vceil.f32 %v8459_v30  ;;  %v4266_v11 = vfloor.f32 %v8459_v30 }
 0x29c   : > { %vm7073_vm8 = vcmp.eq.s32.totalorder %v8440_v63, %v6409_v24  ;;  %v4335_v36 = vceil.f32 %v2356_v37  ;;  %v4336_v22 = vfloor.f32 %v2356_v37  ;;  %v4348_v63 = vcvt.f32.s32 %v4347_v44  ;;  %v8455_v44 = vld [vmem:[#allocation22_spill] sm:$0xff] }
 0x29d   : > { %3928 = vmatpush.msk.msrb.mxu3 %vm6890_vm9, %v8415_v0  ;;  %vm4339_vm9 = vcmp.lt.s32.totalorder %v2359_v35, 0  ;;  %v7103_v14 = vsel %vm4234_vm7, %v4235_v20, %v4236_v13  ;;  %v4251_v35 = vfloor.f32 %v8454_v32  ;;  %v8461_v13 = vld [vmem:[#allocation26_spill] sm:$0xff]  ;;  %vm4264_vm5 = vcmp.lt.s32.totalorder %v8459_v30, 0 }
 0x29e   : > { %vm2780_vm2 = vcmp.eq.s32.totalorder %v4348_v63, %v6409_v24  ;;  %v8462_v20 = vcvt.f32.s32 %v8461_v13  ;;  %vm4319_vm6 = vcmp.lt.s32.totalorder %v6962_v57, 0  ;;  %v4316_v63 = vfloor.f32 %v6811_v7 }
 0x29f   : > { %3929 = vmatpush.msk.msrb.mxu3 %vm6927_vm10, %v8415_v0  ;;  %3776 = vmatpush.xpose.msk.msrb.mxu1 %vm1511_vm3, %v8439_v43  ;;  %vm7092_vm10 = vcmp.eq.s32.totalorder %v8445_v59, %v6409_v24  ;;  %v4331_v43 = vfloor.f32 %v6885_v9  ;;  %v4342_v59 = vsel %vm4339_vm9, %v4340_v19, %v4341_v8  ;;  %v4325_v19 = vceil.f32 %v6940_v12 }
 0x2a0   : > { %v4326_v8 = vfloor.f32 %v6940_v12  ;;  %vm4259_vm7 = vcmp.lt.s32.totalorder %v8465_v62, 0  ;;  %v4267_v41 = vsel %vm4264_vm5, %v4265_v52, %v4266_v11  ;;  %v4305_v30 = vceil.f32 %v6858_v2 }
 0x2a1   : > { %3930 = vmatpush.msk.msrb.mxu3 %vm6954_vm11, %v8415_v0  ;;  %vm4334_vm11 = vcmp.lt.s32.totalorder %v2356_v37, 0  ;;  %v4343_v37 = vcvt.f32.s32 %v4342_v59  ;;  %v4260_v59 = vceil.f32 %v8465_v62  ;;  %v4306_v31 = vfloor.f32 %v6858_v2 }
 0x2a2   : > { %v4327_v13 = vsel %vm4324_vm1, %v4325_v19, %v4326_v8  ;;  %v4310_v19 = vceil.f32 %v6831_v40  ;;  %v4311_v8 = vfloor.f32 %v6831_v40  ;;  %v4268_v52 = vcvt.f32.s32 %v4267_v41 }
 0x2a3   : > { %3931 = vmatpush.msk.msrb.mxu3 %vm6976_vm12, %v8415_v0  ;;  %3777 = vmatpush.xpose.msk.msrb.mxu1 %vm1511_vm3, %v8448_v18  ;;  %vm7113_vm12 = vcmp.eq.s32.totalorder %v8450_v10, %v6409_v24  ;;  %v4337_v10 = vsel %vm4334_vm11, %v4335_v36, %v4336_v22  ;;  %v8456_v18 = vcvt.f32.s32 %v8455_v44  ;;  %v4320_v36 = vceil.f32 %v6962_v57  ;;  %v8460_v44 = vld [vmem:[#allocation98_spill] sm:$0xff] }
 0x2a4   : > { %v4321_v22 = vfloor.f32 %v6962_v57  ;;  %v4338_v9 = vcvt.f32.s32 %v4337_v10  ;;  %vm2779_vm9 = vcmp.eq.s32.totalorder %v4343_v37, %v6409_v24  ;;  %vm4249_vm11 = vcmp.lt.s32.totalorder %v8454_v32, 0 }
 0x2a5   : > { %3932 = vmatpush.msk.msrb.mxu3 %vm7009_vm15, %v8415_v0  ;;  %vm7131_vm14 = vcmp.eq.s32.totalorder %v8456_v18, %v6409_v24  ;;  %vm4244_vm15 = vcmp.lt.s32.totalorder %v8453_v28, 0  ;;  %v4332_v18 = vsel %vm4329_vm13, %v4330_v3, %v4331_v43  ;;  %v4261_v3 = vfloor.f32 %v8465_v62 }
 0x2a6   : > { %v4315_v43 = vceil.f32 %v6811_v7  ;;  %v4333_v12 = vcvt.f32.s32 %v4332_v18  ;;  %v4322_v10 = vsel %vm4319_vm6, %v4320_v36, %v4321_v22  ;;  %vm2778_vm13 = vcmp.eq.s32.totalorder %v4338_v9, %v6409_v24 }
 0x2a7   : > { %3933 = vmatpush.msk.msrb.mxu3 %vm7029_vm4, %v8415_v0  ;;  %3778 = vmatpush.xpose.msk.msrb.mxu1 %vm1511_vm3, %v8460_v44  ;;  %vm7152_vm4 = vcmp.eq.s32.totalorder %v8462_v20, %v6409_v24  ;;  %v8466_v20 = vld [vmem:[#allocation24_spill] sm:$0xff]  ;;  %v4262_v11 = vsel %vm4259_vm7, %v4260_v59, %v4261_v3  ;;  %vm4304_vm1 = vcmp.lt.s32.totalorder %v6858_v2, 0  ;;  %v4323_v42 = vcvt.f32.s32 %v4322_v10  ;;  %v7237_v3 = vpop.xlane.xlu1 %2367  ;;  %v7267_v10 = vpop.xlane.xlu2 %2370 }
 0x2a8   : > { %v8467_v44 = vcvt.f32.s32 %v8466_v20  ;;  %v4300_v37 = vceil.f32 %v6724_v49  ;;  %v4301_v36 = vfloor.f32 %v6724_v49  ;;  %v8470_v22 = vceil.f32 %v8454_v32  ;;  %v8473_v20 = vld [vmem:[#allocation68_spill] sm:$0xff] }
 0x2a9   : > { %3934 = vmatpush.msk.msrb.mxu3 %vm7042_vm0, %v8415_v0  ;;  %v4263_v62 = vcvt.f32.s32 %v4262_v11  ;;  %v4295_v59 = vceil.f32 %v6760_v38  ;;  %v4307_v32 = vsel %vm4304_vm1, %v4305_v30, %v4306_v31  ;;  %v8472_v9 = vceil.f32 %v8453_v28  ;;  %v8477_v31 = vld [vmem:[#allocation35_spill] sm:$0xff] }
 0x2aa   : > { %vm7171_vm0 = vcmp.eq.s32.totalorder %v8467_v44, %v6409_v24  ;;  %3779 = vmatmul.msk.f32.vlgmr.msrb.gmra.mxu1 %vm1511_vm3, %v6983_v54  ;;  %vm4229_vm3 = vcmp.lt.s32.totalorder %v6467_v27, 0  ;;  %v4328_v54 = vcvt.f32.s32 %v4327_v13  ;;  %v4252_v18 = vsel %vm4249_vm11, %v8470_v22, %v4251_v35  ;;  %v8474_v44 = vld [vmem:[#allocation32_spill] sm:$0xff] }
 0x2ab   : > { %3935 = vmatpush.msk.msrb.mxu3 %vm7073_vm8, %v8415_v0  ;;  %3957 = vmatpush.msk.msra.mxu1 %vm2780_vm2, %v8415_v0  ;;  %vm4314_vm8 = vcmp.lt.s32.totalorder %v6811_v7, 0  ;;  %vm4299_vm2 = vcmp.lt.s32.totalorder %v6724_v49, 0  ;;  %v8471_v35 = vfloor.f32 %v8453_v28  ;;  %vm4219_vm5 = vcmp.lt.s32.totalorder %v8443_v60, 0 }
 0x2ac   : > { %v4317_v57 = vsel %vm4314_vm8, %v4315_v43, %v4316_v63  ;;  %vm4294_vm6 = vcmp.lt.s32.totalorder %v6760_v38, 0  ;;  %vm2775_vm7 = vcmp.eq.s32.totalorder %v4323_v42, %v6409_v24  ;;  %vm2764_vm8 = vcmp.eq.s32.totalorder %v4268_v52, %v6409_v24 }
 0x2ad   : > { %3936 = vmatpush.msk.msrb.mxu3 %vm7092_vm10, %v8415_v0  ;;  %3958 = vmatpush.msk.msra.mxu1 %vm2779_vm9, %v8415_v0  ;;  %vm4309_vm10 = vcmp.lt.s32.totalorder %v6831_v40, 0  ;;  %v4318_v53 = vcvt.f32.s32 %v4317_v57  ;;  %v4296_v40 = vfloor.f32 %v6760_v38  ;;  %v4247_v50 = vsel %vm4244_vm15, %v8472_v9, %v8471_v35 }
 0x2ae   : > { %v4312_v7 = vsel %vm4309_vm10, %v4310_v19, %v4311_v8  ;;  %v4290_v28 = vceil.f32 %v6768_v5  ;;  %v4291_v43 = vfloor.f32 %v6768_v5  ;;  %v4253_v63 = vcvt.f32.s32 %v4252_v18  ;;  %v8476_v8 = vld [vmem:[#allocation64_spill] sm:$0xff] }
 0x2af   : > { %3937 = vmatpush.msk.msrb.mxu3 %vm7113_vm12, %v8415_v0  ;;  %3959 = vmatpush.msk.msra.mxu1 %vm2778_vm13, %v8415_v0  ;;  %vm2777_vm12 = vcmp.eq.s32.totalorder %v4333_v12, %v6409_v24  ;;  %v4313_v2 = vcvt.f32.s32 %v4312_v7  ;;  %v4302_v13 = vsel %vm4299_vm2, %v4300_v37, %v4301_v36  ;;  %vm4574_vm15 = vcmp.lt.s32.totalorder %v8473_v20, 0  ;;  %v8480_v36 = vld [vmem:[#allocation18_spill] sm:$0xff] }
 0x2b0   : > { %vm2774_vm9 = vcmp.eq.s32.totalorder %v4318_v53, %v6409_v24  ;;  %vm2763_vm11 = vcmp.eq.s32.totalorder %v4263_v62, %v6409_v24  ;;  %v4308_v51 = vcvt.f32.s32 %v4307_v32  ;;  %v4285_v12 = vceil.f32 %v8474_v44  ;;  %v8481_v53 = vld [vmem:[#allocation33_spill] sm:$0xff] }
 0x2b1   : > { %3938 = vmatpush.msk.msrb.mxu3 %vm7131_vm14, %v8415_v0  ;;  %3960 = vmatpush.msk.msra.mxu1 %vm2777_vm12, %v8415_v0  ;;  %vm2776_vm14 = vcmp.eq.s32.totalorder %v4328_v54, %v6409_v24  ;;  %v4286_v41 = vfloor.f32 %v8474_v44  ;;  %v8475_v49 = vcvt.f32.s32 %v7079_v48  ;;  %v4297_v19 = vsel %vm4294_vm6, %v4295_v59, %v4296_v40 }
 0x2b2   : > { %vm4429_vm13 = vcmp.lt.s32.totalorder %v8476_v8, 0  ;;  %vm4284_vm1 = vcmp.lt.s32.totalorder %v8474_v44, 0  ;;  %vm2773_vm12 = vcmp.eq.s32.totalorder %v4313_v2, %v6409_v24  ;;  %v4303_v54 = vcvt.f32.s32 %v4302_v13 }
 0x2b3   : > { %3939 = vmatpush.msk.msrb.mxu3 %vm7152_vm4, %v8415_v0  ;;  %3961 = vmatpush.msk.msra.mxu1 %vm2776_vm14, %v8415_v0  ;;  %vm4569_vm4 = vcmp.lt.s32.totalorder %v6016_v1, 0  ;;  %vm2762_vm10 = vcmp.eq.s32.totalorder %v8475_v49, %v6409_v24  ;;  %v4248_v30 = vcvt.f32.s32 %v4247_v50  ;;  %vm4579_vm2 = vcmp.lt.s32.totalorder %v6042_v33, 0 }
 0x2b4   : > { %v4280_v57 = vceil.f32 %v8477_v31  ;;  %v4281_v48 = vfloor.f32 %v8477_v31  ;;  %v8478_v11 = vfloor.f32 %v6467_v27  ;;  %v8479_v52 = vceil.f32 %v6467_v27 }
 0x2b5   : > { %3940 = vmatpush.msk.msrb.mxu3 %vm7171_vm0, %v8415_v0  ;;  %3962 = vmatpush.msk.msra.mxu1 %vm2775_vm7, %v8415_v0  ;;  %vm4289_vm0 = vcmp.lt.s32.totalorder %v6768_v5, 0  ;;  %vm4279_vm14 = vcmp.lt.s32.totalorder %v8477_v31, 0  ;;  %vm2772_vm6 = vcmp.eq.s32.totalorder %v4308_v51, %v6409_v24  ;;  %vm2761_vm7 = vcmp.eq.s32.totalorder %v4253_v63, %v6409_v24 }
 0x2b6   : > { %3133 = vmatmul.f32.vlgmr.msrb.gmra.mxu3 %v8415_v0  ;;  %v4292_v38 = vsel %vm4289_vm0, %v4290_v28, %v4291_v43  ;;  %v4232_v42 = vsel %vm4229_vm3, %v8479_v52, %v8478_v11  ;;  %v4298_v37 = vcvt.f32.s32 %v4297_v19  ;;  %v4275_v7 = vceil.f32 %v8480_v36 }
 0x2b7   : > { %3941 = vmatpush.msk.msra.mxu3 %vm2764_vm8, %v8415_v0  ;;  %3963 = vmatpush.msk.msra.mxu1 %vm2774_vm9, %v8415_v0  ;;  %v4276_v22 = vfloor.f32 %v8480_v36  ;;  %v4238_v5 = vcvt.f32.s32 %v7103_v14  ;;  %v4287_v27 = vsel %vm4284_vm1, %v4285_v12, %v4286_v41  ;;  %vm4274_vm3 = vcmp.lt.s32.totalorder %v8480_v36, 0  ;;  %v7329_v41 = vpop.xlane.xlu0 %2364 }
 0x2b8   : > { %vm2771_vm8 = vcmp.eq.s32.totalorder %v4303_v54, %v6409_v24  ;;  %vm2760_vm0 = vcmp.eq.s32.totalorder %v4248_v30, %v6409_v24  ;;  %v4293_v18 = vcvt.f32.s32 %v4292_v38  ;;  %v4270_v62 = vceil.f32 %v8481_v53  ;;  %v7302_v32 = vpop.xlane.xlu1 %2376 }
 0x2b9   : > { %3942 = vmatpush.msk.msra.mxu3 %vm2763_vm11, %v8415_v0  ;;  %3964 = vmatpush.msk.msra.mxu1 %vm2773_vm12, %v8415_v0  ;;  %v4271_v59 = vfloor.f32 %v8481_v53  ;;  %v4233_v40 = vcvt.f32.s32 %v4232_v42  ;;  %v4282_v14 = vsel %vm4279_vm14, %v4280_v57, %v4281_v48  ;;  %vm4269_vm9 = vcmp.lt.s32.totalorder %v8481_v53, 0 }
 0x2ba   : > { %vm2770_vm11 = vcmp.eq.s32.totalorder %v4298_v37, %v6409_v24  ;;  %v8482_v35 = vcvt.f32.s32 %v7061_v4  ;;  %v4288_v9 = vcvt.f32.s32 %v4287_v27  ;;  %v4228_v50 = vcvt.f32.s32 %v7048_v55  ;;  %v8499_v27 = vld [vmem:[#allocation93_spill] sm:$0xff] }
 0x2bb   : > { %3943 = vmatpush.msk.msra.mxu3 %vm2762_vm10, %v8415_v0  ;;  %3965 = vmatpush.msk.msra.mxu1 %vm2772_vm6, %v8415_v0  ;;  %v4277_v2 = vsel %vm4274_vm3, %v4275_v7, %v4276_v22  ;;  %v8483_v28 = vfloor.f32 %v8443_v60  ;;  %v8484_v43 = vceil.f32 %v8443_v60  ;;  %v8485_v4 = vfloor.f32 %v6016_v1  ;;  %v8498_v22 = vld [vmem:[#allocation56_spill] sm:$0xff] }
 0x2bc   : > { %vm2759_vm10 = vcmp.eq.s32.totalorder %v8482_v35, %v6409_v24  ;;  %v8486_v13 = vceil.f32 %v6016_v1  ;;  %vm2769_vm1 = vcmp.eq.s32.totalorder %v4293_v18, %v6409_v24  ;;  %vm2758_vm12 = vcmp.eq.s32.totalorder %v4238_v5, %v6409_v24  ;;  %v8505_v35 = vld [vmem:[#allocation97_spill] sm:$0xff] }
 0x2bd   : > { %3944 = vmatpush.msk.msra.mxu3 %vm2761_vm7, %v8415_v0  ;;  %3966 = vmatpush.msk.msra.mxu1 %vm2771_vm8, %v8415_v0  ;;  %v4222_v63 = vsel %vm4219_vm5, %v8484_v43, %v8483_v28  ;;  %v4283_v55 = vcvt.f32.s32 %v4282_v14  ;;  %v4208_v44 = vcvt.f32.s32 %v7052_v39  ;;  %v4621_v12 = vfloor.f32 %v8435_v56 }
 0x2be   : > { %v4572_v51 = vsel %vm4569_vm4, %v8486_v13, %v8485_v4  ;;  %v4272_v60 = vsel %vm4269_vm9, %v4270_v62, %v4271_v59  ;;  %v4218_v1 = vcvt.f32.s32 %v7065_v29  ;;  %v8487_v49 = vfloor.f32 %v8473_v20  ;;  %v8513_v13 = vld [vmem:[#allocation43_spill] sm:$0xff] }
 0x2bf   : > { %3945 = vmatpush.msk.msra.mxu3 %vm2760_vm0, %v8415_v0  ;;  %3967 = vmatpush.msk.msra.mxu1 %vm2770_vm11, %v8415_v0  ;;  %v8488_v19 = vceil.f32 %v8473_v20  ;;  %vm2768_vm4 = vcmp.eq.s32.totalorder %v4288_v9, %v6409_v24  ;;  %vm2757_vm5 = vcmp.eq.s32.totalorder %v4233_v40, %v6409_v24  ;;  %v4278_v30 = vcvt.f32.s32 %v4277_v2  ;;  %v8530_v40 = vld [vmem:[#allocation84_spill] sm:$0xff] }
 0x2c0   : > { %v2380_v54 = vpop.xlane.xlu2 %2379  ;;  %v4223_v31 = vcvt.f32.s32 %v4222_v63  ;;  %v8489_v57 = vcvt.f32.s32 %v6896_v46  ;;  %v4573_v29 = vcvt.f32.s32 %v4572_v51  ;;  %v4568_v20 = vcvt.f32.s32 %v6993_v58  ;;  %v7406_v28 = vpop.xlane.xlu1 %2562 }
 0x2c1   : > { %3946 = vmatpush.msk.msra.mxu3 %vm2759_vm10, %v8415_v0  ;;  %3968 = vmatpush.msk.msra.mxu1 %vm2769_vm1, %v8415_v0  ;;  %v4577_v39 = vsel %vm4574_vm15, %v8488_v19, %v8487_v49  ;;  %vm2756_vm15 = vcmp.eq.s32.totalorder %v4228_v50, %v6409_v24  ;;  %v8492_v38 = vfloor.f32 %v8476_v8  ;;  %v8493_v11 = vceil.f32 %v8476_v8 }
 0x2c2   : > { %vm7347_vm14 = vcmp.eq.s32.totalorder %v8489_v57, %v6409_v24  ;;  %vm2767_vm6 = vcmp.eq.s32.totalorder %v4283_v55, %v6409_v24  ;;  %v4273_v52 = vcvt.f32.s32 %v4272_v60  ;;  %v8494_v42 = vfloor.f32 %v6042_v33  ;;  %v8517_v60 = vld [vmem:[#allocation53_spill] sm:$0xff] }
 0x2c3   : > { %3947 = vmatpush.msk.msra.mxu3 %vm2758_vm12, %v8415_v0  ;;  %3969 = vmatpush.msk.msra.mxu1 %vm2768_vm4, %v8415_v0  ;;  %v7361_v46 = vsel %vm4429_vm13, %v8493_v11, %v8492_v38  ;;  %v8495_v37 = vceil.f32 %v6042_v33  ;;  %vm7371_vm7 = vcmp.eq.s32.totalorder %v4208_v44, %v6409_v24  ;;  %v4578_v7 = vcvt.f32.s32 %v4577_v39 }
 0x2c4   : > { %v4640_v8 = vceil.f32 %v8498_v22  ;;  %v4641_v5 = vfloor.f32 %v8498_v22  ;;  %v4630_v18 = vceil.f32 %v8499_v27  ;;  %vm7381_vm13 = vcmp.eq.s32.totalorder %v4218_v1, %v6409_v24 }
 0x2c5   : > { %3948 = vmatpush.msk.msra.mxu3 %vm2757_vm5, %v8415_v0  ;;  %v4582_v36 = vsel %vm4579_vm2, %v8495_v37, %v8494_v42  ;;  %3970 = vmatpush.msk.msra.mxu1 %vm2767_vm6, %v8415_v0  ;;  %v4375_v53 = vceil.f32 %v2380_v54  ;;  %v4376_v62 = vfloor.f32 %v2380_v54  ;;  %vm2766_vm3 = vcmp.eq.s32.totalorder %v4278_v30, %v6409_v24 }
 0x2c6   : > { %vm2755_vm8 = vcmp.eq.s32.totalorder %v4223_v31, %v6409_v24  ;;  %v8502_v59 = vcvt.f32.s32 %v6914_v47  ;;  %v4631_v14 = vfloor.f32 %v8499_v27  ;;  %vm4374_vm11 = vcmp.lt.s32.totalorder %v2380_v54, 0 }
 0x2c7   : > { %3949 = vmatpush.msk.msra.mxu3 %vm2756_vm15, %v8415_v0  ;;  %3971 = vmatpush.msk.msra.mxu1 %vm2766_vm3, %v8415_v0  ;;  %v4583_v9 = vcvt.f32.s32 %v4582_v36  ;;  %vm7400_vm10 = vcmp.eq.s32.totalorder %v4573_v29, %v6409_v24  ;;  %v4495_v47 = vceil.f32 %v8505_v35  ;;  %v4496_v2 = vfloor.f32 %v8505_v35  ;;  %v2374_v29 = vpop.xlane.xlu0 %2373 }
 0x2c8   : > { %vm7391_vm0 = vcmp.eq.s32.totalorder %v8502_v59, %v6409_v24  ;;  %vm2765_vm1 = vcmp.eq.s32.totalorder %v4273_v52, %v6409_v24  ;;  %vm7410_vm12 = vcmp.eq.s32.totalorder %v4578_v7, %v6409_v24  ;;  %v8510_v63 = vcvt.f32.s32 %v6835_v25 }
 0x2c9   : > { %3950 = vmatpush.msk.msra.mxu3 %vm2755_vm8, %v8415_v0  ;;  %vm4504_vm15 = vcmp.lt.s32.totalorder %v8513_v13, 0  ;;  %v4505_v51 = vceil.f32 %v8513_v13  ;;  %v4506_v55 = vfloor.f32 %v8513_v13  ;;  %3972 = vmatpush.msk.msra.mxu1 %vm2765_vm1, %v8415_v0  ;;  %v8514_v25 = vcvt.f32.s32 %v6772_v61  ;;  %v2383_v39 = vpop.xlane.xlu2 %2382  ;;  %v8544_v61 = vld [vmem:[#allocation36_spill] sm:$0xff] }
 0x2ca   : > { %vm7417_vm4 = vcmp.eq.s32.totalorder %v8510_v63, %v6409_v24  ;;  %vm7433_vm3 = vcmp.eq.s32.totalorder %v4568_v20, %v6409_v24  ;;  %v4500_v1 = vceil.f32 %v8517_v60  ;;  %v4370_v49 = vceil.f32 %v7302_v32  ;;  %3173 = vmatmul.f32.vlgmr.msra.gmra.mxu1 %v8415_v0 }
 0x2cb   : > { %3951 = vmatpush.msk.msra.mxu3 %vm7381_vm13, %v8415_v0  ;;  %vm2828_vm6 = vcmp.eq.s32.totalorder %v8514_v25, %v6409_v24  ;;  %v4371_v19 = vfloor.f32 %v7302_v32  ;;  %v8518_v30 = vcvt.f32.s32 %v6900_v16  ;;  %v4377_v31 = vsel %vm4374_vm11, %v4375_v53, %v4376_v62 }
 0x2cc   : > { %4005 = vmatpush.msk.msrb.mxu1 %vm2828_vm6, %v8415_v0  ;;  %v4501_v57 = vfloor.f32 %v8517_v60  ;;  %vm4369_vm1 = vcmp.lt.s32.totalorder %v7302_v32, 0  ;;  %vm4379_vm5 = vcmp.lt.s32.totalorder %v2383_v39, 0  ;;  %vm2827_vm6 = vcmp.eq.s32.totalorder %v4583_v9, %v6409_v24 }
 0x2cd   : > { %vm7444_vm13 = vcmp.eq.s32.totalorder %v8518_v30, %v6409_v24  ;;  %3952 = vmatpush.msk.msra.mxu3 %vm7347_vm14, %v8415_v0  ;;  %v8521_v16 = vcvt.f32.s32 %v6937_v26  ;;  %v4365_v20 = vceil.f32 %v2374_v29  ;;  %v4366_v38 = vfloor.f32 %v2374_v29 }
 0x2ce   : > { %v4380_v11 = vceil.f32 %v2383_v39  ;;  %v4381_v52 = vfloor.f32 %v2383_v39  ;;  %4006 = vmatpush.msk.msrb.mxu1 %vm2827_vm6, %v8415_v0  ;;  %vm4469_vm11 = vcmp.lt.s32.totalorder %v6219_v6, 0  ;;  %v4507_v48 = vsel %vm4504_vm15, %v4505_v51, %v4506_v55 }
 0x2cf   : > { %vm7459_vm9 = vcmp.eq.s32.totalorder %v8521_v16, %v6409_v24  ;;  %vm4499_vm14 = vcmp.lt.s32.totalorder %v8517_v60, 0  ;;  %vm4364_vm8 = vcmp.lt.s32.totalorder %v2374_v29, 0  ;;  %3953 = vmatpush.msk.msra.mxu3 %vm7371_vm7, %v8415_v0  ;;  %v4378_v26 = vcvt.f32.s32 %v4377_v31  ;;  %v7526_v60 = vpop.xlane.xlu1 %2559  ;;  %v8543_v29 = vld [vmem:[#allocation34_spill] sm:$0xff]  ;;  %v8587_v16 = vld [vmem:[#allocation8_spill] sm:$0xff] }
 0x2d0   : > { %vm4474_vm2 = vcmp.lt.s32.totalorder %v6223_v17, 0  ;;  %v4360_v42 = vceil.f32 %v7267_v10  ;;  %v4361_v37 = vfloor.f32 %v7267_v10  ;;  %4007 = vmatpush.msk.msrb.mxu1 %vm7410_vm12, %v8415_v0  ;;  %v4382_v36 = vsel %vm4379_vm5, %v4380_v11, %v4381_v52  ;;  %v8551_v52 = vld [vmem:[#allocation79_spill] sm:$0xff] }
 0x2d1   : > { %v4372_v7 = vsel %vm4369_vm1, %v4370_v49, %v4371_v19  ;;  %v8524_v58 = vcvt.f32.s32 %v6908_v15  ;;  %v4355_v53 = vceil.f32 %v7237_v3  ;;  %v4356_v62 = vfloor.f32 %v7237_v3  ;;  %3954 = vmatpush.msk.msra.mxu3 %vm7391_vm0, %v8415_v0  ;;  %v8537_v19 = vld [vmem:[#allocation16_spill] sm:$0xff] }
 0x2d2   : > { %vm4359_vm15 = vcmp.lt.s32.totalorder %v7267_v10, 0  ;;  %v4383_v59 = vcvt.f32.s32 %v4382_v36  ;;  %v4508_v32 = vcvt.f32.s32 %v4507_v48  ;;  %vm4354_vm12 = vcmp.lt.s32.totalorder %v7237_v3, 0  ;;  %4008 = vmatpush.msk.msrb.mxu1 %vm7400_vm10, %v8415_v0  ;;  %v8541_v10 = vld [vmem:[#allocation80_spill] sm:$0xff] }
 0x2d3   : > { %vm7484_vm7 = vcmp.eq.s32.totalorder %v8524_v58, %v6409_v24  ;;  %v4502_v15 = vsel %vm4499_vm14, %v4500_v1, %v4501_v57  ;;  %v4367_v9 = vsel %vm4364_vm8, %v4365_v20, %v4366_v38  ;;  %v8527_v43 = vcvt.f32.s32 %v6877_v21  ;;  %3955 = vmatpush.msk.msra.mxu3 %vm7417_vm4, %v8415_v0  ;;  %v7532_v1 = vpop.xlane.xlu2 %2469 }
 0x2d4   : > { %vm4464_vm0 = vcmp.lt.s32.totalorder %v8530_v40, 0  ;;  %vm2787_vm10 = vcmp.eq.s32.totalorder %v4383_v59, %v6409_v24  ;;  %vm7514_vm1 = vcmp.eq.s32.totalorder %v4378_v26, %v6409_v24  ;;  %v4373_v13 = vcvt.f32.s32 %v4372_v7  ;;  %4009 = vmatpush.msk.msrb.mxu1 %vm7433_vm3, %v8415_v0 }
 0x2d5   : > { %vm7504_vm5 = vcmp.eq.s32.totalorder %v8527_v43, %v6409_v24  ;;  %v8533_v21 = vfloor.f32 %v6305_v23  ;;  %v8534_v51 = vceil.f32 %v6305_v23  ;;  %vm8535_vm8 = vcmp.lt.s32.totalorder %v6305_v23, 0  ;;  %3982 = vmatpush.msk.msra.mxu2 %vm2787_vm10, %v8415_v0  ;;  %3956 = vmatpush.msk.msra.mxu3 %vm7444_vm13, %v8415_v0  ;;  %v8563_v43 = vld [vmem:[#allocation40_spill] sm:$0xff] }
 0x2d6   : > { %v4350_v25 = vceil.f32 %v7329_v41  ;;  %v4351_v4 = vfloor.f32 %v7329_v41  ;;  %vm8536_vm4 = vcmp.lt.s32.totalorder %v8505_v35, 0  ;;  %v4362_v49 = vsel %vm4359_vm15, %v4360_v42, %v4361_v37  ;;  %4010 = vmatpush.msk.msrb.mxu1 %vm7459_vm9, %v8415_v0  ;;  %3153 = vmatmul.f32.vlgmr.msra.gmra.mxu3 %v8415_v0  ;;  %v8552_v37 = vld [vmem:[#allocation47_spill] sm:$0xff] }
 0x2d7   : > { %v4492_v55 = vsel %vm8535_vm8, %v8534_v51, %v8533_v21  ;;  %v4497_v23 = vsel %vm8536_vm4, %v4495_v47, %v4496_v2  ;;  %v8538_v39 = vcvt.f32.s32 %v8537_v19  ;;  %vm4349_vm3 = vcmp.lt.s32.totalorder %v7329_v41, 0  ;;  %v8542_v47 = vld [vmem:[#allocation39_spill] sm:$0xff]  ;;  %3983 = vmatpush.msk.msra.mxu2 %vm7514_vm1, %v8415_v0 }
 0x2d8   : > { %v4503_v44 = vcvt.f32.s32 %v4502_v15  ;;  %v4368_v31 = vcvt.f32.s32 %v4367_v9  ;;  %v4357_v35 = vsel %vm4354_vm12, %v4355_v53, %v4356_v62  ;;  %v4645_v2 = vceil.f32 %v8542_v47  ;;  %4011 = vmatpush.msk.msrb.mxu1 %vm7484_vm7, %v8415_v0 }
 0x2d9   : > { %vm7545_vm6 = vcmp.eq.s32.totalorder %v8538_v39, %v6409_v24  ;;  %v4646_v57 = vfloor.f32 %v8542_v47  ;;  %vm4649_vm15 = vcmp.lt.s32.totalorder %v8543_v29, 0  ;;  %v8545_v3 = vcvt.f32.s32 %v8544_v61  ;;  %v8576_v61 = vld [vmem:[#allocation72_spill] sm:$0xff] }
 0x2da   : > { %v8548_v20 = vfloor.f32 %v6261_v34  ;;  %v8549_v38 = vceil.f32 %v6261_v34  ;;  %vm8550_vm12 = vcmp.lt.s32.totalorder %v6261_v34, 0  ;;  %vm2812_vm9 = vcmp.eq.s32.totalorder %v4508_v32, %v6409_v24  ;;  %v8559_v32 = vld [vmem:[#allocation21_spill] sm:$0xff]  ;;  %4012 = vmatpush.msk.msrb.mxu1 %vm7504_vm5, %v8415_v0 }
 0x2db   : > { %vm7568_vm13 = vcmp.eq.s32.totalorder %v8545_v3, %v6409_v24  ;;  %vm2785_vm8 = vcmp.eq.s32.totalorder %v4373_v13, %v6409_v24  ;;  %v4498_v54 = vcvt.f32.s32 %v4497_v23  ;;  %v4363_v48 = vcvt.f32.s32 %v4362_v49  ;;  %3989 = vmatpush.msk.msrb.mxu3 %vm2812_vm9, %v8415_v0  ;;  %v8577_v3 = vld [vmem:[#allocation71_spill] sm:$0xff] }
 0x2dc   : > { %v4487_v11 = vsel %vm8550_vm12, %v8549_v38, %v8548_v20  ;;  %3984 = vmatpush.msk.msra.mxu2 %vm2785_vm8, %v8415_v0  ;;  %v4493_v26 = vcvt.f32.s32 %v4492_v55  ;;  %v4358_v42 = vcvt.f32.s32 %v4357_v35  ;;  %v4352_v34 = vsel %vm4349_vm3, %v4350_v25, %v4351_v4  ;;  %v8569_v25 = vld [vmem:[#allocation75_spill] sm:$0xff]  ;;  %v2461_v35 = vpop.xlane.xlu1 %2460  ;;  %4013 = vmatpush.msk.msrb.mxu1 %vm7545_vm6, %v8415_v0  ;;  %v8578_v38 = vld [vmem:[#allocation13_spill] sm:$0xff] }
 0x2dd   : > { %v8553_v36 = vcvt.f32.s32 %v8552_v37  ;;  %v8556_v58 = vfloor.f32 %v6266_v45  ;;  %v8557_v53 = vceil.f32 %v6266_v45  ;;  %vm8558_vm12 = vcmp.lt.s32.totalorder %v6266_v45, 0 }
 0x2de   : > { %v4525_v41 = vceil.f32 %v7532_v1  ;;  %v4526_v59 = vfloor.f32 %v7532_v1  ;;  %vm2811_vm3 = vcmp.eq.s32.totalorder %v4503_v44, %v6409_v24  ;;  %vm2784_vm8 = vcmp.eq.s32.totalorder %v4368_v31, %v6409_v24  ;;  %v2467_v31 = vpop.xlane.xlu2 %2466  ;;  %4014 = vmatpush.msk.msrb.mxu1 %vm7568_vm13, %v8415_v0 }
 0x2df   : > { %vm7590_vm4 = vcmp.eq.s32.totalorder %v8553_v36, %v6409_v24  ;;  %v7600_v62 = vsel %vm8558_vm12, %v8557_v53, %v8556_v58  ;;  %v8560_v15 = vcvt.f32.s32 %v8559_v32  ;;  %v4650_v9 = vceil.f32 %v8543_v29  ;;  %3990 = vmatpush.msk.msrb.mxu3 %vm2811_vm3, %v8415_v0  ;;  %3985 = vmatpush.msk.msra.mxu2 %vm2784_vm8, %v8415_v0  ;;  %v8584_v36 = vld [vmem:[#allocation91_spill] sm:$0xff] }
 0x2e0   : > { %vm4524_vm12 = vcmp.lt.s32.totalorder %v7532_v1, 0  ;;  %v4488_v33 = vcvt.f32.s32 %v4487_v11  ;;  %v8564_v50 = vcvt.f32.s32 %v8563_v43  ;;  %v8567_v21 = vfloor.f32 %v6219_v6  ;;  %v8585_v32 = vld [vmem:[#allocation67_spill] sm:$0xff]  ;;  %4015 = vmatpush.msk.msrb.mxu1 %vm7590_vm4, %v8415_v0 }
 0x2e1   : > { %vm7613_vm10 = vcmp.eq.s32.totalorder %v8560_v15, %v6409_v24  ;;  %v8568_v51 = vceil.f32 %v6219_v6  ;;  %vm2810_vm3 = vcmp.eq.s32.totalorder %v4498_v54, %v6409_v24  ;;  %vm2783_vm8 = vcmp.eq.s32.totalorder %v4363_v48, %v6409_v24  ;;  %v8572_v6 = vld [vmem:[#allocation48_spill] sm:$0xff] }
 0x2e2   : > { %vm7624_vm7 = vcmp.eq.s32.totalorder %v8564_v50, %v6409_v24  ;;  %v4353_v4 = vcvt.f32.s32 %v4352_v34  ;;  %v8570_v23 = vfloor.f32 %v6223_v17  ;;  %v8571_v49 = vceil.f32 %v6223_v17  ;;  %3991 = vmatpush.msk.msrb.mxu3 %vm2810_vm3, %v8415_v0  ;;  %3986 = vmatpush.msk.msra.mxu2 %vm2783_vm8, %v8415_v0  ;;  %v8586_v15 = vld [vmem:[#allocation88_spill] sm:$0xff] }
 0x2e3   : > { %v4472_v55 = vsel %vm4469_vm11, %v8568_v51, %v8567_v21  ;;  %v8573_v39 = vcvt.f32.s32 %v8572_v6  ;;  %v4651_v63 = vfloor.f32 %v8543_v29  ;;  %vm2809_vm5 = vcmp.eq.s32.totalorder %v4493_v26, %v6409_v24  ;;  %4016 = vmatpush.msk.msrb.mxu1 %vm7624_vm7, %v8415_v0 }
 0x2e4   : > { %v4477_v19 = vsel %vm4474_vm2, %v8571_v49, %v8570_v23  ;;  %vm2782_vm9 = vcmp.eq.s32.totalorder %v4358_v42, %v6409_v24  ;;  %v4483_v17 = vcvt.f32.s32 %v7600_v62  ;;  %vm4444_vm1 = vcmp.lt.s32.totalorder %v8577_v3, 0  ;;  %3992 = vmatpush.msk.msrb.mxu3 %vm2809_vm5, %v8415_v0  ;;  %v8601_v49 = vld [vmem:[#allocation85_spill] sm:$0xff] }
 0x2e5   : > { %vm7649_vm11 = vcmp.eq.s32.totalorder %v8573_v39, %v6409_v24  ;;  %vm4629_vm14 = vcmp.lt.s32.totalorder %v8499_v27, 0  ;;  %v4527_v20 = vsel %vm4524_vm12, %v4525_v41, %v4526_v59  ;;  %v8579_v11 = vcvt.f32.s32 %v8578_v38  ;;  %3987 = vmatpush.msk.msra.mxu2 %vm2782_vm9, %v8415_v0 }
 0x2e6   : > { %vm4519_vm8 = vcmp.lt.s32.totalorder %v2467_v31, 0  ;;  %v4520_v48 = vceil.f32 %v2467_v31  ;;  %v4521_v26 = vfloor.f32 %v2467_v31  ;;  %vm2808_vm2 = vcmp.eq.s32.totalorder %v4488_v33, %v6409_v24  ;;  %v2464_v13 = vpop.xlane.xlu2 %2463  ;;  %v8605_v31 = vld [vmem:[#allocation86_spill] sm:$0xff] }
 0x2e7   : > { %vm7670_vm3 = vcmp.eq.s32.totalorder %v8579_v11, %v6409_v24  ;;  %v4478_v30 = vcvt.f32.s32 %v4477_v19  ;;  %v4473_v42 = vcvt.f32.s32 %v4472_v55  ;;  %v8582_v1 = vfloor.f32 %v8530_v40  ;;  %3993 = vmatpush.msk.msrb.mxu3 %vm2808_vm2, %v8415_v0 }
 0x2e8   : > { %v8583_v34 = vceil.f32 %v8530_v40  ;;  %vm2781_vm12 = vcmp.eq.s32.totalorder %v4353_v4, %v6409_v24  ;;  %v4510_v58 = vceil.f32 %v2461_v35  ;;  %v4511_v53 = vfloor.f32 %v2461_v35  ;;  %v8595_v4 = vld [vmem:[#allocation89_spill] sm:$0xff] }
 0x2e9   : > { %v4522_v62 = vsel %vm4519_vm8, %v4520_v48, %v4521_v26  ;;  %3988 = vmatpush.msk.msra.mxu2 %vm2781_vm12, %v8415_v0  ;;  %v4528_v41 = vcvt.f32.s32 %v4527_v20  ;;  %v4652_v40 = vsel %vm4649_vm15, %v4650_v9, %v4651_v63  ;;  %vm4434_vm9 = vcmp.lt.s32.totalorder %v8585_v32, 0 }
 0x2ea   : > { %v4467_v37 = vsel %vm4464_vm0, %v8583_v34, %v8582_v1  ;;  %vm4509_vm0 = vcmp.lt.s32.totalorder %v2461_v35, 0  ;;  %v4523_v59 = vcvt.f32.s32 %v4522_v62  ;;  %vm4744_vm5 = vcmp.lt.s32.totalorder %v8586_v15, 0  ;;  %3193 = vmatmul.f32.vlgmr.msra.gmra.mxu2 %v8415_v0  ;;  %v7769_v35 = vpop.xlane.xlu0 %2511  ;;  %v8611_v34 = vld [vmem:[#allocation81_spill] sm:$0xff]  ;;  %v8618_v62 = vld [vmem:[#allocation83_spill] sm:$0xff] }
 0x2eb   : > { %vm4619_vm13 = vcmp.lt.s32.totalorder %v8435_v56, 0  ;;  %vm4634_vm6 = vcmp.lt.s32.totalorder %v8587_v16, 0  ;;  %v4635_v33 = vceil.f32 %v8587_v16  ;;  %vm2807_vm15 = vcmp.eq.s32.totalorder %v4483_v17, %v6409_v24  ;;  %4021 = vmatpush.msk.msrb.mxu2 %vm7613_vm10, %v8415_v0 }
 0x2ec   : > { %v8588_v29 = vfloor.f32 %v8541_v10  ;;  %v8589_v9 = vceil.f32 %v8541_v10  ;;  %vm8590_vm2 = vcmp.lt.s32.totalorder %v8541_v10, 0  ;;  %v4636_v50 = vfloor.f32 %v8587_v16  ;;  %3994 = vmatpush.msk.msrb.mxu3 %vm2807_vm15, %v8415_v0 }
 0x2ed   : > { %v4468_v7 = vcvt.f32.s32 %v4467_v37  ;;  %vm8591_vm4 = vcmp.lt.s32.totalorder %v8542_v47, 0  ;;  %v8592_v51 = vfloor.f32 %v8551_v52  ;;  %v8593_v10 = vceil.f32 %v8551_v52  ;;  %4022 = vmatpush.msk.msrb.mxu2 %vm7649_vm11, %v8415_v0  ;;  %v8612_v37 = vld [vmem:[#allocation82_spill] sm:$0xff] }
 0x2ee   : > { %v4462_v43 = vsel %vm8590_vm2, %v8589_v9, %v8588_v29  ;;  %v4647_v21 = vsel %vm8591_vm4, %v4645_v2, %v4646_v57  ;;  %vm8594_vm8 = vcmp.lt.s32.totalorder %v8551_v52, 0  ;;  %vm4614_vm12 = vcmp.lt.s32.totalorder %v8595_v4, 0 }
 0x2ef   : > { %v4457_v55 = vsel %vm8594_vm8, %v8593_v10, %v8592_v51  ;;  %vm2806_vm10 = vcmp.eq.s32.totalorder %v4478_v30, %v6409_v24  ;;  %vm7731_vm15 = vcmp.eq.s32.totalorder %v4473_v42, %v6409_v24  ;;  %v4653_v47 = vcvt.f32.s32 %v4652_v40  ;;  %4023 = vmatpush.msk.msrb.mxu2 %vm7670_vm3, %v8415_v0 }
 0x2f0   : > { %v4512_v2 = vsel %vm4509_vm0, %v4510_v58, %v4511_v53  ;;  %3995 = vmatpush.msk.msrb.mxu3 %vm2806_vm10, %v8415_v0  ;;  %vm2816_vm2 = vcmp.eq.s32.totalorder %v4528_v41, %v6409_v24  ;;  %v4463_v57 = vcvt.f32.s32 %v4462_v43  ;;  %vm8598_vm7 = vcmp.lt.s32.totalorder %v8498_v22, 0 }
 0x2f1   : > { %v4642_v52 = vsel %vm8598_vm7, %v4640_v8, %v4641_v5  ;;  %vm7748_vm4 = vcmp.eq.s32.totalorder %v4523_v59, %v6409_v24  ;;  %vm4609_vm0 = vcmp.lt.s32.totalorder %v8601_v49, 0  ;;  %4017 = vmatpush.msk.msrb.mxu1 %vm2816_vm2, %v8415_v0  ;;  %v4648_v19 = vcvt.f32.s32 %v4647_v21 }
 0x2f2   : > { %vm4514_vm11 = vcmp.lt.s32.totalorder %v2464_v13, 0  ;;  %v4515_v6 = vceil.f32 %v2464_v13  ;;  %v4516_v39 = vfloor.f32 %v2464_v13  ;;  %3996 = vmatpush.msk.msrb.mxu3 %vm7731_vm15, %v8415_v0  ;;  %v4458_v22 = vcvt.f32.s32 %v4457_v55  ;;  %v8627_v55 = vld [vmem:[#allocation78_spill] sm:$0xff] }
 0x2f3   : > { %v8602_v8 = vfloor.f32 %v8569_v25  ;;  %v8603_v5 = vceil.f32 %v8569_v25  ;;  %vm8604_vm8 = vcmp.lt.s32.totalorder %v8569_v25, 0  ;;  %v4637_v63 = vsel %vm4634_vm6, %v4635_v33, %v4636_v50  ;;  %4018 = vmatpush.msk.msrb.mxu1 %vm7748_vm4, %v8415_v0 }
 0x2f4   : > { %v4513_v17 = vcvt.f32.s32 %v4512_v2  ;;  %vm4604_vm10 = vcmp.lt.s32.totalorder %v8605_v31, 0  ;;  %vm2804_vm15 = vcmp.eq.s32.totalorder %v4468_v7, %v6409_v24  ;;  %vm2841_vm3 = vcmp.eq.s32.totalorder %v4653_v47, %v6409_v24  ;;  %v8624_v7 = vld [vmem:[#allocation77_spill] sm:$0xff] }
 0x2f5   : > { %v4452_v44 = vsel %vm8604_vm8, %v8603_v5, %v8602_v8  ;;  %v4643_v20 = vcvt.f32.s32 %v4642_v52  ;;  %v4517_v38 = vsel %vm4514_vm11, %v4515_v6, %v4516_v39  ;;  %3997 = vmatpush.msk.msrb.mxu3 %vm2804_vm15, %v8415_v0  ;;  %4024 = vmatpush.msk.msrb.mxu2 %vm2841_vm3, %v8415_v0  ;;  %v8606_v25 = vfloor.f32 %v8577_v3  ;;  %v2509_v6 = vpop.xlane.xlu0 %2508 }
 0x2f6   : > { %v8607_v11 = vceil.f32 %v8577_v3  ;;  %v4632_v48 = vsel %vm4629_vm14, %v4630_v18, %v4631_v14  ;;  %v8608_v26 = vfloor.f32 %v8576_v61  ;;  %v8609_v30 = vceil.f32 %v8576_v61 }
 0x2f7   : > { %vm8610_vm6 = vcmp.lt.s32.totalorder %v8576_v61, 0  ;;  %v4518_v1 = vcvt.f32.s32 %v4517_v38  ;;  %vm4734_vm2 = vcmp.lt.s32.totalorder %v8611_v34, 0  ;;  %vm4599_vm7 = vcmp.lt.s32.totalorder %v8612_v37, 0 }
 0x2f8   : > { %v4447_v54 = vsel %vm4444_vm1, %v8607_v11, %v8606_v25  ;;  %v4442_v42 = vsel %vm8610_vm6, %v8609_v30, %v8608_v26  ;;  %vm2803_vm1 = vcmp.eq.s32.totalorder %v4463_v57, %v6409_v24  ;;  %vm2840_vm4 = vcmp.eq.s32.totalorder %v4648_v19, %v6409_v24  ;;  %v8630_v19 = vld [vmem:[#allocation74_spill] sm:$0xff] }
 0x2f9   : > { %v4453_v3 = vcvt.f32.s32 %v4452_v44  ;;  %v4638_v58 = vcvt.f32.s32 %v4637_v63  ;;  %v4616_v27 = vfloor.f32 %v8595_v4  ;;  %3998 = vmatpush.msk.msrb.mxu3 %vm2803_vm1, %v8415_v0  ;;  %4025 = vmatpush.msk.msrb.mxu2 %vm2840_vm4, %v8415_v0  ;;  %v8613_v18 = vfloor.f32 %v8584_v36 }
 0x2fa   : > { %v8614_v14 = vceil.f32 %v8584_v36  ;;  %vm8615_vm14 = vcmp.lt.s32.totalorder %v8584_v36, 0  ;;  %vm2814_vm11 = vcmp.eq.s32.totalorder %v4518_v1, %v6409_v24  ;;  %vm7811_vm8 = vcmp.eq.s32.totalorder %v4513_v17, %v6409_v24 }
 0x2fb   : > { %vm4729_vm15 = vcmp.lt.s32.totalorder %v8618_v62, 0  ;;  %vm2802_vm3 = vcmp.eq.s32.totalorder %v4458_v22, %v6409_v24  ;;  %vm2839_vm6 = vcmp.eq.s32.totalorder %v4643_v20, %v6409_v24  ;;  %v4448_v41 = vcvt.f32.s32 %v4447_v54  ;;  %4019 = vmatpush.msk.msrb.mxu1 %vm2814_vm11, %v8415_v0 }
 0x2fc   : > { %v4627_v61 = vsel %vm8615_vm14, %v8614_v14, %v8613_v18  ;;  %v4633_v40 = vcvt.f32.s32 %v4632_v48  ;;  %v8619_v36 = vfloor.f32 %v8586_v15  ;;  %v8620_v59 = vceil.f32 %v8586_v15  ;;  %3999 = vmatpush.msk.msrb.mxu3 %vm2802_vm3, %v8415_v0  ;;  %4026 = vmatpush.msk.msrb.mxu2 %vm2839_vm6, %v8415_v0 }
 0x2fd   : > { %v8621_v33 = vfloor.f32 %v8585_v32  ;;  %v8622_v29 = vceil.f32 %v8585_v32  ;;  %v8623_v43 = vceil.f32 %v8435_v56  ;;  %v4433_v50 = vcvt.f32.s32 %v7361_v46  ;;  %4020 = vmatpush.msk.msrb.mxu1 %vm7811_vm8, %v8415_v0  ;;  %v8625_v32 = vld [vmem:[#allocation87_spill] sm:$0xff] }
 0x2fe   : > { %v7825_v16 = vsel %vm4744_vm5, %v8620_v59, %v8619_v36  ;;  %vm4724_vm5 = vcmp.lt.s32.totalorder %v8624_v7, 0  ;;  %vm2801_vm1 = vcmp.eq.s32.totalorder %v4453_v3, %v6409_v24  ;;  %vm2838_vm4 = vcmp.eq.s32.totalorder %v4638_v58, %v6409_v24  ;;  %3233 = vmatmul.f32.vlgmr.msrb.gmra.mxu1 %v8415_v0  ;;  %v8641_v59 = vld [vmem:[#allocation70_spill] sm:$0xff] }
 0x2ff   : > { %v4437_v9 = vsel %vm4434_vm9, %v8622_v29, %v8621_v33  ;;  %v4622_v15 = vsel %vm4619_vm13, %v8623_v43, %v4621_v12  ;;  %v4443_v21 = vcvt.f32.s32 %v4442_v42  ;;  %v4628_v51 = vcvt.f32.s32 %v4627_v61  ;;  %4000 = vmatpush.msk.msrb.mxu3 %vm2801_vm1, %v8415_v0  ;;  %4027 = vmatpush.msk.msrb.mxu2 %vm2838_vm4, %v8415_v0 }
 0x300   : > { %vm4739_vm9 = vcmp.lt.s32.totalorder %v8625_v32, 0  ;;  %v4740_v10 = vceil.f32 %v8625_v32  ;;  %v4741_v56 = vfloor.f32 %v8625_v32  ;;  %v8626_v12 = vceil.f32 %v8595_v4  ;;  %v8643_v32 = vld [vmem:[#allocation66_spill] sm:$0xff] }
 0x301   : > { %vm4719_vm13 = vcmp.lt.s32.totalorder %v8627_v55, 0  ;;  %vm2800_vm14 = vcmp.eq.s32.totalorder %v4448_v41, %v6409_v24  ;;  %vm2837_vm11 = vcmp.eq.s32.totalorder %v4633_v40, %v6409_v24  ;;  %v4438_v45 = vcvt.f32.s32 %v4437_v9 }
 0x302   : > { %v4617_v46 = vsel %vm4614_vm12, %v8626_v12, %v4616_v27  ;;  %v4623_v47 = vcvt.f32.s32 %v4622_v15  ;;  %v4730_v2 = vceil.f32 %v8618_v62  ;;  %v4731_v57 = vfloor.f32 %v8618_v62  ;;  %4001 = vmatpush.msk.msrb.mxu3 %vm2800_vm14, %v8415_v0  ;;  %4028 = vmatpush.msk.msrb.mxu2 %vm2837_vm11, %v8415_v0  ;;  %v8642_v15 = vld [vmem:[#allocation69_spill] sm:$0xff] }
 0x303   : > { %v4748_v52 = vcvt.f32.s32 %v7825_v16  ;;  %v8628_v4 = vfloor.f32 %v8601_v49  ;;  %v8629_v13 = vceil.f32 %v8601_v49  ;;  %vm4714_vm12 = vcmp.lt.s32.totalorder %v8630_v19, 0 }
 0x304   : > { %vm2799_vm8 = vcmp.eq.s32.totalorder %v4443_v21, %v6409_v24  ;;  %vm2836_vm3 = vcmp.eq.s32.totalorder %v4628_v51, %v6409_v24  ;;  %vm7876_vm6 = vcmp.eq.s32.totalorder %v4433_v50, %v6409_v24  ;;  %v4618_v22 = vcvt.f32.s32 %v4617_v46 }
 0x305   : > { %v4612_v23 = vsel %vm4609_vm0, %v8629_v13, %v8628_v4  ;;  %v4595_v8 = vceil.f32 %v7769_v35  ;;  %v4596_v5 = vfloor.f32 %v7769_v35  ;;  %4002 = vmatpush.msk.msrb.mxu3 %vm2799_vm8, %v8415_v0  ;;  %4029 = vmatpush.msk.msrb.mxu2 %vm2836_vm3, %v8415_v0  ;;  %v4742_v49 = vsel %vm4739_vm9, %v4740_v10, %v4741_v56 }
 0x306   : > { %v8633_v44 = vfloor.f32 %v8605_v31  ;;  %v8634_v63 = vceil.f32 %v8605_v31  ;;  %vm4594_vm0 = vcmp.lt.s32.totalorder %v7769_v35, 0  ;;  %vm2798_vm1 = vcmp.eq.s32.totalorder %v4438_v45, %v6409_v24 }
 0x307   : > { %vm2835_vm4 = vcmp.eq.s32.totalorder %v4623_v47, %v6409_v24  ;;  %v4613_v20 = vcvt.f32.s32 %v4612_v23  ;;  %v4590_v38 = vceil.f32 %v2509_v6  ;;  %v4591_v25 = vfloor.f32 %v2509_v6  ;;  %4003 = vmatpush.msk.msrb.mxu3 %vm2798_vm1, %v8415_v0 }
 0x308   : > { %v4607_v17 = vsel %vm4604_vm10, %v8634_v63, %v8633_v44  ;;  %4030 = vmatpush.msk.msrb.mxu2 %vm2835_vm4, %v8415_v0  ;;  %v8635_v11 = vfloor.f32 %v8611_v34  ;;  %v8636_v54 = vceil.f32 %v8611_v34  ;;  %v8637_v48 = vfloor.f32 %v8612_v37 }
 0x309   : > { %v8638_v26 = vceil.f32 %v8612_v37  ;;  %vm4589_vm10 = vcmp.lt.s32.totalorder %v2509_v6, 0  ;;  %vm2834_vm9 = vcmp.eq.s32.totalorder %v4618_v22, %v6409_v24  ;;  %v4743_v42 = vcvt.f32.s32 %v4742_v49  ;;  %4004 = vmatpush.msk.msrb.mxu3 %vm7876_vm6, %v8415_v0  ;;  %v8646_v6 = vld [vmem:[#allocation51_spill] sm:$0xff] }
 0x30a   : > { %v4737_v31 = vsel %vm4734_vm2, %v8636_v54, %v8635_v11  ;;  %v4608_v1 = vcvt.f32.s32 %v4607_v17  ;;  %v4720_v3 = vceil.f32 %v8627_v55  ;;  %v4721_v58 = vfloor.f32 %v8627_v55  ;;  %4031 = vmatpush.msk.msrb.mxu2 %vm2834_vm9, %v8415_v0  ;;  %3213 = vmatmul.f32.vlgmr.msrb.gmra.mxu3 %v8415_v0  ;;  %v8644_v55 = vld [vmem:[#allocation63_spill] sm:$0xff]  ;;  %v2557_v17 = vpop.xlane.xlu0 %2556 }
 0x30b   : > { %v4602_v30 = vsel %vm4599_vm7, %v8638_v26, %v8637_v48  ;;  %v4732_v34 = vsel %vm4729_vm15, %v4730_v2, %v4731_v57  ;;  %v4597_v37 = vsel %vm4594_vm0, %v4595_v8, %v4596_v5  ;;  %vm2860_vm2 = vcmp.eq.s32.totalorder %v4748_v52, %v6409_v24  ;;  %v8645_v52 = vld [vmem:[#allocation61_spill] sm:$0xff] }
 0x30c   : > { %vm2833_vm7 = vcmp.eq.s32.totalorder %v4613_v20, %v6409_v24  ;;  %v4738_v27 = vcvt.f32.s32 %v4737_v31  ;;  %v4603_v18 = vcvt.f32.s32 %v4602_v30  ;;  %v4715_v14 = vceil.f32 %v8630_v19  ;;  %4037 = vmatpush.msk.msra.mxu3 %vm2860_vm2, %v8415_v0 }
 0x30d   : > { %v4716_v61 = vfloor.f32 %v8630_v19  ;;  %4032 = vmatpush.msk.msrb.mxu2 %vm2833_vm7, %v8415_v0  ;;  %v8639_v53 = vfloor.f32 %v8624_v7  ;;  %v8640_v35 = vceil.f32 %v8624_v7  ;;  %v4592_v41 = vsel %vm4589_vm10, %v4590_v38, %v4591_v25 }
 0x30e   : > { %vm2859_vm15 = vcmp.eq.s32.totalorder %v4743_v42, %v6409_v24  ;;  %vm2832_vm14 = vcmp.eq.s32.totalorder %v4608_v1, %v6409_v24  ;;  %v4733_v40 = vcvt.f32.s32 %v4732_v34  ;;  %v4598_v36 = vcvt.f32.s32 %v4597_v37  ;;  %v1916_v34 = vpop.f32.mrf.mxu1  ;;  %v1956_v37 = vpop.f32.mrf.mxu3 }
 0x30f   : > { %v4727_v62 = vsel %vm4724_vm5, %v8640_v35, %v8639_v53  ;;  %vm4709_vm11 = vcmp.lt.s32.totalorder %v8641_v59, 0  ;;  %v4710_v16 = vceil.f32 %v8641_v59  ;;  %v4711_v33 = vfloor.f32 %v8641_v59  ;;  %4038 = vmatpush.msk.msra.mxu3 %vm2859_vm15, %v8415_v0  ;;  %4033 = vmatpush.msk.msrb.mxu2 %vm2832_vm14, %v8415_v0 }
 0x310   : > { %v4722_v29 = vsel %vm4719_vm13, %v4720_v3, %v4721_v58  ;;  %vm2858_vm5 = vcmp.eq.s32.totalorder %v4738_v27, %v6409_v24  ;;  %vm2831_vm8 = vcmp.eq.s32.totalorder %v4603_v18, %v6409_v24  ;;  %v4728_v9 = vcvt.f32.s32 %v4727_v62  ;;  %v1936_v3 = vpop.f32.mrf.mxu2 }
 0x311   : > { %v4593_v43 = vcvt.f32.s32 %v4592_v41  ;;  %v4705_v50 = vceil.f32 %v8642_v15  ;;  %v4706_v7 = vfloor.f32 %v8642_v15  ;;  %4039 = vmatpush.msk.msra.mxu3 %vm2858_vm5, %v8415_v0  ;;  %4034 = vmatpush.msk.msrb.mxu2 %vm2831_vm8, %v8415_v0  ;;  %v4717_v21 = vsel %vm4714_vm12, %v4715_v14, %v4716_v61 }
 0x312   : > { %vm4704_vm3 = vcmp.lt.s32.totalorder %v8642_v15, 0  ;;  %vm2857_vm13 = vcmp.eq.s32.totalorder %v4733_v40, %v6409_v24  ;;  %vm2830_vm6 = vcmp.eq.s32.totalorder %v4598_v36, %v6409_v24  ;;  %v4723_v51 = vcvt.f32.s32 %v4722_v29 }
 0x313   : > { %v4700_v10 = vceil.f32 %v8643_v32  ;;  %v4701_v56 = vfloor.f32 %v8643_v32  ;;  %4040 = vmatpush.msk.msra.mxu3 %vm2857_vm13, %v8415_v0  ;;  %4035 = vmatpush.msk.msrb.mxu2 %vm2830_vm6, %v8415_v0  ;;  %v4712_v12 = vsel %vm4709_vm11, %v4710_v16, %v4711_v33  ;;  %vm4699_vm12 = vcmp.lt.s32.totalorder %v8643_v32, 0 }
 0x314   : > { %vm2856_vm0 = vcmp.eq.s32.totalorder %v4728_v9, %v6409_v24  ;;  %vm2829_vm1 = vcmp.eq.s32.totalorder %v4593_v43, %v6409_v24  ;;  %v4718_v46 = vcvt.f32.s32 %v4717_v21  ;;  %v4695_v45 = vceil.f32 %v8644_v55 }
 0x315   : > { %v4696_v47 = vfloor.f32 %v8644_v55  ;;  %4041 = vmatpush.msk.msra.mxu3 %vm2856_vm0, %v8415_v0  ;;  %4036 = vmatpush.msk.msrb.mxu2 %vm2829_vm1, %v8415_v0  ;;  %v4707_v2 = vsel %vm4704_vm3, %v4705_v50, %v4706_v7  ;;  %vm4694_vm4 = vcmp.lt.s32.totalorder %v8644_v55, 0  ;;  %vm2855_vm10 = vcmp.eq.s32.totalorder %v4723_v51, %v6409_v24 }
 0x316   : > { %3253 = vmatmul.f32.vlgmr.msrb.gmra.mxu2 %v8415_v0  ;;  %v4713_v57 = vcvt.f32.s32 %v4712_v12  ;;  %v4690_v4 = vceil.f32 %v8645_v52  ;;  %v4691_v13 = vfloor.f32 %v8645_v52  ;;  %v4702_v23 = vsel %vm4699_vm12, %v4700_v10, %v4701_v56  ;;  %v1976_v18 = vpop.f32.mrf.mxu1 }
 0x317   : > { %4042 = vmatpush.msk.msra.mxu3 %vm2855_vm10, %v8415_v0  ;;  %vm4689_vm9 = vcmp.lt.s32.totalorder %v8645_v52, 0  ;;  %vm2854_vm2 = vcmp.eq.s32.totalorder %v4718_v46, %v6409_v24  ;;  %v4708_v19 = vcvt.f32.s32 %v4707_v2  ;;  %v4685_v39 = vceil.f32 %v8646_v6 }
 0x318   : > { %v4686_v22 = vfloor.f32 %v8646_v6  ;;  %v4697_v8 = vsel %vm4694_vm4, %v4695_v45, %v4696_v47  ;;  %vm4684_vm7 = vcmp.lt.s32.totalorder %v8646_v6, 0  ;;  %vm2853_vm15 = vcmp.eq.s32.totalorder %v4713_v57, %v6409_v24  ;;  %v1996_v27 = vpop.f32.mrf.mxu2 }
 0x319   : > { %4043 = vmatpush.msk.msra.mxu3 %vm2854_vm2, %v8415_v0  ;;  %v4703_v5 = vcvt.f32.s32 %v4702_v23  ;;  %v4680_v49 = vceil.f32 %v7406_v28  ;;  %v4681_v44 = vfloor.f32 %v7406_v28  ;;  %v4692_v63 = vsel %vm4689_vm9, %v4690_v4, %v4691_v13  ;;  %v2016_v14 = vpop.f32.mrf.mxu3 }
 0x31a   : > { %vm4679_vm14 = vcmp.lt.s32.totalorder %v7406_v28, 0  ;;  %vm2852_vm11 = vcmp.eq.s32.totalorder %v4708_v19, %v6409_v24  ;;  %v4698_v20 = vcvt.f32.s32 %v4697_v8  ;;  %v4675_v38 = vceil.f32 %v7526_v60 }
 0x31b   : > { %4044 = vmatpush.msk.msra.mxu3 %vm2853_vm15, %v8415_v0  ;;  %v4676_v25 = vfloor.f32 %v7526_v60  ;;  %v4687_v11 = vsel %vm4684_vm7, %v4685_v39, %v4686_v22  ;;  %vm4674_vm5 = vcmp.lt.s32.totalorder %v7526_v60, 0  ;;  %vm2851_vm8 = vcmp.eq.s32.totalorder %v4703_v5, %v6409_v24 }
 0x31c   : > { %v4693_v54 = vcvt.f32.s32 %v4692_v63  ;;  %v4670_v31 = vceil.f32 %v2557_v17  ;;  %v4671_v48 = vfloor.f32 %v2557_v17  ;;  %v4682_v28 = vsel %vm4679_vm14, %v4680_v49, %v4681_v44 }
 0x31d   : > { %4045 = vmatpush.msk.msra.mxu3 %vm2852_vm11, %v8415_v0  ;;  %vm4669_vm3 = vcmp.lt.s32.totalorder %v2557_v17, 0  ;;  %vm2850_vm13 = vcmp.eq.s32.totalorder %v4698_v20, %v6409_v24  ;;  %v4688_v26 = vcvt.f32.s32 %v4687_v11  ;;  %v4677_v30 = vsel %vm4674_vm5, %v4675_v38, %v4676_v25 }
 0x31e   : > { %vm2849_vm6 = vcmp.eq.s32.totalorder %v4693_v54, %v6409_v24  ;;  %v4683_v42 = vcvt.f32.s32 %v4682_v28  ;;  %v4672_v1 = vsel %vm4669_vm3, %v4670_v31, %v4671_v48  ;;  %v4678_v60 = vcvt.f32.s32 %v4677_v30 }
 0x31f   : > { %4046 = vmatpush.msk.msra.mxu3 %vm2851_vm8, %v8415_v0  ;;  %vm2848_vm12 = vcmp.eq.s32.totalorder %v4688_v26, %v6409_v24  ;;  %v4673_v58 = vcvt.f32.s32 %v4672_v1  ;;  %vm4074_vm10 = vcmp.lt.s32.totalorder %v1936_v3, 0  ;;  %v4075_v61 = vceil.f32 %v1936_v3 }
 0x320   : > { %vm2847_vm0 = vcmp.eq.s32.totalorder %v4683_v42, %v6409_v24  ;;  %vm2846_vm1 = vcmp.eq.s32.totalorder %v4678_v60, %v6409_v24  ;;  %v4076_v53 = vfloor.f32 %v1936_v3  ;;  %v4080_v35 = vceil.f32 %v1956_v37  ;;  %v2056_v36 = vpop.f32.mrf.mxu2 }
 0x321   : > { %4047 = vmatpush.msk.msra.mxu3 %vm2850_vm13, %v8415_v0  ;;  %vm2845_vm4 = vcmp.eq.s32.totalorder %v4673_v58, %v6409_v24  ;;  %v4081_v62 = vfloor.f32 %v1956_v37  ;;  %vm4079_vm9 = vcmp.lt.s32.totalorder %v1956_v37, 0  ;;  %vm4084_vm2 = vcmp.lt.s32.totalorder %v1976_v18, 0 }
 0x322   : > { %v4085_v41 = vceil.f32 %v1976_v18  ;;  %v4086_v40 = vfloor.f32 %v1976_v18  ;;  %v4090_v59 = vceil.f32 %v1996_v27  ;;  %v4091_v24 = vfloor.f32 %v1996_v27 }
 0x323   : > { %4048 = vmatpush.msk.msra.mxu3 %vm2849_vm6, %v8415_v0  ;;  %v4095_v16 = vceil.f32 %v2016_v14  ;;  %v4096_v33 = vfloor.f32 %v2016_v14  ;;  %v4070_v29 = vceil.f32 %v1916_v34  ;;  %vm4089_vm7 = vcmp.lt.s32.totalorder %v1996_v27, 0 }
 0x324   : > { %vm4094_vm15 = vcmp.lt.s32.totalorder %v2016_v14, 0  ;;  %v4077_v9 = vsel %vm4074_vm10, %v4075_v61, %v4076_v53  ;;  %v4082_v43 = vsel %vm4079_vm9, %v4080_v35, %v4081_v62  ;;  %v4105_v15 = vceil.f32 %v2056_v36 }
 0x325   : > { %4049 = vmatpush.msk.msra.mxu3 %vm2848_vm12, %v8415_v0  ;;  %v4106_v50 = vfloor.f32 %v2056_v36  ;;  %vm4069_vm14 = vcmp.lt.s32.totalorder %v1916_v34, 0  ;;  %v4087_v7 = vsel %vm4084_vm2, %v4085_v41, %v4086_v40  ;;  %vm4104_vm11 = vcmp.lt.s32.totalorder %v2056_v36, 0 }
 0x326   : > { %v4092_v21 = vsel %vm4089_vm7, %v4090_v59, %v4091_v24  ;;  %v4097_v51 = vsel %vm4094_vm15, %v4095_v16, %v4096_v33  ;;  %v4078_v32 = vcvt.f32.s32 %v4077_v9  ;;  %v4083_v10 = vcvt.f32.s32 %v4082_v43 }
 0x327   : > { %4050 = vmatpush.msk.msra.mxu3 %vm2847_vm0, %v8415_v0  ;;  %v4088_v12 = vcvt.f32.s32 %v4087_v7  ;;  %v4107_v46 = vsel %vm4104_vm11, %v4105_v15, %v4106_v50  ;;  %v4093_v55 = vcvt.f32.s32 %v4092_v21  ;;  %v4098_v45 = vcvt.f32.s32 %v4097_v51  ;;  %v2036_v52 = vpop.f32.mrf.mxu1 }
 0x328   : > { %v2067_v2 = vrot.slane %v4078_v32, 7  ;;  %v2068_v57 = vrot.slane %v4083_v10, 6  ;;  %v4108_v4 = vcvt.f32.s32 %v4107_v46  ;;  %vm4099_vm5 = vcmp.lt.s32.totalorder %v2036_v52, 0 }
 0x329   : > { %4051 = vmatpush.msk.msra.mxu3 %vm2846_vm1, %v8415_v0  ;;  %v2069_v13 = vrot.slane %v4088_v12, 5  ;;  %v4100_v23 = vceil.f32 %v2036_v52  ;;  %v4101_v19 = vfloor.f32 %v2036_v52  ;;  %v2070_v6 = vrot.slane %v4093_v55, 4 }
 0x32a   : > { %v2071_v39 = vrot.slane %v4098_v45, 3  ;;  %vm2074_vm8 = vcmask 1040384   ;;  %vm2076_vm3 = vcmask 1042434   ;;  %vm2080_vm13 = vcmask 1044484  }
 0x32b   : > { %4052 = vmatpush.msk.msra.mxu3 %vm2845_vm4, %v8415_v0  ;;  %v4102_v22 = vsel %vm4099_vm5, %v4100_v23, %v4101_v19  ;;  %v2073_v5 = vrot.slane %v4108_v4, 1  ;;  %v2077_v44 = vsel %vm2076_vm3, %v2068_v57, %v2069_v13  ;;  %vm2082_vm6 = vcmask 1046534  }
 0x32c   : > { %3273 = vmatmul.f32.vlgmr.msra.gmra.mxu3 %v8415_v0  ;;  %v4071_v0 = vfloor.f32 %v1916_v34  ;;  %v4103_v8 = vcvt.f32.s32 %v4102_v22  ;;  %vm2078_vm12 = vcmask 1041408   ;;  %v2081_v17 = vsel %vm2080_vm13, %v2070_v6, %v2071_v39 }
 0x32d   : > { %vm2084_vm0 = vcmask 1045508   ;;  %vm2086_vm1 = vcmask 1043456  }
 0x32e   : > { %v4072_v56 = vsel %vm4069_vm14, %v4070_v29, %v4071_v0  ;;  %v2072_v63 = vrot.slane %v4103_v8, 2 }
 0x32f   : > { %v4073_v47 = vcvt.f32.s32 %v4072_v56 }
 0x330   : > { %v2083_v20 = vsel %vm2082_vm6, %v2072_v63, %v2073_v5 }
 0x331   : > { %v2075_v49 = vsel %vm2074_vm8, %v4073_v47, %v2067_v2  ;;  %v2085_v25 = vsel %vm2084_vm0, %v2081_v17, %v2083_v20 }
 0x332   : > { %v2079_v38 = vsel %vm2078_vm12, %v2075_v49, %v2077_v44 }
 0x333   : > { %v2087_v11 = vsel %vm2086_vm1, %v2079_v38, %v2085_v25 }
 0x334   : > { %2088 = vst [vmem:[%s195_s13] sm:$0xff] %v2087_v11 }
 0x335   : > { %4826 = shalt.err (!%p4823_p3)
}
 0x336   : > { %4749 = dma.vmem_to_hbm [thread:$0]  (%p4960_p5), %s3296_s14, 128, %s3298_s20, %s3279_s22  }
 0x337   : > { %s3306_s10 = scalar_lea.hbm %s8066_s4, %s4943_s19  ;;  %s201_s11 = scalar_lea.vmem [#allocation4], %s8011_s7 }
 0x338   : > { %s3308_s12 = sshll.u32 %s201_s11, 4  ;;  %s3310_s13 = sshll.u32 %s3306_s10, 4  ;;  %s3309_s12 = int_to_ptr.vmem [resolvable:$true] %s3308_s12  ;;  %s3311_s13 = int_to_ptr.hbm [resolvable:$true] %s3310_s13 }
 0x339   : > { %v3134_v54 = vpop.f32.mrf.mxu3  ;;  %s3284_s14 = scalar_lea.sflag [#allocation5], %s8011_s7  ;;  %s4841_s20 = sshra.s32 %s3311_s13, 4  ;;  %s4842_s20 = int_to_ptr.hbm [resolvable:$true] %s4841_s20 }
 0x33a   : > { %s4843_s22 = scalar_lea.hbm %s4842_s20, 1  ;;  %s4847_s27 = scalar_lea.hbm %s8066_s4, 4 }
 0x33b   : > { %p4844_p4 = scmp.ne.s32.totalorder %s4842_s20, %s4843_s22  ;;  %p4848_p9 = scmp.lt.s32.totalorder %s4842_s20, %s8066_s4 }
 0x33c   : > { %p4849_p10 = scmp.lt.s32.totalorder %s4847_s27, %s4843_s22 }
 0x33d   : > { %p4845_p7 = pnand %p4844_p4, %p4960_p5 }
 0x33e   : > { %p4850_p11 = por %p4849_p10, %p4848_p9 }
 0x33f   : > { %p4846_p8 = pneg %p4845_p7 }
 0x341   : > { %p4851_p12 = pnand %p4850_p11, %p4846_p8 }
 0x347   : > { %v3174_v28 = vpop.f32.mrf.mxu1 }
 0x359   : > { %v3154_v31 = vpop.f32.mrf.mxu3 }
 0x35a   : > { %v3155_v48 = vadd.f32 %v3154_v31, %v3134_v54 }
 0x35c   : > { %v3175_v30 = vadd.f32 %v3174_v28, %v3155_v48 }
 0x36d   : > { %v3194_v26 = vpop.f32.mrf.mxu2 }
 0x36e   : > { %v3195_v1 = vadd.f32 %v3194_v26, %v3175_v30 }
 0x37b   : > { %v3234_v3 = vpop.f32.mrf.mxu1 }
 0x38d   : > { %v3214_v42 = vpop.f32.mrf.mxu3 }
 0x38e   : > { %v3215_v60 = vadd.f32 %v3214_v42, %v3195_v1 }
 0x390   : > { %v3235_v34 = vadd.f32 %v3234_v3, %v3215_v60 }
 0x399   : > { %v3254_v58 = vpop.f32.mrf.mxu2 }
 0x39a   : > { %v3255_v37 = vadd.f32 %v3254_v58, %v3235_v34 }
 0x3af   : > { %v3274_v27 = vpop.f32.mrf.mxu3 }
 0x3b0   : > { %v3275_v18 = vadd.f32 %v3274_v27, %v3255_v37 }
 0x3b2   : > { %3277 = vst [vmem:[%s201_s11] sm:$0x1] %v3275_v18 }
 0x3b3   : > { %4854 = shalt.err (!%p4851_p12)
}
 0x3b4   : > { %4750 = dma.vmem_to_hbm [thread:$0]  (%p4960_p5), %s3309_s12, 16, %s3311_s13, %s3284_s14  }
 0x3b5 PF: > { %p4760_p13 = scmp.ge.s32.totalorder %s4893_s18, 2  ;;  %s3322_s7 = sand.u32 1, %s4881_s15  }
 0x3b6   : > { %s3323_s30 = scalar_lea.sflag [#allocation3], %s3322_s7 }
 0x3b7   : > { %p4754_p0 = pnand %p4760_p13, %p4964_p6 }
 0x3b9   : > { %p4755_p1 = pneg %p4754_p0 }
 0x3bb   : > { %4872 = dma.done.wait (%p4755_p1), %s3323_s30, 128  }
 0x3bc   : > { %4874 = vsyncadd (%p4755_p1), %s3323_s30, 4294967168  ;;  %s3333_s5 = scalar_lea.sflag [#allocation5], %s3322_s7 }
 0x3bd   : > { %4876 = dma.done.wait (%p4755_p1), %s3333_s5, 16  }
 0x3be   : > { %4878 = vsyncadd (%p4755_p1), %s3333_s5, 4294967280  ;;  %p18_p5 = scmp.ge.s32.totalorder %s4947_s21, 6   ;;  %s8647_s15 = smov %s4885_s16 }
 0x3bf   : > { %s8648_s16 = smov %s4889_s17  ;;  %s8649_s17 = smov %s4958_s24 }
 0x3c0   : > { %s8650_s18 = smov %s4947_s21  ;;  %20 = sbr.rel (!%p18_p5) target bundleno = 5 (0x5), region = 84 }
 0x3c5   :  { %3338 = vsyncpa [#allocation3], 1 }
 0x3c6   :  { %3340 = vsyncpa [#allocation3 + $0x1], 1 }
 0x3c7   :  { %3341 = vsyncpa [#allocation5], 1 }
 0x3c8   :  { %3343 = vsyncpa [#allocation5 + $0x1], 1 }

</bundles_post_ra>
